<compile_context>
chip_gen: v5e
topology: v5e:2x2
jax: 0.10.0
libtpu: 0.0.40
codegen_flags: <defaults>
</compile_context>

<pallas_src>
import functools

import jax
import jax.numpy as jnp
from jax.experimental import pallas as pl
from jax.experimental.pallas import tpu as pltpu


# ----------------------------- Pallas kernels ------------------------------ #

def _attn_proj_kernel(x_ref, wq_ref, wk_ref, wv_ref, wp_ref, bp_ref,
                      outa_ref, v_ref, *, num_heads, head_dim, scale):
    """One batch: qkv matmuls + per-head attention + projected attention part.

    x_ref:  (1, HW, C)  f32 tokens
    w*_ref: (C, C)      bf16 weights (resident across grid steps)
    bp_ref: (1, C)      f32 proj bias
    outa_ref: (1, HW, C) f32  = attn_concat @ W_proj + b_proj
    v_ref:    (1, HW, C) f32  = x @ W_v   (needed later for LePE)
    """
    x = x_ref[0].astype(jnp.bfloat16)                                    # (HW, C)

    q = jnp.dot(x, wq_ref[...], preferred_element_type=jnp.float32)     # (HW, C)
    k = jnp.dot(x, wk_ref[...], preferred_element_type=jnp.float32)
    v = jnp.dot(x, wv_ref[...], preferred_element_type=jnp.float32)

    v_ref[0] = v.astype(v_ref.dtype)

    # Fold softmax scale into q (touches hd elems/row instead of HW logits).
    q_s = (q * scale).astype(jnp.bfloat16)
    k_b = k.astype(jnp.bfloat16)
    v_b = v.astype(jnp.bfloat16)

    HW = x.shape[0]
    C = num_heads * head_dim
    acc = jnp.zeros((HW, C), jnp.float32)

    for h in range(num_heads):                       # static unrolled head loop
        sl = slice(h * head_dim, (h + 1) * head_dim)
        qh = q_s[:, sl]                              # (HW, hd) lane slice
        kh = k_b[:, sl]
        vh = v_b[:, sl]

        # logits = qh @ kh^T  (NT matmul on the MXU, f32 accumulation)
        logits = jax.lax.dot_general(
            qh, kh, (((1,), (1,)), ((), ())),
            preferred_element_type=jnp.float32)      # (HW, HW)
        logits = logits - jnp.max(logits, axis=-1, keepdims=True)
        p = jnp.exp(logits)
        p = p * pl.reciprocal(jnp.sum(p, axis=-1, keepdims=True), approx=True)

        out_h = jnp.dot(p.astype(jnp.bfloat16), vh,
                        preferred_element_type=jnp.float32)              # (HW, hd)

        # concat_h(out_h) @ W_proj  ==  sum_h  out_h @ W_proj[h*hd:(h+1)*hd, :]
        acc = acc + jnp.dot(out_h.astype(jnp.bfloat16), wp_ref[sl, :],
                            preferred_element_type=jnp.float32)

    acc = acc + bp_ref[...].astype(jnp.float32)      # (1, C) broadcast
    outa_ref[0] = acc.astype(outa_ref.dtype)


def _lepe_proj_kernel(outa_ref, vpad_ref, wl_ref, bl_ref, wp_ref, o_ref,
                      *, K, H, W):
    """One batch: depthwise KxK LePE conv on v, project it, add to attention part.

    outa_ref: (1, HW, C) f32   attn_concat @ W_proj + b_proj
    vpad_ref: (1, H+K-1, W+K-1, C) f32  zero-padded v image
    wl_ref:   (K, K, C)  f32   depthwise weights
    bl_ref:   (1, C)     f32   depthwise bias
    wp_ref:   (C, C)     bf16  proj weight
    o_ref:    (1, HW, C)       final output tokens
    """
    C = o_ref.shape[-1]
    HW = H * W

    w_all = wl_ref[...].astype(jnp.float32)          # load weights once (K, K, C)
    acc = jnp.zeros((1, H, W, C), jnp.float32)
    for i in range(K):
        for j in range(K):
            patch = vpad_ref[:, i:i + H, j:j + W, :].astype(jnp.float32)
            acc = acc + patch * w_all[i, j][None, None, None, :]
    acc = acc + bl_ref[...].astype(jnp.float32)[None, None]              # (1,1,1,C)

    lepe = acc.reshape(HW, C)
    # (attn + lepe) @ Wp + b  ==  [attn @ Wp + b]  +  lepe @ Wp
    contrib = jnp.dot(lepe.astype(jnp.bfloat16), wp_ref[...],
                      preferred_element_type=jnp.float32)
    o_ref[0] = (outa_ref[0].astype(jnp.float32) + contrib).astype(o_ref.dtype)


# ------------------------------ Host wrapper ------------------------------- #

def nchw_attention_lepe(x, params, *, num_heads, side_dwconv=5):
    B, C, H, W = x.shape
    assert C % num_heads == 0
    hd = C // num_heads
    scale = hd ** (-0.5)
    HW = H * W
    K = side_dwconv
    P = K // 2

    # Weight prep (host-side, once per trace): split qkv, cast matmul weights bf16.
    w_qkv = params["w_qkv"]                                   # (C, 3C) f32
    w_q = w_qkv[:, :C].astype(jnp.bfloat16)
    w_k = w_qkv[:, C:2 * C].astype(jnp.bfloat16)
    w_v = w_qkv[:, 2 * C:].astype(jnp.bfloat16)
    w_proj = params["w_proj"].astype(jnp.bfloat16)            # (C, C)
    b_proj = params["b_proj"].astype(jnp.float32)             # (1, C)
    w_lepe = params["w_lepe"].astype(jnp.float32)             # (K, K, C)
    b_lepe = params["b_lepe"].astype(jnp.float32)             # (1, C)

    # NCHW -> channels-last tokens (lane-dense on C).
    x_tok = jnp.transpose(x, (0, 2, 3, 1)).reshape(B, HW, C)

    weight_cc = pl.BlockSpec((C, C), lambda b: (0, 0))
    bias_spec = pl.BlockSpec((1, C), lambda b: (0, 0))
    tok_spec = pl.BlockSpec((1, HW, C), lambda b: (b, 0, 0))

    # --- Call A: qkv + all-head attention + projected attention part ---
    out_a, v = pl.pallas_call(
        functools.partial(_attn_proj_kernel, num_heads=num_heads,
                          head_dim=hd, scale=scale),
        out_shape=(jax.ShapeDtypeStruct((B, HW, C), jnp.float32),
                   jax.ShapeDtypeStruct((B, HW, C), jnp.float32)),
        grid=(B,),
        in_specs=[tok_spec, weight_cc, weight_cc, weight_cc, weight_cc, bias_spec],
        out_specs=(tok_spec, tok_spec),
        compiler_params=pltpu.CompilerParams(
            dimension_semantics=("parallel",)),
    )(x_tok, w_q, w_k, w_v, w_proj, b_proj)

    # Zero-pad v for the LePE halo (host glue; see module docstring).
    v_pad = jnp.pad(v.reshape(B, H, W, C), ((0, 0), (P, P), (P, P), (0, 0)))

    # --- Call B: LePE depthwise conv + fused projection/add ---
    out_tok = pl.pallas_call(
        functools.partial(_lepe_proj_kernel, K=K, H=H, W=W),
        out_shape=jax.ShapeDtypeStruct((B, HW, C), x.dtype),
        grid=(B,),
        in_specs=[
            tok_spec,
            pl.BlockSpec((1, H + 2 * P, W + 2 * P, C), lambda b: (b, 0, 0, 0)),
            pl.BlockSpec((K, K, C), lambda b: (0, 0, 0)),
            bias_spec,
            weight_cc,
        ],
        out_specs=tok_spec,
        compiler_params=pltpu.CompilerParams(
            dimension_semantics=("parallel",)),
    )(out_a, v_pad, w_lepe, b_lepe, w_proj)

    return jnp.transpose(out_tok.reshape(B, H, W, C), (0, 3, 1, 2))  # back to NCHW


# --------------------------- Pure-JAX reference ---------------------------- #

def reference(x, params, *, num_heads, side_dwconv=5):
    B, C, H, W = x.shape
    hd = C // num_heads
    scale = hd ** (-0.5)
    K = side_dwconv
    P = K // 2
    x_cl = jnp.transpose(x, (0, 2, 3, 1)).reshape(B, H * W, C)
    qkv = x_cl @ params["w_qkv"]
    q, k, v = jnp.split(qkv, 3, axis=-1)

    def heads(t):
        return jnp.transpose(t.reshape(B, H * W, num_heads, hd), (0, 2, 1, 3))

    qh, kh, vh = heads(q), heads(k), heads(v)
    attn = jnp.einsum("bhid,bhjd->bhij", qh, kh) * scale
    attn = jax.nn.softmax(attn, axis=-1)
    out = jnp.einsum("bhij,bhjd->bhid", attn, vh)
    out = jnp.transpose(out, (0, 2, 1, 3)).reshape(B, H * W, C)

    v_img = v.reshape(B, H, W, C)
    v_pad = jnp.pad(v_img, ((0, 0), (P, P), (P, P), (0, 0)))
    lepe = jnp.zeros_like(v_img)
    for i in range(K):
        for j in range(K):
            lepe = lepe + v_pad[:, i:i + H, j:j + W, :] * params["w_lepe"][i, j][None, None, None, :]
    lepe = lepe + params["b_lepe"].reshape(1, 1, 1, C)

    out = out + lepe.reshape(B, H * W, C)
    out = out @ params["w_proj"] + params["b_proj"]
    return jnp.transpose(out.reshape(B, H, W, C), (0, 3, 1, 2))


# ---------------------------------- main ----------------------------------- #

if __name__ == "__main__":
    B, C, H, W = 2, 128, 8, 8          # dim=128, 8x8 feature map
    num_heads = 8                       # head_dim = 16
    K = 5                               # side_dwconv

    key = jax.random.PRNGKey(0)
    k0, k1, k2, k3, k4, k5 = jax.random.split(key, 6)
    x = jax.random.normal(k0, (B, C, H, W), jnp.float32)
    params = {
        # qkv: Conv2d(C, 3C, 1, bias=False) weight, stored as (C_in, 3C_out)
        "w_qkv": 0.05 * jax.random.normal(k1, (C, 3 * C), jnp.float32),
        # proj: Conv2d(C, C, 1) weight (C_in, C_out) + bias
        "w_proj": 0.05 * jax.random.normal(k2, (C, C), jnp.float32),
        "b_proj": 0.05 * jax.random.normal(k3, (1, C), jnp.float32),
        # lepe: depthwise Conv2d(C, C, 5, padding=2, groups=C) weight (K, K, C) + bias
        "w_lepe": 0.05 * jax.random.normal(k4, (K, K, C), jnp.float32),
        "b_lepe": 0.05 * jax.random.normal(k5, (1, C), jnp.float32),
    }

    fwd = jax.jit(functools.partial(nchw_attention_lepe,
                                    num_heads=num_heads, side_dwconv=K))
    out = jax.block_until_ready(fwd(x, params))

    ref = reference(x, params, num_heads=num_heads, side_dwconv=K)
    assert out.shape == (B, C, H, W), out.shape
    max_err = float(jnp.max(jnp.abs(out - ref)))
    # bf16 MXU operands + approx reciprocal -> allow a slightly looser tolerance.
    if not jnp.allclose(out, ref, atol=2e-2, rtol=2e-2):
        raise AssertionError(f"kernel/reference mismatch, max abs diff = {max_err}")
    print("KERNEL_OK")
</pallas_src>

<mosaic_0001>
module attributes {stable_mosaic.version = 11 : i64} {
  func.func @_attn_proj_kernel(%arg0: i32, %arg1: memref<1x64x128xf32, #tpu.memory_space<vmem>>, %arg2: memref<128x128xbf16, #tpu.memory_space<vmem>>, %arg3: memref<128x128xbf16, #tpu.memory_space<vmem>>, %arg4: memref<128x128xbf16, #tpu.memory_space<vmem>>, %arg5: memref<128x128xbf16, #tpu.memory_space<vmem>>, %arg6: memref<1x128xf32, #tpu.memory_space<vmem>>, %arg7: memref<1x64x128xf32, #tpu.memory_space<vmem>>, %arg8: memref<1x64x128xf32, #tpu.memory_space<vmem>>) attributes {dimension_semantics = [#tpu.dimension_semantics<parallel>], iteration_bounds = array<i64: 2>, scalar_prefetch = 0 : i64, scratch_operands = 0 : i64, tpu.core_type = #tpu.core_type<tc>, window_params = [{transform_indices = @transform_0, window_bounds = array<i64: 1, 64, 128>}, {pipeline_mode = #tpu.pipeline_mode<synchronous>, transform_indices = @transform_1, window_bounds = array<i64: 128, 128>}, {pipeline_mode = #tpu.pipeline_mode<synchronous>, transform_indices = @transform_2, window_bounds = array<i64: 128, 128>}, {pipeline_mode = #tpu.pipeline_mode<synchronous>, transform_indices = @transform_3, window_bounds = array<i64: 128, 128>}, {pipeline_mode = #tpu.pipeline_mode<synchronous>, transform_indices = @transform_4, window_bounds = array<i64: 128, 128>}, {pipeline_mode = #tpu.pipeline_mode<synchronous>, transform_indices = @transform_5, window_bounds = array<i64: 1, 128>}, {transform_indices = @transform_6, window_bounds = array<i64: 1, 64, 128>}, {transform_indices = @transform_7, window_bounds = array<i64: 1, 64, 128>}]} {
    %c0 = arith.constant 0 : index
    %c0_0 = arith.constant 0 : index
    %c0_1 = arith.constant 0 : index
    %0 = vector.load %arg1[%c0, %c0_0, %c0_1] : memref<1x64x128xf32, #tpu.memory_space<vmem>>, vector<1x64x128xf32>
    %1 = vector.shape_cast %0 : vector<1x64x128xf32> to vector<64x128xf32>
    %2 = arith.truncf %1 : vector<64x128xf32> to vector<64x128xbf16>
    %c0_2 = arith.constant 0 : index
    %c0_3 = arith.constant 0 : index
    %3 = vector.load %arg2[%c0_2, %c0_3] : memref<128x128xbf16, #tpu.memory_space<vmem>>, vector<128x128xbf16>
    %cst = arith.constant dense<0.000000e+00> : vector<64x128xf32>
    %4 = tpu.matmul %2, %3, %cst {dimension_numbers = #tpu.dot_dimension_numbers<[1], [0], [0], [1], [0, 0, 1, 1], [], []>} : vector<64x128xbf16>, vector<128x128xbf16>, vector<64x128xf32> -> vector<64x128xf32>
    %c0_4 = arith.constant 0 : index
    %c0_5 = arith.constant 0 : index
    %5 = vector.load %arg3[%c0_4, %c0_5] : memref<128x128xbf16, #tpu.memory_space<vmem>>, vector<128x128xbf16>
    %cst_6 = arith.constant dense<0.000000e+00> : vector<64x128xf32>
    %6 = tpu.matmul %2, %5, %cst_6 {dimension_numbers = #tpu.dot_dimension_numbers<[1], [0], [0], [1], [0, 0, 1, 1], [], []>} : vector<64x128xbf16>, vector<128x128xbf16>, vector<64x128xf32> -> vector<64x128xf32>
    %c0_7 = arith.constant 0 : index
    %c0_8 = arith.constant 0 : index
    %7 = vector.load %arg4[%c0_7, %c0_8] : memref<128x128xbf16, #tpu.memory_space<vmem>>, vector<128x128xbf16>
    %cst_9 = arith.constant dense<0.000000e+00> : vector<64x128xf32>
    %8 = tpu.matmul %2, %7, %cst_9 {dimension_numbers = #tpu.dot_dimension_numbers<[1], [0], [0], [1], [0, 0, 1, 1], [], []>} : vector<64x128xbf16>, vector<128x128xbf16>, vector<64x128xf32> -> vector<64x128xf32>
    %c0_10 = arith.constant 0 : index
    %c0_11 = arith.constant 0 : index
    %c0_12 = arith.constant 0 : index
    %9 = vector.load %arg8[%c0_10, %c0_11, %c0_12] : memref<1x64x128xf32, #tpu.memory_space<vmem>>, vector<1x64x128xf32>
    %10 = vector.shape_cast %9 : vector<1x64x128xf32> to vector<64x128xf32>
    %11 = vector.shape_cast %8 : vector<64x128xf32> to vector<1x64x128xf32>
    tpu.vector_store %arg8[%c0_10, %c0_11, %c0_12], %11 {strides = array<i32>} : memref<1x64x128xf32, #tpu.memory_space<vmem>>, vector<1x64x128xf32>,
    %cst_13 = arith.constant 2.500000e-01 : f32
    %12 = vector.broadcast %cst_13 : f32 to vector<64x128xf32>
    %13 = arith.mulf %4, %12 : vector<64x128xf32>
    %14 = arith.truncf %13 : vector<64x128xf32> to vector<64x128xbf16>
    %15 = arith.truncf %6 : vector<64x128xf32> to vector<64x128xbf16>
    %16 = arith.truncf %8 : vector<64x128xf32> to vector<64x128xbf16>
    %cst_14 = arith.constant 0.000000e+00 : f32
    %17 = vector.broadcast %cst_14 : f32 to vector<64x128xf32>
    %18 = vector.extract_strided_slice %14 {offsets = [0, 0], sizes = [64, 16], strides = [1, 1]} : vector<64x128xbf16> to vector<64x16xbf16>
    %19 = vector.extract_strided_slice %15 {offsets = [0, 0], sizes = [64, 16], strides = [1, 1]} : vector<64x128xbf16> to vector<64x16xbf16>
    %20 = vector.extract_strided_slice %16 {offsets = [0, 0], sizes = [64, 16], strides = [1, 1]} : vector<64x128xbf16> to vector<64x16xbf16>
    %cst_15 = arith.constant dense<0.000000e+00> : vector<64x64xf32>
    %21 = tpu.matmul %18, %19, %cst_15 {dimension_numbers = #tpu.dot_dimension_numbers<[1], [1], [0], [0], [0, 0, 1, 0], [], []>} : vector<64x16xbf16>, vector<64x16xbf16>, vector<64x64xf32> -> vector<64x64xf32>
    %cst_16 = arith.constant dense<0xFF800000> : vector<64xf32>
    %22 = vector.multi_reduction <maximumf>, %21, %cst_16 [1] : vector<64x64xf32> to vector<64xf32>
    %23 = vector.shape_cast %22 : vector<64xf32> to vector<64x1xf32>
    %24 = vector.broadcast %23 : vector<64x1xf32> to vector<64x64xf32>
    %25 = arith.subf %21, %24 : vector<64x64xf32>
    %26 = math.exp %25 : vector<64x64xf32>
    %cst_17 = arith.constant dense<0.000000e+00> : vector<64xf32>
    %27 = vector.multi_reduction <add>, %26, %cst_17 [1] : vector<64x64xf32> to vector<64xf32>
    %28 = vector.shape_cast %27 : vector<64xf32> to vector<64x1xf32>
    %29 = tpu.reciprocal %28 {approx = true} : vector<64x1xf32> -> vector<64x1xf32>
    %30 = vector.broadcast %29 : vector<64x1xf32> to vector<64x64xf32>
    %31 = arith.mulf %26, %30 : vector<64x64xf32>
    %32 = arith.truncf %31 : vector<64x64xf32> to vector<64x64xbf16>
    %cst_18 = arith.constant dense<0.000000e+00> : vector<64x16xf32>
    %33 = tpu.matmul %32, %20, %cst_18 {dimension_numbers = #tpu.dot_dimension_numbers<[1], [0], [0], [1], [0, 0, 1, 1], [], []>} : vector<64x64xbf16>, vector<64x16xbf16>, vector<64x16xf32> -> vector<64x16xf32>
    %34 = arith.truncf %33 : vector<64x16xf32> to vector<64x16xbf16>
    %c0_19 = arith.constant 0 : index
    %c0_20 = arith.constant 0 : index
    %35 = vector.load %arg5[%c0_19, %c0_20] : memref<128x128xbf16, #tpu.memory_space<vmem>>, vector<16x128xbf16>
    %cst_21 = arith.constant dense<0.000000e+00> : vector<64x128xf32>
    %36 = tpu.matmul %34, %35, %cst_21 {dimension_numbers = #tpu.dot_dimension_numbers<[1], [0], [0], [1], [0, 0, 1, 1], [], []>} : vector<64x16xbf16>, vector<16x128xbf16>, vector<64x128xf32> -> vector<64x128xf32>
    %37 = arith.addf %17, %36 : vector<64x128xf32>
    %38 = vector.extract_strided_slice %14 {offsets = [0, 16], sizes = [64, 16], strides = [1, 1]} : vector<64x128xbf16> to vector<64x16xbf16>
    %39 = vector.extract_strided_slice %15 {offsets = [0, 16], sizes = [64, 16], strides = [1, 1]} : vector<64x128xbf16> to vector<64x16xbf16>
    %40 = vector.extract_strided_slice %16 {offsets = [0, 16], sizes = [64, 16], strides = [1, 1]} : vector<64x128xbf16> to vector<64x16xbf16>
    %cst_22 = arith.constant dense<0.000000e+00> : vector<64x64xf32>
    %41 = tpu.matmul %38, %39, %cst_22 {dimension_numbers = #tpu.dot_dimension_numbers<[1], [1], [0], [0], [0, 0, 1, 0], [], []>} : vector<64x16xbf16>, vector<64x16xbf16>, vector<64x64xf32> -> vector<64x64xf32>
    %cst_23 = arith.constant dense<0xFF800000> : vector<64xf32>
    %42 = vector.multi_reduction <maximumf>, %41, %cst_23 [1] : vector<64x64xf32> to vector<64xf32>
    %43 = vector.shape_cast %42 : vector<64xf32> to vector<64x1xf32>
    %44 = vector.broadcast %43 : vector<64x1xf32> to vector<64x64xf32>
    %45 = arith.subf %41, %44 : vector<64x64xf32>
    %46 = math.exp %45 : vector<64x64xf32>
    %cst_24 = arith.constant dense<0.000000e+00> : vector<64xf32>
    %47 = vector.multi_reduction <add>, %46, %cst_24 [1] : vector<64x64xf32> to vector<64xf32>
    %48 = vector.shape_cast %47 : vector<64xf32> to vector<64x1xf32>
    %49 = tpu.reciprocal %48 {approx = true} : vector<64x1xf32> -> vector<64x1xf32>
    %50 = vector.broadcast %49 : vector<64x1xf32> to vector<64x64xf32>
    %51 = arith.mulf %46, %50 : vector<64x64xf32>
    %52 = arith.truncf %51 : vector<64x64xf32> to vector<64x64xbf16>
    %cst_25 = arith.constant dense<0.000000e+00> : vector<64x16xf32>
    %53 = tpu.matmul %52, %40, %cst_25 {dimension_numbers = #tpu.dot_dimension_numbers<[1], [0], [0], [1], [0, 0, 1, 1], [], []>} : vector<64x64xbf16>, vector<64x16xbf16>, vector<64x16xf32> -> vector<64x16xf32>
    %54 = arith.truncf %53 : vector<64x16xf32> to vector<64x16xbf16>
    %c16 = arith.constant 16 : index
    %c0_26 = arith.constant 0 : index
    %55 = vector.load %arg5[%c16, %c0_26] : memref<128x128xbf16, #tpu.memory_space<vmem>>, vector<16x128xbf16>
    %cst_27 = arith.constant dense<0.000000e+00> : vector<64x128xf32>
    %56 = tpu.matmul %54, %55, %cst_27 {dimension_numbers = #tpu.dot_dimension_numbers<[1], [0], [0], [1], [0, 0, 1, 1], [], []>} : vector<64x16xbf16>, vector<16x128xbf16>, vector<64x128xf32> -> vector<64x128xf32>
    %57 = arith.addf %37, %56 : vector<64x128xf32>
    %58 = vector.extract_strided_slice %14 {offsets = [0, 32], sizes = [64, 16], strides = [1, 1]} : vector<64x128xbf16> to vector<64x16xbf16>
    %59 = vector.extract_strided_slice %15 {offsets = [0, 32], sizes = [64, 16], strides = [1, 1]} : vector<64x128xbf16> to vector<64x16xbf16>
    %60 = vector.extract_strided_slice %16 {offsets = [0, 32], sizes = [64, 16], strides = [1, 1]} : vector<64x128xbf16> to vector<64x16xbf16>
    %cst_28 = arith.constant dense<0.000000e+00> : vector<64x64xf32>
    %61 = tpu.matmul %58, %59, %cst_28 {dimension_numbers = #tpu.dot_dimension_numbers<[1], [1], [0], [0], [0, 0, 1, 0], [], []>} : vector<64x16xbf16>, vector<64x16xbf16>, vector<64x64xf32> -> vector<64x64xf32>
    %cst_29 = arith.constant dense<0xFF800000> : vector<64xf32>
    %62 = vector.multi_reduction <maximumf>, %61, %cst_29 [1] : vector<64x64xf32> to vector<64xf32>
    %63 = vector.shape_cast %62 : vector<64xf32> to vector<64x1xf32>
    %64 = vector.broadcast %63 : vector<64x1xf32> to vector<64x64xf32>
    %65 = arith.subf %61, %64 : vector<64x64xf32>
    %66 = math.exp %65 : vector<64x64xf32>
    %cst_30 = arith.constant dense<0.000000e+00> : vector<64xf32>
    %67 = vector.multi_reduction <add>, %66, %cst_30 [1] : vector<64x64xf32> to vector<64xf32>
    %68 = vector.shape_cast %67 : vector<64xf32> to vector<64x1xf32>
    %69 = tpu.reciprocal %68 {approx = true} : vector<64x1xf32> -> vector<64x1xf32>
    %70 = vector.broadcast %69 : vector<64x1xf32> to vector<64x64xf32>
    %71 = arith.mulf %66, %70 : vector<64x64xf32>
    %72 = arith.truncf %71 : vector<64x64xf32> to vector<64x64xbf16>
    %cst_31 = arith.constant dense<0.000000e+00> : vector<64x16xf32>
    %73 = tpu.matmul %72, %60, %cst_31 {dimension_numbers = #tpu.dot_dimension_numbers<[1], [0], [0], [1], [0, 0, 1, 1], [], []>} : vector<64x64xbf16>, vector<64x16xbf16>, vector<64x16xf32> -> vector<64x16xf32>
    %74 = arith.truncf %73 : vector<64x16xf32> to vector<64x16xbf16>
    %c32 = arith.constant 32 : index
    %c0_32 = arith.constant 0 : index
    %75 = vector.load %arg5[%c32, %c0_32] : memref<128x128xbf16, #tpu.memory_space<vmem>>, vector<16x128xbf16>
    %cst_33 = arith.constant dense<0.000000e+00> : vector<64x128xf32>
    %76 = tpu.matmul %74, %75, %cst_33 {dimension_numbers = #tpu.dot_dimension_numbers<[1], [0], [0], [1], [0, 0, 1, 1], [], []>} : vector<64x16xbf16>, vector<16x128xbf16>, vector<64x128xf32> -> vector<64x128xf32>
    %77 = arith.addf %57, %76 : vector<64x128xf32>
    %78 = vector.extract_strided_slice %14 {offsets = [0, 48], sizes = [64, 16], strides = [1, 1]} : vector<64x128xbf16> to vector<64x16xbf16>
    %79 = vector.extract_strided_slice %15 {offsets = [0, 48], sizes = [64, 16], strides = [1, 1]} : vector<64x128xbf16> to vector<64x16xbf16>
    %80 = vector.extract_strided_slice %16 {offsets = [0, 48], sizes = [64, 16], strides = [1, 1]} : vector<64x128xbf16> to vector<64x16xbf16>
    %cst_34 = arith.constant dense<0.000000e+00> : vector<64x64xf32>
    %81 = tpu.matmul %78, %79, %cst_34 {dimension_numbers = #tpu.dot_dimension_numbers<[1], [1], [0], [0], [0, 0, 1, 0], [], []>} : vector<64x16xbf16>, vector<64x16xbf16>, vector<64x64xf32> -> vector<64x64xf32>
    %cst_35 = arith.constant dense<0xFF800000> : vector<64xf32>
    %82 = vector.multi_reduction <maximumf>, %81, %cst_35 [1] : vector<64x64xf32> to vector<64xf32>
    %83 = vector.shape_cast %82 : vector<64xf32> to vector<64x1xf32>
    %84 = vector.broadcast %83 : vector<64x1xf32> to vector<64x64xf32>
    %85 = arith.subf %81, %84 : vector<64x64xf32>
    %86 = math.exp %85 : vector<64x64xf32>
    %cst_36 = arith.constant dense<0.000000e+00> : vector<64xf32>
    %87 = vector.multi_reduction <add>, %86, %cst_36 [1] : vector<64x64xf32> to vector<64xf32>
    %88 = vector.shape_cast %87 : vector<64xf32> to vector<64x1xf32>
    %89 = tpu.reciprocal %88 {approx = true} : vector<64x1xf32> -> vector<64x1xf32>
    %90 = vector.broadcast %89 : vector<64x1xf32> to vector<64x64xf32>
    %91 = arith.mulf %86, %90 : vector<64x64xf32>
    %92 = arith.truncf %91 : vector<64x64xf32> to vector<64x64xbf16>
    %cst_37 = arith.constant dense<0.000000e+00> : vector<64x16xf32>
    %93 = tpu.matmul %92, %80, %cst_37 {dimension_numbers = #tpu.dot_dimension_numbers<[1], [0], [0], [1], [0, 0, 1, 1], [], []>} : vector<64x64xbf16>, vector<64x16xbf16>, vector<64x16xf32> -> vector<64x16xf32>
    %94 = arith.truncf %93 : vector<64x16xf32> to vector<64x16xbf16>
    %c48 = arith.constant 48 : index
    %c0_38 = arith.constant 0 : index
    %95 = vector.load %arg5[%c48, %c0_38] : memref<128x128xbf16, #tpu.memory_space<vmem>>, vector<16x128xbf16>
    %cst_39 = arith.constant dense<0.000000e+00> : vector<64x128xf32>
    %96 = tpu.matmul %94, %95, %cst_39 {dimension_numbers = #tpu.dot_dimension_numbers<[1], [0], [0], [1], [0, 0, 1, 1], [], []>} : vector<64x16xbf16>, vector<16x128xbf16>, vector<64x128xf32> -> vector<64x128xf32>
    %97 = arith.addf %77, %96 : vector<64x128xf32>
    %98 = vector.extract_strided_slice %14 {offsets = [0, 64], sizes = [64, 16], strides = [1, 1]} : vector<64x128xbf16> to vector<64x16xbf16>
    %99 = vector.extract_strided_slice %15 {offsets = [0, 64], sizes = [64, 16], strides = [1, 1]} : vector<64x128xbf16> to vector<64x16xbf16>
    %100 = vector.extract_strided_slice %16 {offsets = [0, 64], sizes = [64, 16], strides = [1, 1]} : vector<64x128xbf16> to vector<64x16xbf16>
    %cst_40 = arith.constant dense<0.000000e+00> : vector<64x64xf32>
    %101 = tpu.matmul %98, %99, %cst_40 {dimension_numbers = #tpu.dot_dimension_numbers<[1], [1], [0], [0], [0, 0, 1, 0], [], []>} : vector<64x16xbf16>, vector<64x16xbf16>, vector<64x64xf32> -> vector<64x64xf32>
    %cst_41 = arith.constant dense<0xFF800000> : vector<64xf32>
    %102 = vector.multi_reduction <maximumf>, %101, %cst_41 [1] : vector<64x64xf32> to vector<64xf32>
    %103 = vector.shape_cast %102 : vector<64xf32> to vector<64x1xf32>
    %104 = vector.broadcast %103 : vector<64x1xf32> to vector<64x64xf32>
    %105 = arith.subf %101, %104 : vector<64x64xf32>
    %106 = math.exp %105 : vector<64x64xf32>
    %cst_42 = arith.constant dense<0.000000e+00> : vector<64xf32>
    %107 = vector.multi_reduction <add>, %106, %cst_42 [1] : vector<64x64xf32> to vector<64xf32>
    %108 = vector.shape_cast %107 : vector<64xf32> to vector<64x1xf32>
    %109 = tpu.reciprocal %108 {approx = true} : vector<64x1xf32> -> vector<64x1xf32>
    %110 = vector.broadcast %109 : vector<64x1xf32> to vector<64x64xf32>
    %111 = arith.mulf %106, %110 : vector<64x64xf32>
    %112 = arith.truncf %111 : vector<64x64xf32> to vector<64x64xbf16>
    %cst_43 = arith.constant dense<0.000000e+00> : vector<64x16xf32>
    %113 = tpu.matmul %112, %100, %cst_43 {dimension_numbers = #tpu.dot_dimension_numbers<[1], [0], [0], [1], [0, 0, 1, 1], [], []>} : vector<64x64xbf16>, vector<64x16xbf16>, vector<64x16xf32> -> vector<64x16xf32>
    %114 = arith.truncf %113 : vector<64x16xf32> to vector<64x16xbf16>
    %c64 = arith.constant 64 : index
    %c0_44 = arith.constant 0 : index
    %115 = vector.load %arg5[%c64, %c0_44] : memref<128x128xbf16, #tpu.memory_space<vmem>>, vector<16x128xbf16>
    %cst_45 = arith.constant dense<0.000000e+00> : vector<64x128xf32>
    %116 = tpu.matmul %114, %115, %cst_45 {dimension_numbers = #tpu.dot_dimension_numbers<[1], [0], [0], [1], [0, 0, 1, 1], [], []>} : vector<64x16xbf16>, vector<16x128xbf16>, vector<64x128xf32> -> vector<64x128xf32>
    %117 = arith.addf %97, %116 : vector<64x128xf32>
    %118 = vector.extract_strided_slice %14 {offsets = [0, 80], sizes = [64, 16], strides = [1, 1]} : vector<64x128xbf16> to vector<64x16xbf16>
    %119 = vector.extract_strided_slice %15 {offsets = [0, 80], sizes = [64, 16], strides = [1, 1]} : vector<64x128xbf16> to vector<64x16xbf16>
    %120 = vector.extract_strided_slice %16 {offsets = [0, 80], sizes = [64, 16], strides = [1, 1]} : vector<64x128xbf16> to vector<64x16xbf16>
    %cst_46 = arith.constant dense<0.000000e+00> : vector<64x64xf32>
    %121 = tpu.matmul %118, %119, %cst_46 {dimension_numbers = #tpu.dot_dimension_numbers<[1], [1], [0], [0], [0, 0, 1, 0], [], []>} : vector<64x16xbf16>, vector<64x16xbf16>, vector<64x64xf32> -> vector<64x64xf32>
    %cst_47 = arith.constant dense<0xFF800000> : vector<64xf32>
    %122 = vector.multi_reduction <maximumf>, %121, %cst_47 [1] : vector<64x64xf32> to vector<64xf32>
    %123 = vector.shape_cast %122 : vector<64xf32> to vector<64x1xf32>
    %124 = vector.broadcast %123 : vector<64x1xf32> to vector<64x64xf32>
    %125 = arith.subf %121, %124 : vector<64x64xf32>
    %126 = math.exp %125 : vector<64x64xf32>
    %cst_48 = arith.constant dense<0.000000e+00> : vector<64xf32>
    %127 = vector.multi_reduction <add>, %126, %cst_48 [1] : vector<64x64xf32> to vector<64xf32>
    %128 = vector.shape_cast %127 : vector<64xf32> to vector<64x1xf32>
    %129 = tpu.reciprocal %128 {approx = true} : vector<64x1xf32> -> vector<64x1xf32>
    %130 = vector.broadcast %129 : vector<64x1xf32> to vector<64x64xf32>
    %131 = arith.mulf %126, %130 : vector<64x64xf32>
    %132 = arith.truncf %131 : vector<64x64xf32> to vector<64x64xbf16>
    %cst_49 = arith.constant dense<0.000000e+00> : vector<64x16xf32>
    %133 = tpu.matmul %132, %120, %cst_49 {dimension_numbers = #tpu.dot_dimension_numbers<[1], [0], [0], [1], [0, 0, 1, 1], [], []>} : vector<64x64xbf16>, vector<64x16xbf16>, vector<64x16xf32> -> vector<64x16xf32>
    %134 = arith.truncf %133 : vector<64x16xf32> to vector<64x16xbf16>
    %c80 = arith.constant 80 : index
    %c0_50 = arith.constant 0 : index
    %135 = vector.load %arg5[%c80, %c0_50] : memref<128x128xbf16, #tpu.memory_space<vmem>>, vector<16x128xbf16>
    %cst_51 = arith.constant dense<0.000000e+00> : vector<64x128xf32>
    %136 = tpu.matmul %134, %135, %cst_51 {dimension_numbers = #tpu.dot_dimension_numbers<[1], [0], [0], [1], [0, 0, 1, 1], [], []>} : vector<64x16xbf16>, vector<16x128xbf16>, vector<64x128xf32> -> vector<64x128xf32>
    %137 = arith.addf %117, %136 : vector<64x128xf32>
    %138 = vector.extract_strided_slice %14 {offsets = [0, 96], sizes = [64, 16], strides = [1, 1]} : vector<64x128xbf16> to vector<64x16xbf16>
    %139 = vector.extract_strided_slice %15 {offsets = [0, 96], sizes = [64, 16], strides = [1, 1]} : vector<64x128xbf16> to vector<64x16xbf16>
    %140 = vector.extract_strided_slice %16 {offsets = [0, 96], sizes = [64, 16], strides = [1, 1]} : vector<64x128xbf16> to vector<64x16xbf16>
    %cst_52 = arith.constant dense<0.000000e+00> : vector<64x64xf32>
    %141 = tpu.matmul %138, %139, %cst_52 {dimension_numbers = #tpu.dot_dimension_numbers<[1], [1], [0], [0], [0, 0, 1, 0], [], []>} : vector<64x16xbf16>, vector<64x16xbf16>, vector<64x64xf32> -> vector<64x64xf32>
    %cst_53 = arith.constant dense<0xFF800000> : vector<64xf32>
    %142 = vector.multi_reduction <maximumf>, %141, %cst_53 [1] : vector<64x64xf32> to vector<64xf32>
    %143 = vector.shape_cast %142 : vector<64xf32> to vector<64x1xf32>
    %144 = vector.broadcast %143 : vector<64x1xf32> to vector<64x64xf32>
    %145 = arith.subf %141, %144 : vector<64x64xf32>
    %146 = math.exp %145 : vector<64x64xf32>
    %cst_54 = arith.constant dense<0.000000e+00> : vector<64xf32>
    %147 = vector.multi_reduction <add>, %146, %cst_54 [1] : vector<64x64xf32> to vector<64xf32>
    %148 = vector.shape_cast %147 : vector<64xf32> to vector<64x1xf32>
    %149 = tpu.reciprocal %148 {approx = true} : vector<64x1xf32> -> vector<64x1xf32>
    %150 = vector.broadcast %149 : vector<64x1xf32> to vector<64x64xf32>
    %151 = arith.mulf %146, %150 : vector<64x64xf32>
    %152 = arith.truncf %151 : vector<64x64xf32> to vector<64x64xbf16>
    %cst_55 = arith.constant dense<0.000000e+00> : vector<64x16xf32>
    %153 = tpu.matmul %152, %140, %cst_55 {dimension_numbers = #tpu.dot_dimension_numbers<[1], [0], [0], [1], [0, 0, 1, 1], [], []>} : vector<64x64xbf16>, vector<64x16xbf16>, vector<64x16xf32> -> vector<64x16xf32>
    %154 = arith.truncf %153 : vector<64x16xf32> to vector<64x16xbf16>
    %c96 = arith.constant 96 : index
    %c0_56 = arith.constant 0 : index
    %155 = vector.load %arg5[%c96, %c0_56] : memref<128x128xbf16, #tpu.memory_space<vmem>>, vector<16x128xbf16>
    %cst_57 = arith.constant dense<0.000000e+00> : vector<64x128xf32>
    %156 = tpu.matmul %154, %155, %cst_57 {dimension_numbers = #tpu.dot_dimension_numbers<[1], [0], [0], [1], [0, 0, 1, 1], [], []>} : vector<64x16xbf16>, vector<16x128xbf16>, vector<64x128xf32> -> vector<64x128xf32>
    %157 = arith.addf %137, %156 : vector<64x128xf32>
    %158 = vector.extract_strided_slice %14 {offsets = [0, 112], sizes = [64, 16], strides = [1, 1]} : vector<64x128xbf16> to vector<64x16xbf16>
    %159 = vector.extract_strided_slice %15 {offsets = [0, 112], sizes = [64, 16], strides = [1, 1]} : vector<64x128xbf16> to vector<64x16xbf16>
    %160 = vector.extract_strided_slice %16 {offsets = [0, 112], sizes = [64, 16], strides = [1, 1]} : vector<64x128xbf16> to vector<64x16xbf16>
    %cst_58 = arith.constant dense<0.000000e+00> : vector<64x64xf32>
    %161 = tpu.matmul %158, %159, %cst_58 {dimension_numbers = #tpu.dot_dimension_numbers<[1], [1], [0], [0], [0, 0, 1, 0], [], []>} : vector<64x16xbf16>, vector<64x16xbf16>, vector<64x64xf32> -> vector<64x64xf32>
    %cst_59 = arith.constant dense<0xFF800000> : vector<64xf32>
    %162 = vector.multi_reduction <maximumf>, %161, %cst_59 [1] : vector<64x64xf32> to vector<64xf32>
    %163 = vector.shape_cast %162 : vector<64xf32> to vector<64x1xf32>
    %164 = vector.broadcast %163 : vector<64x1xf32> to vector<64x64xf32>
    %165 = arith.subf %161, %164 : vector<64x64xf32>
    %166 = math.exp %165 : vector<64x64xf32>
    %cst_60 = arith.constant dense<0.000000e+00> : vector<64xf32>
    %167 = vector.multi_reduction <add>, %166, %cst_60 [1] : vector<64x64xf32> to vector<64xf32>
    %168 = vector.shape_cast %167 : vector<64xf32> to vector<64x1xf32>
    %169 = tpu.reciprocal %168 {approx = true} : vector<64x1xf32> -> vector<64x1xf32>
    %170 = vector.broadcast %169 : vector<64x1xf32> to vector<64x64xf32>
    %171 = arith.mulf %166, %170 : vector<64x64xf32>
    %172 = arith.truncf %171 : vector<64x64xf32> to vector<64x64xbf16>
    %cst_61 = arith.constant dense<0.000000e+00> : vector<64x16xf32>
    %173 = tpu.matmul %172, %160, %cst_61 {dimension_numbers = #tpu.dot_dimension_numbers<[1], [0], [0], [1], [0, 0, 1, 1], [], []>} : vector<64x64xbf16>, vector<64x16xbf16>, vector<64x16xf32> -> vector<64x16xf32>
    %174 = arith.truncf %173 : vector<64x16xf32> to vector<64x16xbf16>
    %c112 = arith.constant 112 : index
    %c0_62 = arith.constant 0 : index
    %175 = vector.load %arg5[%c112, %c0_62] : memref<128x128xbf16, #tpu.memory_space<vmem>>, vector<16x128xbf16>
    %cst_63 = arith.constant dense<0.000000e+00> : vector<64x128xf32>
    %176 = tpu.matmul %174, %175, %cst_63 {dimension_numbers = #tpu.dot_dimension_numbers<[1], [0], [0], [1], [0, 0, 1, 1], [], []>} : vector<64x16xbf16>, vector<16x128xbf16>, vector<64x128xf32> -> vector<64x128xf32>
    %177 = arith.addf %157, %176 : vector<64x128xf32>
    %c0_64 = arith.constant 0 : index
    %c0_65 = arith.constant 0 : index
    %178 = vector.load %arg6[%c0_64, %c0_65] : memref<1x128xf32, #tpu.memory_space<vmem>>, vector<1x128xf32>
    %179 = vector.broadcast %178 : vector<1x128xf32> to vector<64x128xf32>
    %180 = arith.addf %177, %179 : vector<64x128xf32>
    %c0_66 = arith.constant 0 : index
    %c0_67 = arith.constant 0 : index
    %c0_68 = arith.constant 0 : index
    %181 = vector.load %arg7[%c0_66, %c0_67, %c0_68] : memref<1x64x128xf32, #tpu.memory_space<vmem>>, vector<1x64x128xf32>
    %182 = vector.shape_cast %181 : vector<1x64x128xf32> to vector<64x128xf32>
    %183 = vector.shape_cast %180 : vector<64x128xf32> to vector<1x64x128xf32>
    tpu.vector_store %arg7[%c0_66, %c0_67, %c0_68], %183 {strides = array<i32>} : memref<1x64x128xf32, #tpu.memory_space<vmem>>, vector<1x64x128xf32>,
    return
  }
  func.func @transform_0(%arg0: i32) -> (i32, i32, i32) {
    %c0_i32 = arith.constant 0 : i32
    %c0_i32_0 = arith.constant 0 : i32
    %c0_i32_1 = arith.constant 0 : i32
    return %arg0, %c0_i32, %c0_i32_0 : i32, i32, i32
  }
  func.func @transform_1(%arg0: i32) -> (i32, i32) {
    %c0_i32 = arith.constant 0 : i32
    %c0_i32_0 = arith.constant 0 : i32
    %c0_i32_1 = arith.constant 0 : i32
    return %c0_i32, %c0_i32_0 : i32, i32
  }
  func.func @transform_2(%arg0: i32) -> (i32, i32) {
    %c0_i32 = arith.constant 0 : i32
    %c0_i32_0 = arith.constant 0 : i32
    %c0_i32_1 = arith.constant 0 : i32
    return %c0_i32, %c0_i32_0 : i32, i32
  }
  func.func @transform_3(%arg0: i32) -> (i32, i32) {
    %c0_i32 = arith.constant 0 : i32
    %c0_i32_0 = arith.constant 0 : i32
    %c0_i32_1 = arith.constant 0 : i32
    return %c0_i32, %c0_i32_0 : i32, i32
  }
  func.func @transform_4(%arg0: i32) -> (i32, i32) {
    %c0_i32 = arith.constant 0 : i32
    %c0_i32_0 = arith.constant 0 : i32
    %c0_i32_1 = arith.constant 0 : i32
    return %c0_i32, %c0_i32_0 : i32, i32
  }
  func.func @transform_5(%arg0: i32) -> (i32, i32) {
    %c0_i32 = arith.constant 0 : i32
    %c0_i32_0 = arith.constant 0 : i32
    %c0_i32_1 = arith.constant 0 : i32
    return %c0_i32, %c0_i32_0 : i32, i32
  }
  func.func @transform_6(%arg0: i32) -> (i32, i32, i32) {
    %c0_i32 = arith.constant 0 : i32
    %c0_i32_0 = arith.constant 0 : i32
    %c0_i32_1 = arith.constant 0 : i32
    return %arg0, %c0_i32, %c0_i32_0 : i32, i32, i32
  }
  func.func @transform_7(%arg0: i32) -> (i32, i32, i32) {
    %c0_i32 = arith.constant 0 : i32
    %c0_i32_0 = arith.constant 0 : i32
    %c0_i32_1 = arith.constant 0 : i32
    return %arg0, %c0_i32, %c0_i32_0 : i32, i32, i32
  }
}

module attributes {stable_mosaic.version = 11 : i64} {
  func.func @_lepe_proj_kernel(%arg0: i32, %arg1: memref<1x64x128xf32, #tpu.memory_space<vmem>>, %arg2: memref<1x12x12x128xf32, #tpu.memory_space<vmem>>, %arg3: memref<5x5x128xf32, #tpu.memory_space<vmem>>, %arg4: memref<1x128xf32, #tpu.memory_space<vmem>>, %arg5: memref<128x128xbf16, #tpu.memory_space<vmem>>, %arg6: memref<1x64x128xf32, #tpu.memory_space<vmem>>) attributes {dimension_semantics = [#tpu.dimension_semantics<parallel>], iteration_bounds = array<i64: 2>, scalar_prefetch = 0 : i64, scratch_operands = 0 : i64, tpu.core_type = #tpu.core_type<tc>, window_params = [{transform_indices = @transform_0, window_bounds = array<i64: 1, 64, 128>}, {transform_indices = @transform_1, window_bounds = array<i64: 1, 12, 12, 128>}, {pipeline_mode = #tpu.pipeline_mode<synchronous>, transform_indices = @transform_2, window_bounds = array<i64: 5, 5, 128>}, {pipeline_mode = #tpu.pipeline_mode<synchronous>, transform_indices = @transform_3, window_bounds = array<i64: 1, 128>}, {pipeline_mode = #tpu.pipeline_mode<synchronous>, transform_indices = @transform_4, window_bounds = array<i64: 128, 128>}, {transform_indices = @transform_5, window_bounds = array<i64: 1, 64, 128>}]} {
    %c0 = arith.constant 0 : index
    %c0_0 = arith.constant 0 : index
    %c0_1 = arith.constant 0 : index
    %0 = vector.load %arg3[%c0, %c0_0, %c0_1] : memref<5x5x128xf32, #tpu.memory_space<vmem>>, vector<5x5x128xf32>
    %cst = arith.constant 0.000000e+00 : f32
    %1 = vector.broadcast %cst : f32 to vector<1x8x8x128xf32>
    %c0_2 = arith.constant 0 : index
    %c0_3 = arith.constant 0 : index
    %c0_4 = arith.constant 0 : index
    %c0_5 = arith.constant 0 : index
    %2 = vector.load %arg2[%c0_2, %c0_3, %c0_4, %c0_5] : memref<1x12x12x128xf32, #tpu.memory_space<vmem>>, vector<1x8x8x128xf32>
    %3 = vector.extract_strided_slice %0 {offsets = [0, 0, 0], sizes = [1, 1, 128], strides = [1, 1, 1]} : vector<5x5x128xf32> to vector<1x1x128xf32>
    %4 = vector.shape_cast %3 : vector<1x1x128xf32> to vector<128xf32>
    %5 = vector.shape_cast %4 : vector<128xf32> to vector<1x1x1x128xf32>
    %6 = vector.broadcast %5 : vector<1x1x1x128xf32> to vector<1x8x8x128xf32>
    %7 = arith.mulf %2, %6 : vector<1x8x8x128xf32>
    %8 = arith.addf %1, %7 : vector<1x8x8x128xf32>
    %c0_6 = arith.constant 0 : index
    %c0_7 = arith.constant 0 : index
    %c1 = arith.constant 1 : index
    %c0_8 = arith.constant 0 : index
    %9 = vector.load %arg2[%c0_6, %c0_7, %c1, %c0_8] : memref<1x12x12x128xf32, #tpu.memory_space<vmem>>, vector<1x8x8x128xf32>
    %10 = vector.extract_strided_slice %0 {offsets = [0, 1, 0], sizes = [1, 1, 128], strides = [1, 1, 1]} : vector<5x5x128xf32> to vector<1x1x128xf32>
    %11 = vector.shape_cast %10 : vector<1x1x128xf32> to vector<128xf32>
    %12 = vector.shape_cast %11 : vector<128xf32> to vector<1x1x1x128xf32>
    %13 = vector.broadcast %12 : vector<1x1x1x128xf32> to vector<1x8x8x128xf32>
    %14 = arith.mulf %9, %13 : vector<1x8x8x128xf32>
    %15 = arith.addf %8, %14 : vector<1x8x8x128xf32>
    %c0_9 = arith.constant 0 : index
    %c0_10 = arith.constant 0 : index
    %c2 = arith.constant 2 : index
    %c0_11 = arith.constant 0 : index
    %16 = vector.load %arg2[%c0_9, %c0_10, %c2, %c0_11] : memref<1x12x12x128xf32, #tpu.memory_space<vmem>>, vector<1x8x8x128xf32>
    %17 = vector.extract_strided_slice %0 {offsets = [0, 2, 0], sizes = [1, 1, 128], strides = [1, 1, 1]} : vector<5x5x128xf32> to vector<1x1x128xf32>
    %18 = vector.shape_cast %17 : vector<1x1x128xf32> to vector<128xf32>
    %19 = vector.shape_cast %18 : vector<128xf32> to vector<1x1x1x128xf32>
    %20 = vector.broadcast %19 : vector<1x1x1x128xf32> to vector<1x8x8x128xf32>
    %21 = arith.mulf %16, %20 : vector<1x8x8x128xf32>
    %22 = arith.addf %15, %21 : vector<1x8x8x128xf32>
    %c0_12 = arith.constant 0 : index
    %c0_13 = arith.constant 0 : index
    %c3 = arith.constant 3 : index
    %c0_14 = arith.constant 0 : index
    %23 = vector.load %arg2[%c0_12, %c0_13, %c3, %c0_14] : memref<1x12x12x128xf32, #tpu.memory_space<vmem>>, vector<1x8x8x128xf32>
    %24 = vector.extract_strided_slice %0 {offsets = [0, 3, 0], sizes = [1, 1, 128], strides = [1, 1, 1]} : vector<5x5x128xf32> to vector<1x1x128xf32>
    %25 = vector.shape_cast %24 : vector<1x1x128xf32> to vector<128xf32>
    %26 = vector.shape_cast %25 : vector<128xf32> to vector<1x1x1x128xf32>
    %27 = vector.broadcast %26 : vector<1x1x1x128xf32> to vector<1x8x8x128xf32>
    %28 = arith.mulf %23, %27 : vector<1x8x8x128xf32>
    %29 = arith.addf %22, %28 : vector<1x8x8x128xf32>
    %c0_15 = arith.constant 0 : index
    %c0_16 = arith.constant 0 : index
    %c4 = arith.constant 4 : index
    %c0_17 = arith.constant 0 : index
    %30 = vector.load %arg2[%c0_15, %c0_16, %c4, %c0_17] : memref<1x12x12x128xf32, #tpu.memory_space<vmem>>, vector<1x8x8x128xf32>
    %31 = vector.extract_strided_slice %0 {offsets = [0, 4, 0], sizes = [1, 1, 128], strides = [1, 1, 1]} : vector<5x5x128xf32> to vector<1x1x128xf32>
    %32 = vector.shape_cast %31 : vector<1x1x128xf32> to vector<128xf32>
    %33 = vector.shape_cast %32 : vector<128xf32> to vector<1x1x1x128xf32>
    %34 = vector.broadcast %33 : vector<1x1x1x128xf32> to vector<1x8x8x128xf32>
    %35 = arith.mulf %30, %34 : vector<1x8x8x128xf32>
    %36 = arith.addf %29, %35 : vector<1x8x8x128xf32>
    %c0_18 = arith.constant 0 : index
    %c1_19 = arith.constant 1 : index
    %c0_20 = arith.constant 0 : index
    %c0_21 = arith.constant 0 : index
    %37 = vector.load %arg2[%c0_18, %c1_19, %c0_20, %c0_21] : memref<1x12x12x128xf32, #tpu.memory_space<vmem>>, vector<1x8x8x128xf32>
    %38 = vector.extract_strided_slice %0 {offsets = [1, 0, 0], sizes = [1, 1, 128], strides = [1, 1, 1]} : vector<5x5x128xf32> to vector<1x1x128xf32>
    %39 = vector.shape_cast %38 : vector<1x1x128xf32> to vector<128xf32>
    %40 = vector.shape_cast %39 : vector<128xf32> to vector<1x1x1x128xf32>
    %41 = vector.broadcast %40 : vector<1x1x1x128xf32> to vector<1x8x8x128xf32>
    %42 = arith.mulf %37, %41 : vector<1x8x8x128xf32>
    %43 = arith.addf %36, %42 : vector<1x8x8x128xf32>
    %c0_22 = arith.constant 0 : index
    %c1_23 = arith.constant 1 : index
    %c1_24 = arith.constant 1 : index
    %c0_25 = arith.constant 0 : index
    %44 = vector.load %arg2[%c0_22, %c1_23, %c1_24, %c0_25] : memref<1x12x12x128xf32, #tpu.memory_space<vmem>>, vector<1x8x8x128xf32>
    %45 = vector.extract_strided_slice %0 {offsets = [1, 1, 0], sizes = [1, 1, 128], strides = [1, 1, 1]} : vector<5x5x128xf32> to vector<1x1x128xf32>
    %46 = vector.shape_cast %45 : vector<1x1x128xf32> to vector<128xf32>
    %47 = vector.shape_cast %46 : vector<128xf32> to vector<1x1x1x128xf32>
    %48 = vector.broadcast %47 : vector<1x1x1x128xf32> to vector<1x8x8x128xf32>
    %49 = arith.mulf %44, %48 : vector<1x8x8x128xf32>
    %50 = arith.addf %43, %49 : vector<1x8x8x128xf32>
    %c0_26 = arith.constant 0 : index
    %c1_27 = arith.constant 1 : index
    %c2_28 = arith.constant 2 : index
    %c0_29 = arith.constant 0 : index
    %51 = vector.load %arg2[%c0_26, %c1_27, %c2_28, %c0_29] : memref<1x12x12x128xf32, #tpu.memory_space<vmem>>, vector<1x8x8x128xf32>
    %52 = vector.extract_strided_slice %0 {offsets = [1, 2, 0], sizes = [1, 1, 128], strides = [1, 1, 1]} : vector<5x5x128xf32> to vector<1x1x128xf32>
    %53 = vector.shape_cast %52 : vector<1x1x128xf32> to vector<128xf32>
    %54 = vector.shape_cast %53 : vector<128xf32> to vector<1x1x1x128xf32>
    %55 = vector.broadcast %54 : vector<1x1x1x128xf32> to vector<1x8x8x128xf32>
    %56 = arith.mulf %51, %55 : vector<1x8x8x128xf32>
    %57 = arith.addf %50, %56 : vector<1x8x8x128xf32>
    %c0_30 = arith.constant 0 : index
    %c1_31 = arith.constant 1 : index
    %c3_32 = arith.constant 3 : index
    %c0_33 = arith.constant 0 : index
    %58 = vector.load %arg2[%c0_30, %c1_31, %c3_32, %c0_33] : memref<1x12x12x128xf32, #tpu.memory_space<vmem>>, vector<1x8x8x128xf32>
    %59 = vector.extract_strided_slice %0 {offsets = [1, 3, 0], sizes = [1, 1, 128], strides = [1, 1, 1]} : vector<5x5x128xf32> to vector<1x1x128xf32>
    %60 = vector.shape_cast %59 : vector<1x1x128xf32> to vector<128xf32>
    %61 = vector.shape_cast %60 : vector<128xf32> to vector<1x1x1x128xf32>
    %62 = vector.broadcast %61 : vector<1x1x1x128xf32> to vector<1x8x8x128xf32>
    %63 = arith.mulf %58, %62 : vector<1x8x8x128xf32>
    %64 = arith.addf %57, %63 : vector<1x8x8x128xf32>
    %c0_34 = arith.constant 0 : index
    %c1_35 = arith.constant 1 : index
    %c4_36 = arith.constant 4 : index
    %c0_37 = arith.constant 0 : index
    %65 = vector.load %arg2[%c0_34, %c1_35, %c4_36, %c0_37] : memref<1x12x12x128xf32, #tpu.memory_space<vmem>>, vector<1x8x8x128xf32>
    %66 = vector.extract_strided_slice %0 {offsets = [1, 4, 0], sizes = [1, 1, 128], strides = [1, 1, 1]} : vector<5x5x128xf32> to vector<1x1x128xf32>
    %67 = vector.shape_cast %66 : vector<1x1x128xf32> to vector<128xf32>
    %68 = vector.shape_cast %67 : vector<128xf32> to vector<1x1x1x128xf32>
    %69 = vector.broadcast %68 : vector<1x1x1x128xf32> to vector<1x8x8x128xf32>
    %70 = arith.mulf %65, %69 : vector<1x8x8x128xf32>
    %71 = arith.addf %64, %70 : vector<1x8x8x128xf32>
    %c0_38 = arith.constant 0 : index
    %c2_39 = arith.constant 2 : index
    %c0_40 = arith.constant 0 : index
    %c0_41 = arith.constant 0 : index
    %72 = vector.load %arg2[%c0_38, %c2_39, %c0_40, %c0_41] : memref<1x12x12x128xf32, #tpu.memory_space<vmem>>, vector<1x8x8x128xf32>
    %73 = vector.extract_strided_slice %0 {offsets = [2, 0, 0], sizes = [1, 1, 128], strides = [1, 1, 1]} : vector<5x5x128xf32> to vector<1x1x128xf32>
    %74 = vector.shape_cast %73 : vector<1x1x128xf32> to vector<128xf32>
    %75 = vector.shape_cast %74 : vector<128xf32> to vector<1x1x1x128xf32>
    %76 = vector.broadcast %75 : vector<1x1x1x128xf32> to vector<1x8x8x128xf32>
    %77 = arith.mulf %72, %76 : vector<1x8x8x128xf32>
    %78 = arith.addf %71, %77 : vector<1x8x8x128xf32>
    %c0_42 = arith.constant 0 : index
    %c2_43 = arith.constant 2 : index
    %c1_44 = arith.constant 1 : index
    %c0_45 = arith.constant 0 : index
    %79 = vector.load %arg2[%c0_42, %c2_43, %c1_44, %c0_45] : memref<1x12x12x128xf32, #tpu.memory_space<vmem>>, vector<1x8x8x128xf32>
    %80 = vector.extract_strided_slice %0 {offsets = [2, 1, 0], sizes = [1, 1, 128], strides = [1, 1, 1]} : vector<5x5x128xf32> to vector<1x1x128xf32>
    %81 = vector.shape_cast %80 : vector<1x1x128xf32> to vector<128xf32>
    %82 = vector.shape_cast %81 : vector<128xf32> to vector<1x1x1x128xf32>
    %83 = vector.broadcast %82 : vector<1x1x1x128xf32> to vector<1x8x8x128xf32>
    %84 = arith.mulf %79, %83 : vector<1x8x8x128xf32>
    %85 = arith.addf %78, %84 : vector<1x8x8x128xf32>
    %c0_46 = arith.constant 0 : index
    %c2_47 = arith.constant 2 : index
    %c2_48 = arith.constant 2 : index
    %c0_49 = arith.constant 0 : index
    %86 = vector.load %arg2[%c0_46, %c2_47, %c2_48, %c0_49] : memref<1x12x12x128xf32, #tpu.memory_space<vmem>>, vector<1x8x8x128xf32>
    %87 = vector.extract_strided_slice %0 {offsets = [2, 2, 0], sizes = [1, 1, 128], strides = [1, 1, 1]} : vector<5x5x128xf32> to vector<1x1x128xf32>
    %88 = vector.shape_cast %87 : vector<1x1x128xf32> to vector<128xf32>
    %89 = vector.shape_cast %88 : vector<128xf32> to vector<1x1x1x128xf32>
    %90 = vector.broadcast %89 : vector<1x1x1x128xf32> to vector<1x8x8x128xf32>
    %91 = arith.mulf %86, %90 : vector<1x8x8x128xf32>
    %92 = arith.addf %85, %91 : vector<1x8x8x128xf32>
    %c0_50 = arith.constant 0 : index
    %c2_51 = arith.constant 2 : index
    %c3_52 = arith.constant 3 : index
    %c0_53 = arith.constant 0 : index
    %93 = vector.load %arg2[%c0_50, %c2_51, %c3_52, %c0_53] : memref<1x12x12x128xf32, #tpu.memory_space<vmem>>, vector<1x8x8x128xf32>
    %94 = vector.extract_strided_slice %0 {offsets = [2, 3, 0], sizes = [1, 1, 128], strides = [1, 1, 1]} : vector<5x5x128xf32> to vector<1x1x128xf32>
    %95 = vector.shape_cast %94 : vector<1x1x128xf32> to vector<128xf32>
    %96 = vector.shape_cast %95 : vector<128xf32> to vector<1x1x1x128xf32>
    %97 = vector.broadcast %96 : vector<1x1x1x128xf32> to vector<1x8x8x128xf32>
    %98 = arith.mulf %93, %97 : vector<1x8x8x128xf32>
    %99 = arith.addf %92, %98 : vector<1x8x8x128xf32>
    %c0_54 = arith.constant 0 : index
    %c2_55 = arith.constant 2 : index
    %c4_56 = arith.constant 4 : index
    %c0_57 = arith.constant 0 : index
    %100 = vector.load %arg2[%c0_54, %c2_55, %c4_56, %c0_57] : memref<1x12x12x128xf32, #tpu.memory_space<vmem>>, vector<1x8x8x128xf32>
    %101 = vector.extract_strided_slice %0 {offsets = [2, 4, 0], sizes = [1, 1, 128], strides = [1, 1, 1]} : vector<5x5x128xf32> to vector<1x1x128xf32>
    %102 = vector.shape_cast %101 : vector<1x1x128xf32> to vector<128xf32>
    %103 = vector.shape_cast %102 : vector<128xf32> to vector<1x1x1x128xf32>
    %104 = vector.broadcast %103 : vector<1x1x1x128xf32> to vector<1x8x8x128xf32>
    %105 = arith.mulf %100, %104 : vector<1x8x8x128xf32>
    %106 = arith.addf %99, %105 : vector<1x8x8x128xf32>
    %c0_58 = arith.constant 0 : index
    %c3_59 = arith.constant 3 : index
    %c0_60 = arith.constant 0 : index
    %c0_61 = arith.constant 0 : index
    %107 = vector.load %arg2[%c0_58, %c3_59, %c0_60, %c0_61] : memref<1x12x12x128xf32, #tpu.memory_space<vmem>>, vector<1x8x8x128xf32>
    %108 = vector.extract_strided_slice %0 {offsets = [3, 0, 0], sizes = [1, 1, 128], strides = [1, 1, 1]} : vector<5x5x128xf32> to vector<1x1x128xf32>
    %109 = vector.shape_cast %108 : vector<1x1x128xf32> to vector<128xf32>
    %110 = vector.shape_cast %109 : vector<128xf32> to vector<1x1x1x128xf32>
    %111 = vector.broadcast %110 : vector<1x1x1x128xf32> to vector<1x8x8x128xf32>
    %112 = arith.mulf %107, %111 : vector<1x8x8x128xf32>
    %113 = arith.addf %106, %112 : vector<1x8x8x128xf32>
    %c0_62 = arith.constant 0 : index
    %c3_63 = arith.constant 3 : index
    %c1_64 = arith.constant 1 : index
    %c0_65 = arith.constant 0 : index
    %114 = vector.load %arg2[%c0_62, %c3_63, %c1_64, %c0_65] : memref<1x12x12x128xf32, #tpu.memory_space<vmem>>, vector<1x8x8x128xf32>
    %115 = vector.extract_strided_slice %0 {offsets = [3, 1, 0], sizes = [1, 1, 128], strides = [1, 1, 1]} : vector<5x5x128xf32> to vector<1x1x128xf32>
    %116 = vector.shape_cast %115 : vector<1x1x128xf32> to vector<128xf32>
    %117 = vector.shape_cast %116 : vector<128xf32> to vector<1x1x1x128xf32>
    %118 = vector.broadcast %117 : vector<1x1x1x128xf32> to vector<1x8x8x128xf32>
    %119 = arith.mulf %114, %118 : vector<1x8x8x128xf32>
    %120 = arith.addf %113, %119 : vector<1x8x8x128xf32>
    %c0_66 = arith.constant 0 : index
    %c3_67 = arith.constant 3 : index
    %c2_68 = arith.constant 2 : index
    %c0_69 = arith.constant 0 : index
    %121 = vector.load %arg2[%c0_66, %c3_67, %c2_68, %c0_69] : memref<1x12x12x128xf32, #tpu.memory_space<vmem>>, vector<1x8x8x128xf32>
    %122 = vector.extract_strided_slice %0 {offsets = [3, 2, 0], sizes = [1, 1, 128], strides = [1, 1, 1]} : vector<5x5x128xf32> to vector<1x1x128xf32>
    %123 = vector.shape_cast %122 : vector<1x1x128xf32> to vector<128xf32>
    %124 = vector.shape_cast %123 : vector<128xf32> to vector<1x1x1x128xf32>
    %125 = vector.broadcast %124 : vector<1x1x1x128xf32> to vector<1x8x8x128xf32>
    %126 = arith.mulf %121, %125 : vector<1x8x8x128xf32>
    %127 = arith.addf %120, %126 : vector<1x8x8x128xf32>
    %c0_70 = arith.constant 0 : index
    %c3_71 = arith.constant 3 : index
    %c3_72 = arith.constant 3 : index
    %c0_73 = arith.constant 0 : index
    %128 = vector.load %arg2[%c0_70, %c3_71, %c3_72, %c0_73] : memref<1x12x12x128xf32, #tpu.memory_space<vmem>>, vector<1x8x8x128xf32>
    %129 = vector.extract_strided_slice %0 {offsets = [3, 3, 0], sizes = [1, 1, 128], strides = [1, 1, 1]} : vector<5x5x128xf32> to vector<1x1x128xf32>
    %130 = vector.shape_cast %129 : vector<1x1x128xf32> to vector<128xf32>
    %131 = vector.shape_cast %130 : vector<128xf32> to vector<1x1x1x128xf32>
    %132 = vector.broadcast %131 : vector<1x1x1x128xf32> to vector<1x8x8x128xf32>
    %133 = arith.mulf %128, %132 : vector<1x8x8x128xf32>
    %134 = arith.addf %127, %133 : vector<1x8x8x128xf32>
    %c0_74 = arith.constant 0 : index
    %c3_75 = arith.constant 3 : index
    %c4_76 = arith.constant 4 : index
    %c0_77 = arith.constant 0 : index
    %135 = vector.load %arg2[%c0_74, %c3_75, %c4_76, %c0_77] : memref<1x12x12x128xf32, #tpu.memory_space<vmem>>, vector<1x8x8x128xf32>
    %136 = vector.extract_strided_slice %0 {offsets = [3, 4, 0], sizes = [1, 1, 128], strides = [1, 1, 1]} : vector<5x5x128xf32> to vector<1x1x128xf32>
    %137 = vector.shape_cast %136 : vector<1x1x128xf32> to vector<128xf32>
    %138 = vector.shape_cast %137 : vector<128xf32> to vector<1x1x1x128xf32>
    %139 = vector.broadcast %138 : vector<1x1x1x128xf32> to vector<1x8x8x128xf32>
    %140 = arith.mulf %135, %139 : vector<1x8x8x128xf32>
    %141 = arith.addf %134, %140 : vector<1x8x8x128xf32>
    %c0_78 = arith.constant 0 : index
    %c4_79 = arith.constant 4 : index
    %c0_80 = arith.constant 0 : index
    %c0_81 = arith.constant 0 : index
    %142 = vector.load %arg2[%c0_78, %c4_79, %c0_80, %c0_81] : memref<1x12x12x128xf32, #tpu.memory_space<vmem>>, vector<1x8x8x128xf32>
    %143 = vector.extract_strided_slice %0 {offsets = [4, 0, 0], sizes = [1, 1, 128], strides = [1, 1, 1]} : vector<5x5x128xf32> to vector<1x1x128xf32>
    %144 = vector.shape_cast %143 : vector<1x1x128xf32> to vector<128xf32>
    %145 = vector.shape_cast %144 : vector<128xf32> to vector<1x1x1x128xf32>
    %146 = vector.broadcast %145 : vector<1x1x1x128xf32> to vector<1x8x8x128xf32>
    %147 = arith.mulf %142, %146 : vector<1x8x8x128xf32>
    %148 = arith.addf %141, %147 : vector<1x8x8x128xf32>
    %c0_82 = arith.constant 0 : index
    %c4_83 = arith.constant 4 : index
    %c1_84 = arith.constant 1 : index
    %c0_85 = arith.constant 0 : index
    %149 = vector.load %arg2[%c0_82, %c4_83, %c1_84, %c0_85] : memref<1x12x12x128xf32, #tpu.memory_space<vmem>>, vector<1x8x8x128xf32>
    %150 = vector.extract_strided_slice %0 {offsets = [4, 1, 0], sizes = [1, 1, 128], strides = [1, 1, 1]} : vector<5x5x128xf32> to vector<1x1x128xf32>
    %151 = vector.shape_cast %150 : vector<1x1x128xf32> to vector<128xf32>
    %152 = vector.shape_cast %151 : vector<128xf32> to vector<1x1x1x128xf32>
    %153 = vector.broadcast %152 : vector<1x1x1x128xf32> to vector<1x8x8x128xf32>
    %154 = arith.mulf %149, %153 : vector<1x8x8x128xf32>
    %155 = arith.addf %148, %154 : vector<1x8x8x128xf32>
    %c0_86 = arith.constant 0 : index
    %c4_87 = arith.constant 4 : index
    %c2_88 = arith.constant 2 : index
    %c0_89 = arith.constant 0 : index
    %156 = vector.load %arg2[%c0_86, %c4_87, %c2_88, %c0_89] : memref<1x12x12x128xf32, #tpu.memory_space<vmem>>, vector<1x8x8x128xf32>
    %157 = vector.extract_strided_slice %0 {offsets = [4, 2, 0], sizes = [1, 1, 128], strides = [1, 1, 1]} : vector<5x5x128xf32> to vector<1x1x128xf32>
    %158 = vector.shape_cast %157 : vector<1x1x128xf32> to vector<128xf32>
    %159 = vector.shape_cast %158 : vector<128xf32> to vector<1x1x1x128xf32>
    %160 = vector.broadcast %159 : vector<1x1x1x128xf32> to vector<1x8x8x128xf32>
    %161 = arith.mulf %156, %160 : vector<1x8x8x128xf32>
    %162 = arith.addf %155, %161 : vector<1x8x8x128xf32>
    %c0_90 = arith.constant 0 : index
    %c4_91 = arith.constant 4 : index
    %c3_92 = arith.constant 3 : index
    %c0_93 = arith.constant 0 : index
    %163 = vector.load %arg2[%c0_90, %c4_91, %c3_92, %c0_93] : memref<1x12x12x128xf32, #tpu.memory_space<vmem>>, vector<1x8x8x128xf32>
    %164 = vector.extract_strided_slice %0 {offsets = [4, 3, 0], sizes = [1, 1, 128], strides = [1, 1, 1]} : vector<5x5x128xf32> to vector<1x1x128xf32>
    %165 = vector.shape_cast %164 : vector<1x1x128xf32> to vector<128xf32>
    %166 = vector.shape_cast %165 : vector<128xf32> to vector<1x1x1x128xf32>
    %167 = vector.broadcast %166 : vector<1x1x1x128xf32> to vector<1x8x8x128xf32>
    %168 = arith.mulf %163, %167 : vector<1x8x8x128xf32>
    %169 = arith.addf %162, %168 : vector<1x8x8x128xf32>
    %c0_94 = arith.constant 0 : index
    %c4_95 = arith.constant 4 : index
    %c4_96 = arith.constant 4 : index
    %c0_97 = arith.constant 0 : index
    %170 = vector.load %arg2[%c0_94, %c4_95, %c4_96, %c0_97] : memref<1x12x12x128xf32, #tpu.memory_space<vmem>>, vector<1x8x8x128xf32>
    %171 = vector.extract_strided_slice %0 {offsets = [4, 4, 0], sizes = [1, 1, 128], strides = [1, 1, 1]} : vector<5x5x128xf32> to vector<1x1x128xf32>
    %172 = vector.shape_cast %171 : vector<1x1x128xf32> to vector<128xf32>
    %173 = vector.shape_cast %172 : vector<128xf32> to vector<1x1x1x128xf32>
    %174 = vector.broadcast %173 : vector<1x1x1x128xf32> to vector<1x8x8x128xf32>
    %175 = arith.mulf %170, %174 : vector<1x8x8x128xf32>
    %176 = arith.addf %169, %175 : vector<1x8x8x128xf32>
    %c0_98 = arith.constant 0 : index
    %c0_99 = arith.constant 0 : index
    %177 = vector.load %arg4[%c0_98, %c0_99] : memref<1x128xf32, #tpu.memory_space<vmem>>, vector<1x128xf32>
    %178 = vector.shape_cast %177 : vector<1x128xf32> to vector<1x1x1x128xf32>
    %179 = vector.broadcast %178 : vector<1x1x1x128xf32> to vector<1x8x8x128xf32>
    %180 = arith.addf %176, %179 : vector<1x8x8x128xf32>
    %181 = vector.shape_cast %180 : vector<1x8x8x128xf32> to vector<64x128xf32>
    %182 = arith.truncf %181 : vector<64x128xf32> to vector<64x128xbf16>
    %c0_100 = arith.constant 0 : index
    %c0_101 = arith.constant 0 : index
    %183 = vector.load %arg5[%c0_100, %c0_101] : memref<128x128xbf16, #tpu.memory_space<vmem>>, vector<128x128xbf16>
    %cst_102 = arith.constant dense<0.000000e+00> : vector<64x128xf32>
    %184 = tpu.matmul %182, %183, %cst_102 {dimension_numbers = #tpu.dot_dimension_numbers<[1], [0], [0], [1], [0, 0, 1, 1], [], []>} : vector<64x128xbf16>, vector<128x128xbf16>, vector<64x128xf32> -> vector<64x128xf32>
    %c0_103 = arith.constant 0 : index
    %c0_104 = arith.constant 0 : index
    %c0_105 = arith.constant 0 : index
    %185 = vector.load %arg1[%c0_103, %c0_104, %c0_105] : memref<1x64x128xf32, #tpu.memory_space<vmem>>, vector<1x64x128xf32>
    %186 = vector.shape_cast %185 : vector<1x64x128xf32> to vector<64x128xf32>
    %187 = arith.addf %186, %184 : vector<64x128xf32>
    %c0_106 = arith.constant 0 : index
    %c0_107 = arith.constant 0 : index
    %c0_108 = arith.constant 0 : index
    %188 = vector.load %arg6[%c0_106, %c0_107, %c0_108] : memref<1x64x128xf32, #tpu.memory_space<vmem>>, vector<1x64x128xf32>
    %189 = vector.shape_cast %188 : vector<1x64x128xf32> to vector<64x128xf32>
    %190 = vector.shape_cast %187 : vector<64x128xf32> to vector<1x64x128xf32>
    tpu.vector_store %arg6[%c0_106, %c0_107, %c0_108], %190 {strides = array<i32>} : memref<1x64x128xf32, #tpu.memory_space<vmem>>, vector<1x64x128xf32>,
    return
  }
  func.func @transform_0(%arg0: i32) -> (i32, i32, i32) {
    %c0_i32 = arith.constant 0 : i32
    %c0_i32_0 = arith.constant 0 : i32
    %c0_i32_1 = arith.constant 0 : i32
    return %arg0, %c0_i32, %c0_i32_0 : i32, i32, i32
  }
  func.func @transform_1(%arg0: i32) -> (i32, i32, i32, i32) {
    %c0_i32 = arith.constant 0 : i32
    %c0_i32_0 = arith.constant 0 : i32
    %c0_i32_1 = arith.constant 0 : i32
    %c0_i32_2 = arith.constant 0 : i32
    return %arg0, %c0_i32, %c0_i32_0, %c0_i32_1 : i32, i32, i32, i32
  }
  func.func @transform_2(%arg0: i32) -> (i32, i32, i32) {
    %c0_i32 = arith.constant 0 : i32
    %c0_i32_0 = arith.constant 0 : i32
    %c0_i32_1 = arith.constant 0 : i32
    %c0_i32_2 = arith.constant 0 : i32
    return %c0_i32, %c0_i32_0, %c0_i32_1 : i32, i32, i32
  }
  func.func @transform_3(%arg0: i32) -> (i32, i32) {
    %c0_i32 = arith.constant 0 : i32
    %c0_i32_0 = arith.constant 0 : i32
    %c0_i32_1 = arith.constant 0 : i32
    return %c0_i32, %c0_i32_0 : i32, i32
  }
  func.func @transform_4(%arg0: i32) -> (i32, i32) {
    %c0_i32 = arith.constant 0 : i32
    %c0_i32_0 = arith.constant 0 : i32
    %c0_i32_1 = arith.constant 0 : i32
    return %c0_i32, %c0_i32_0 : i32, i32
  }
  func.func @transform_5(%arg0: i32) -> (i32, i32, i32) {
    %c0_i32 = arith.constant 0 : i32
    %c0_i32_0 = arith.constant 0 : i32
    %c0_i32_1 = arith.constant 0 : i32
    return %arg0, %c0_i32, %c0_i32_0 : i32, i32, i32
  }
}

</mosaic_0001>

<bundles_post_ra>
// kernel: nchw_attention_lepe.3
= control target key start
LH: loop header
LB: loop body
LE: loop exit
PB: predicated region body
PF: predicated region fallthrough
CT: control target
= control target key end

     0   :  { %10 = vsyncpa [#allocation3], 0  ;;  %s2244_s0 = inlined_call_operand.vmem [shape: f32[2,64,128], index: 0, kind: input, shape index: {}]   ;;  %s2245_s1 = inlined_call_operand.vmem [shape: f32[2,12,12,128], index: 1, kind: input, shape index: {}]   ;;  %s2246_s2 = inlined_call_operand.vmem [shape: f32[5,5,128], index: 2, kind: input, shape index: {}]   ;;  %s2247_s3 = inlined_call_operand.vmem [shape: f32[1,128], index: 3, kind: input, shape index: {}]   ;;  %s2248_s4 = inlined_call_operand.vmem [shape: bf16[128,128], index: 4, kind: input, shape index: {}]   ;;  %s2249_s5 = inlined_call_operand.hbm [shape: f32[2,64,128], index: 5, kind: output, shape index: {}]  }
   0x1   :  { %12 = vsyncpa [#allocation3 + $0x1], 0  ;;  %s1478_s18 = smov 0   ;;  %s1480_s19 = smov 0  }
   0x2   :  { %s1482_s20 = smov 0   ;;  %s1484_s21 = smov 0  }
   0x3 LB: > { %s1499_s22 = sadd.s32 4294967295, %s1444_s21   ;;  %s1100_s23 = sadd.s32 4294967294, %s1444_s21   ;;  %s1444_s21 = sphi %s1484_s21, %s2311_s21   ;;  %s1440_s20 = sphi %s1482_s20, %s2310_s20   ;;  %s1436_s19 = sphi %s1480_s19, %s2309_s19   ;;  %s1432_s18 = sphi %s1478_s18, %s2308_s18  }
   0x4   : > { %s1503_s24 = sadd.s32 1, %s1444_s21   ;;  %s140_s25 = sadd.s32 1, %s1440_s20 }
   0x5   : > { %s137_s26 = ssub.s32 %s1444_s21, %s1503_s24  ;;  %p150_p0 = scmp.ne.s32.totalorder %s1440_s20, %s1436_s19 }
   0x6   : > { %p138_p1 = scmp.eq.s32.totalorder %s137_s26, 0  ;;  %p151_p2 = scmp.eq.s32.totalorder %s1499_s22, 1 }
   0x7   : > { %p156_p3 = scmp.ne.s32.totalorder %s1436_s19, %s1432_s18  ;;  %p157_p4 = scmp.eq.s32.totalorder %s1100_s23, 1 }
   0x8   : > { %s1514_s27 = scalar_select %p138_p1, %s1440_s20, %s140_s25  }
   0x9   : > { %p1516_p5 = por %p151_p2, %p150_p0  ;;  %p1520_p6 = por %p157_p4, %p156_p3 }
   0xa   : > { %p1103_p7 = scmp.ge.s32.totalorder %s1444_s21, 1  ;;  %p200_p8 = scmp.lt.s32.totalorder %s1444_s21, 3 }
   0xc   : > { %p201_p9 = pnand %p1103_p7, %p200_p8 }
   0xe   : > { %204 = sbr.rel (%p201_p9) target bundleno = 300 (0x12c), region = 40 }
  0x13   : > { %v1313_v0 = vld [vmem:[%s2248_s4 + $0x38] sm:$0xff]  ;;  %p233_p10 = scmp.lt.s32.totalorder %s1499_s22, 1  ;;  %v1312_v1 = vld [vmem:[%s2248_s4 + $0x30] sm:$0xff]  ;;  %v243_v2 = vld [vmem:[%s2246_s2] sm:$0x1f]  ;;  %s230_s8 = sand.u32 1, %s1436_s19  }
  0x14   : > { %957 = vmatpush.bf16.msra.mxu0 %v1313_v0  ;;  %1315 = vmatpush.bf16.msra.mxu1 %v1313_v0  ;;  %v1540_v3 = vperm.slane %v243_v2, 0  ;;  %v1542_v4 = vperm.slane %v243_v2, 1  ;;  %v1544_v5 = vperm.slane %v243_v2, 2  ;;  %v1311_v6 = vld [vmem:[%s2248_s4 + $0x28] sm:$0xff]  ;;  %v1557_v8 = vperm.slane %v243_v2, 3  ;;  %v1310_v25 = vld [vmem:[%s2248_s4 + $0x20] sm:$0xff] }
  0x15   : > { %s1534_s9 = scalar_select %p233_p10, %s1499_s22, 1  ;;  %1316 = vmatpush.bf16.msra.mxu2 %v1313_v0  ;;  %1317 = vmatpush.bf16.msra.mxu3 %v1313_v0  ;;  %v244_v7 = vld [vmem:[%s2246_s2 + $0x8] sm:$0x1f]  ;;  %v1568_v18 = vperm.slane %v243_v2, 4  ;;  %v245_v30 = vld [vmem:[%s2246_s2 + $0x10] sm:$0x1f] }
  0x16   : > { %2280 = vst [vmem:[#allocation5_spill] sm:$0xff] %v1540_v3  ;;  %v1581_v29 = vperm.slane %v244_v7, 0  ;;  %v1588_v35 = vperm.slane %v244_v7, 1  ;;  %v1590_v36 = vperm.slane %v244_v7, 2  ;;  %v1593_v39 = vperm.slane %v244_v7, 3  ;;  %v1309_v41 = vld [vmem:[%s2248_s4 + $0x18] sm:$0xff] }
  0x17   : > { %s1339_s12 = smul.u32 192, %s1534_s9  ;;  %2281 = vst [vmem:[#allocation6_spill] sm:$0xff] %v1542_v4  ;;  %v1595_v40 = vperm.slane %v244_v7, 4  ;;  %v1604_v45 = vperm.slane %v245_v30, 0  ;;  %v1606_v46 = vperm.slane %v245_v30, 1  ;;  %v1616_v51 = vperm.slane %v245_v30, 2 }
  0x18   : > { %2282 = vst [vmem:[#allocation7_spill] sm:$0xff] %v1544_v5  ;;  %958 = vmatpush.bf16.msra.mxu0 %v1312_v1  ;;  %1318 = vmatpush.bf16.msra.mxu1 %v1312_v1  ;;  %v246_v47 = vld [vmem:[%s2246_s2 + $0x18] sm:$0x1f]  ;;  %v1618_v52 = vperm.slane %v245_v30, 3  ;;  %v1626_v57 = vperm.slane %v245_v30, 4  ;;  %v1308_v63 = vld [vmem:[%s2248_s4 + $0x10] sm:$0xff] }
  0x19   : > { %s1552_s17 = scalar_lea.vmem %s2245_s1, %s1339_s12  ;;  %1319 = vmatpush.bf16.msra.mxu2 %v1312_v1  ;;  %1320 = vmatpush.bf16.msra.mxu3 %v1312_v1  ;;  %2283 = vst [vmem:[#allocation8_spill] sm:$0xff] %v1616_v51  ;;  %v1644_v7 = vperm.slane %v246_v47, 0  ;;  %s1104_s13 = sshll.u32 %s230_s8, 6 }
  0x1a   : > { %v248_v9 = vld [vmem:[%s1552_s17] sm:$0xff]  ;;  %v249_v10 = vld [vmem:[%s1552_s17 + $0x10] sm:$0xff]  ;;  %2284 = vst [vmem:[#allocation9_spill] sm:$0xff] %v1618_v52  ;;  %s2193_s14 = scalar_lea.vmem [#allocation2], %s1104_s13  ;;  %s1011_s30 = scalar_lea.sflag [#allocation3], %s230_s8 }
  0x1b   : > { %v273_v11 = vld [vmem:[%s1552_s17 + $0x1] sm:$0xff]  ;;  %v257_v12 = vmul.f32 %v1540_v3, %v248_v9  ;;  %v258_v13 = vmul.f32 %v1540_v3, %v249_v10  ;;  %v274_v14 = vld [vmem:[%s1552_s17 + $0x11] sm:$0xff]  ;;  %v383_v44 = vmul.f32 %v1581_v29, %v249_v10  ;;  %2285 = vst [vmem:[#allocation10_spill] sm:$0xff] %v1626_v57  ;;  %s1023_s25 = sshll.u32 %s2193_s14, 4  ;;  %s1402_s10 = scalar_lea.hbm %s2249_s5, 128  ;;  %s1024_s25 = int_to_ptr.vmem [resolvable:$true] %s1023_s25 }
  0x1c   : > { %v282_v15 = vmul.f32 %v1542_v4, %v273_v11  ;;  %v298_v16 = vld [vmem:[%s1552_s17 + $0x2] sm:$0xff]  ;;  %v299_v17 = vld [vmem:[%s1552_s17 + $0x12] sm:$0xff]  ;;  %v283_v19 = vmul.f32 %v1542_v4, %v274_v14  ;;  %959 = vmatpush.bf16.msra.mxu0 %v1311_v6  ;;  %1321 = vmatpush.bf16.msra.mxu1 %v1311_v6  ;;  %v408_v54 = vmul.f32 %v1588_v35, %v274_v14 }
  0x1d   : > { %v307_v20 = vmul.f32 %v1544_v5, %v298_v16  ;;  %v308_v21 = vmul.f32 %v1544_v5, %v299_v17  ;;  %v323_v22 = vld [vmem:[%s1552_s17 + $0x3] sm:$0xff]  ;;  %v324_v23 = vld [vmem:[%s1552_s17 + $0x13] sm:$0xff]  ;;  %1322 = vmatpush.bf16.msra.mxu2 %v1311_v6  ;;  %1323 = vmatpush.bf16.msra.mxu3 %v1311_v6  ;;  %v433_v59 = vmul.f32 %v1590_v36, %v299_v17 }
  0x1e   : > { %v348_v24 = vld [vmem:[%s1552_s17 + $0x4] sm:$0xff]  ;;  %v290_v26 = vadd.f32 %v282_v15, %v257_v12  ;;  %v332_v27 = vmul.f32 %v1557_v8, %v323_v22  ;;  %v349_v28 = vld [vmem:[%s1552_s17 + $0x14] sm:$0xff]  ;;  %v291_v31 = vadd.f32 %v283_v19, %v258_v13  ;;  %v333_v32 = vmul.f32 %v1557_v8, %v324_v23  ;;  %2286 = vst [vmem:[#allocation11_spill] sm:$0xff] %v1644_v7 }
  0x1f   : > { %v357_v34 = vmul.f32 %v1568_v18, %v348_v24  ;;  %v358_v38 = vmul.f32 %v1568_v18, %v349_v28  ;;  %v1601_v43 = vld [vmem:[%s1552_s17 + $0x20] sm:$0xff]  ;;  %v458_v62 = vmul.f32 %v1593_v39, %v324_v23  ;;  %v483_v6 = vmul.f32 %v1595_v40, %v349_v28  ;;  %v1649_v11 = vld [vmem:[%s1552_s17 + $0x30] sm:$0xff] }
  0x20   : > { %v315_v33 = vadd.f32 %v307_v20, %v290_v26  ;;  %v316_v37 = vadd.f32 %v308_v21, %v291_v31  ;;  %960 = vmatpush.bf16.msra.mxu0 %v1310_v25  ;;  %1324 = vmatpush.bf16.msra.mxu1 %v1310_v25  ;;  %v384_v49 = vmul.f32 %v1601_v43, %v1581_v29  ;;  %v1614_v50 = vld [vmem:[%s1552_s17 + $0x21] sm:$0xff]  ;;  %v1653_v13 = vperm.slane %v246_v47, 1  ;;  %v1658_v16 = vld [vmem:[%s1552_s17 + $0x31] sm:$0xff] }
  0x21   : > { %1325 = vmatpush.bf16.msra.mxu2 %v1310_v25  ;;  %1326 = vmatpush.bf16.msra.mxu3 %v1310_v25  ;;  %v409_v55 = vmul.f32 %v1614_v50, %v1588_v35  ;;  %v1624_v56 = vld [vmem:[%s1552_s17 + $0x22] sm:$0xff]  ;;  %v509_v12 = vmul.f32 %v1601_v43, %v1604_v45  ;;  %v510_v15 = vmul.f32 %v1649_v11, %v1604_v45  ;;  %v1663_v19 = vld [vmem:[%s1552_s17 + $0x32] sm:$0xff]  ;;  %v1665_v20 = vperm.slane %v246_v47, 2 }
  0x22   : > { %v340_v42 = vadd.f32 %v332_v27, %v315_v33  ;;  %v341_v48 = vadd.f32 %v333_v32, %v316_v37  ;;  %v434_v60 = vmul.f32 %v1624_v56, %v1590_v36  ;;  %v1632_v61 = vld [vmem:[%s1552_s17 + $0x23] sm:$0xff]  ;;  %2287 = vst [vmem:[#allocation12_spill] sm:$0xff] %v1653_v13  ;;  %v534_v17 = vmul.f32 %v1614_v50, %v1606_v46  ;;  %v1676_v25 = vld [vmem:[%s1552_s17 + $0x33] sm:$0xff] }
  0x23   : > { %v459_v1 = vmul.f32 %v1632_v61, %v1593_v39  ;;  %v1641_v2 = vld [vmem:[%s1552_s17 + $0x24] sm:$0xff]  ;;  %2288 = vst [vmem:[#allocation13_spill] sm:$0xff] %v1665_v20  ;;  %v535_v22 = vmul.f32 %v1658_v16, %v1606_v46  ;;  %v559_v23 = vmul.f32 %v1624_v56, %v1616_v51  ;;  %v1673_v24 = vmul.f32 %v1663_v19, %v1616_v51  ;;  %v1690_v31 = vld [vmem:[%s1552_s17 + $0x34] sm:$0xff] }
  0x24   : > { %v365_v53 = vadd.f32 %v357_v34, %v340_v42  ;;  %v366_v58 = vadd.f32 %v358_v38, %v341_v48  ;;  %961 = vmatpush.bf16.msra.mxu0 %v1309_v41  ;;  %1327 = vmatpush.bf16.msra.mxu1 %v1309_v41  ;;  %v484_v10 = vmul.f32 %v1641_v2, %v1595_v40  ;;  %v1307_v26 = vld [vmem:[%s2248_s4 + $0x8] sm:$0xff]  ;;  %v1692_v32 = vperm.slane %v246_v47, 3  ;;  %v1703_v38 = vld [vmem:[%s1552_s17 + $0x40] sm:$0xff] }
  0x25   : > { %1328 = vmatpush.bf16.msra.mxu2 %v1309_v41  ;;  %1329 = vmatpush.bf16.msra.mxu3 %v1309_v41  ;;  %v1683_v28 = vmul.f32 %v1632_v61, %v1618_v52  ;;  %v1687_v30 = vmul.f32 %v1676_v25, %v1618_v52  ;;  %v1696_v34 = vmul.f32 %v1641_v2, %v1626_v57  ;;  %v1705_v41 = vperm.slane %v246_v47, 4  ;;  %v247_v47 = vld [vmem:[%s2246_s2 + $0x20] sm:$0x1f] }
  0x26   : > { %v391_v0 = vadd.f32 %v383_v44, %v365_v53  ;;  %v392_v9 = vadd.f32 %v384_v49, %v366_v58  ;;  %2289 = vst [vmem:[#allocation14_spill] sm:$0xff] %v1692_v32  ;;  %v1700_v37 = vmul.f32 %v1690_v31, %v1626_v57  ;;  %v1709_v44 = vmul.f32 %v1649_v11, %v1644_v7  ;;  %v1716_v49 = vld [vmem:[%s1552_s17 + $0x41] sm:$0xff] }
  0x27   : > { %2290 = vst [vmem:[#allocation15_spill] sm:$0xff] %v1705_v41  ;;  %v1713_v48 = vmul.f32 %v1703_v38, %v1644_v7  ;;  %v1720_v53 = vmul.f32 %v1658_v16, %v1653_v13  ;;  %v1730_v58 = vmul.f32 %v1716_v49, %v1653_v13  ;;  %v1793_v7 = vld [vmem:[%s1552_s17 + $0x50] sm:$0xff] }
  0x28   : > { %v416_v14 = vadd.f32 %v408_v54, %v391_v0  ;;  %v417_v21 = vadd.f32 %v409_v55, %v392_v9  ;;  %962 = vmatpush.bf16.msra.mxu0 %v1308_v63  ;;  %1330 = vmatpush.bf16.msra.mxu1 %v1308_v63  ;;  %v1723_v54 = vld [vmem:[%s1552_s17 + $0x42] sm:$0xff] }
  0x29   : > { %1331 = vmatpush.bf16.msra.mxu2 %v1308_v63  ;;  %1332 = vmatpush.bf16.msra.mxu3 %v1308_v63  ;;  %v1306_v63 = vld [vmem:[%s2248_s4] sm:$0xff] }
  0x2a   : > { %v441_v27 = vadd.f32 %v433_v59, %v416_v14  ;;  %v442_v33 = vadd.f32 %v434_v60, %v417_v21  ;;  %v1734_v59 = vmul.f32 %v1663_v19, %v1665_v20  ;;  %v1738_v60 = vmul.f32 %v1723_v54, %v1665_v20  ;;  %v1755_v14 = vld [vmem:[%s1552_s17 + $0x44] sm:$0xff] }
  0x2b   : > { %v260_v20 = vmul.f32 %v1649_v11, %v1540_v3 }
  0x2c   : > { %v466_v42 = vadd.f32 %v458_v62, %v441_v27  ;;  %v467_v55 = vadd.f32 %v459_v1, %v442_v33  ;;  %v1741_v62 = vld [vmem:[%s1552_s17 + $0x43] sm:$0xff]  ;;  %963 = vmatpush.bf16.msra.mxu0 %v1307_v26  ;;  %1333 = vmatpush.bf16.msra.mxu1 %v1307_v26  ;;  %v1748_v1 = vmul.f32 %v1676_v25, %v1692_v32 }
  0x2d   : > { %v1752_v9 = vmul.f32 %v1741_v62, %v1692_v32  ;;  %1334 = vmatpush.bf16.msra.mxu2 %v1307_v26  ;;  %1335 = vmatpush.bf16.msra.mxu3 %v1307_v26  ;;  %v1759_v27 = vmul.f32 %v1690_v31, %v1705_v41  ;;  %v259_v32 = vmul.f32 %v1601_v43, %v1540_v3  ;;  %v1785_v3 = vperm.slane %v247_v47, 3 }
  0x2e   : > { %v491_v0 = vadd.f32 %v483_v6, %v466_v42  ;;  %v492_v21 = vadd.f32 %v484_v10, %v467_v55  ;;  %v1763_v6 = vmul.f32 %v1755_v14, %v1705_v41  ;;  %v1765_v42 = vperm.slane %v247_v47, 0 }
  0x2f   : > { %v284_v10 = vmul.f32 %v1614_v50, %v1542_v4  ;;  %v285_v26 = vmul.f32 %v1658_v16, %v1542_v4  ;;  %v309_v55 = vmul.f32 %v1624_v56, %v1544_v5  ;;  %v310_v43 = vmul.f32 %v1663_v19, %v1544_v5 }
  0x30   : > { %v517_v33 = vadd.f32 %v509_v12, %v491_v0  ;;  %v518_v13 = vadd.f32 %v510_v15, %v492_v21  ;;  %964 = vmatpush.bf16.msra.mxu0 %v1306_v63  ;;  %1336 = vmatpush.bf16.msra.mxu1 %v1306_v63  ;;  %v1777_v0 = vperm.slane %v247_v47, 1  ;;  %v334_v15 = vmul.f32 %v1632_v61, %v1557_v8 }
  0x31   : > { %1337 = vmatpush.bf16.msra.mxu2 %v1306_v63  ;;  %1338 = vmatpush.bf16.msra.mxu3 %v1306_v63  ;;  %v1783_v21 = vperm.slane %v247_v47, 2  ;;  %v292_v41 = vadd.f32 %v284_v10, %v259_v32  ;;  %v293_v4 = vadd.f32 %v285_v26, %v260_v20  ;;  %v762_v32 = vmul.f32 %v1793_v7, %v1765_v42 }
  0x32   : > { %v542_v12 = vadd.f32 %v534_v17, %v517_v33  ;;  %v543_v50 = vadd.f32 %v535_v22, %v518_v13  ;;  %v335_v17 = vmul.f32 %v1676_v25, %v1557_v8  ;;  %v359_v33 = vmul.f32 %v1641_v2, %v1568_v18 }
  0x33   : > { %v317_v61 = vadd.f32 %v309_v55, %v292_v41  ;;  %v318_v13 = vadd.f32 %v310_v43, %v293_v4  ;;  %v360_v22 = vmul.f32 %v1690_v31, %v1568_v18  ;;  %v385_v2 = vmul.f32 %v1649_v11, %v1581_v29 }
  0x34   : > { %v567_v56 = vadd.f32 %v559_v23, %v542_v12  ;;  %v568_v5 = vadd.f32 %v1673_v24, %v543_v50  ;;  %v761_v23 = vmul.f32 %v1703_v38, %v1765_v42  ;;  %v386_v4 = vmul.f32 %v1703_v38, %v1581_v29  ;;  %v1816_v12 = vld [vmem:[%s1552_s17 + $0x51] sm:$0xff] }
  0x35   : > { %v342_v63 = vadd.f32 %v334_v15, %v317_v61  ;;  %v343_v41 = vadd.f32 %v335_v17, %v318_v13  ;;  %v1810_v26 = vperm.slane %v247_v47, 4  ;;  %v410_v55 = vmul.f32 %v1658_v16, %v1588_v35  ;;  %v1829_v50 = vld [vmem:[%s1552_s17 + $0x52] sm:$0xff] }
  0x36   : > { %v592_v20 = vadd.f32 %v1683_v28, %v567_v56  ;;  %v593_v24 = vadd.f32 %v1687_v30, %v568_v5  ;;  %v786_v28 = vmul.f32 %v1716_v49, %v1777_v0  ;;  %v411_v43 = vmul.f32 %v1716_v49, %v1588_v35 }
  0x37   : > { %v367_v5 = vadd.f32 %v359_v33, %v342_v63  ;;  %v368_v30 = vadd.f32 %v360_v22, %v343_v41  ;;  %v787_v15 = vmul.f32 %v1816_v12, %v1777_v0  ;;  %v811_v47 = vmul.f32 %v1723_v54, %v1783_v21  ;;  %v1842_v22 = vld [vmem:[%s1552_s17 + $0x53] sm:$0xff] }
  0x38   : > { %v617_v10 = vadd.f32 %v1696_v34, %v592_v20  ;;  %v618_v11 = vadd.f32 %v1700_v37, %v593_v24  ;;  %v435_v16 = vmul.f32 %v1663_v19, %v1590_v36  ;;  %v436_v33 = vmul.f32 %v1723_v54, %v1590_v36 }
  0x39   : > { %v393_v56 = vadd.f32 %v385_v2, %v367_v5  ;;  %v394_v17 = vadd.f32 %v386_v4, %v368_v30  ;;  %v812_v61 = vmul.f32 %v1829_v50, %v1783_v21  ;;  %v836_v13 = vmul.f32 %v1741_v62, %v1785_v3  ;;  %v1855_v4 = vld [vmem:[%s1552_s17 + $0x54] sm:$0xff] }
  0x3a   : > { %v643_v34 = vadd.f32 %v1709_v44, %v617_v10  ;;  %v644_v37 = vadd.f32 %v1713_v48, %v618_v11  ;;  %v460_v19 = vmul.f32 %v1676_v25, %v1593_v39  ;;  %v461_v24 = vmul.f32 %v1741_v62, %v1593_v39 }
  0x3b   : > { %v418_v20 = vadd.f32 %v410_v55, %v393_v56  ;;  %v419_v2 = vadd.f32 %v411_v43, %v394_v17  ;;  %v837_v63 = vmul.f32 %v1842_v22, %v1785_v3  ;;  %v861_v41 = vmul.f32 %v1755_v14, %v1810_v26 }
  0x3c   : > { %v668_v44 = vadd.f32 %v1720_v53, %v643_v34  ;;  %v669_v48 = vadd.f32 %v1730_v58, %v644_v37  ;;  %v485_v25 = vmul.f32 %v1690_v31, %v1595_v40  ;;  %v486_v11 = vmul.f32 %v1755_v14, %v1595_v40 }
  0x3d   : > { %v443_v10 = vadd.f32 %v435_v16, %v418_v20  ;;  %v444_v55 = vadd.f32 %v436_v33, %v419_v2  ;;  %v862_v5 = vmul.f32 %v1855_v4, %v1810_v26  ;;  %v511_v30 = vmul.f32 %v1703_v38, %v1604_v45 }
  0x3e   : > { %v693_v53 = vadd.f32 %v1734_v59, %v668_v44  ;;  %v694_v58 = vadd.f32 %v1738_v60, %v669_v48  ;;  %v512_v31 = vmul.f32 %v1793_v7, %v1604_v45  ;;  %v536_v16 = vmul.f32 %v1716_v49, %v1606_v46 }
  0x3f   : > { %v468_v43 = vadd.f32 %v460_v19, %v443_v10  ;;  %v469_v34 = vadd.f32 %v461_v24, %v444_v55  ;;  %v561_v56 = vmul.f32 %v1723_v54, %v1616_v51  ;;  %v562_v17 = vmul.f32 %v1829_v50, %v1616_v51 }
  0x40   : > { %v718_v59 = vadd.f32 %v1748_v1, %v693_v53  ;;  %v719_v60 = vadd.f32 %v1752_v9, %v694_v58  ;;  %v537_v1 = vmul.f32 %v1816_v12, %v1606_v46  ;;  %v586_v19 = vmul.f32 %v1741_v62, %v1618_v52  ;;  %v2291_v58 = vld [vmem:[#allocation11_spill] sm:$0xff] }
  0x41   : > { %v493_v33 = vadd.f32 %v485_v25, %v468_v43  ;;  %v494_v44 = vadd.f32 %v486_v11, %v469_v34  ;;  %v611_v20 = vmul.f32 %v1755_v14, %v1626_v57  ;;  %v612_v2 = vmul.f32 %v1855_v4, %v1626_v57  ;;  %v1886_v25 = vld [vmem:[%s1552_s17 + $0x60] sm:$0xff] }
  0x42   : > { %v743_v37 = vadd.f32 %v1759_v27, %v718_v59  ;;  %v744_v9 = vadd.f32 %v1763_v6, %v719_v60  ;;  %v587_v27 = vmul.f32 %v1842_v22, %v1618_v52  ;;  %v637_v10 = vmul.f32 %v1793_v7, %v2291_v58  ;;  %v2292_v59 = vld [vmem:[#allocation12_spill] sm:$0xff]  ;;  %v1900_v34 = vld [vmem:[%s1552_s17 + $0x62] sm:$0xff] }
  0x43   : > { %v519_v53 = vadd.f32 %v511_v30, %v493_v33  ;;  %v520_v6 = vadd.f32 %v512_v31, %v494_v44  ;;  %v638_v11 = vmul.f32 %v1886_v25, %v2291_v58  ;;  %v662_v60 = vmul.f32 %v1816_v12, %v2292_v59  ;;  %v1905_v33 = vld [vmem:[%s1552_s17 + $0x63] sm:$0xff] }
  0x44   : > { %v769_v48 = vadd.f32 %v761_v23, %v743_v37  ;;  %v770_v24 = vadd.f32 %v762_v32, %v744_v9  ;;  %v1891_v23 = vld [vmem:[%s1552_s17 + $0x61] sm:$0xff] }
  0x45   : > { %v663_v43 = vmul.f32 %v1891_v23, %v2292_v59  ;;  %v544_v30 = vadd.f32 %v536_v16, %v519_v53  ;;  %v545_v31 = vadd.f32 %v537_v1, %v520_v6  ;;  %v2293_v37 = vld [vmem:[#allocation13_spill] sm:$0xff] }
  0x46   : > { %v794_v55 = vadd.f32 %v786_v28, %v769_v48  ;;  %v795_v32 = vadd.f32 %v787_v15, %v770_v24  ;;  %v687_v9 = vmul.f32 %v1829_v50, %v2293_v37  ;;  %v688_v44 = vmul.f32 %v1900_v34, %v2293_v37  ;;  %v2294_v48 = vld [vmem:[#allocation14_spill] sm:$0xff]  ;;  %v2295_v24 = vld [vmem:[#allocation5_spill] sm:$0xff] }
  0x47   : > { %v712_v58 = vmul.f32 %v1842_v22, %v2294_v48  ;;  %v713_v59 = vmul.f32 %v1905_v33, %v2294_v48  ;;  %v569_v16 = vadd.f32 %v561_v56, %v544_v30  ;;  %v570_v1 = vadd.f32 %v562_v17, %v545_v31  ;;  %v2296_v37 = vld [vmem:[#allocation6_spill] sm:$0xff]  ;;  %v2297_v30 = vld [vmem:[#allocation7_spill] sm:$0xff] }
  0x48   : > { %v819_v28 = vadd.f32 %v811_v47, %v794_v55  ;;  %v820_v15 = vadd.f32 %v812_v61, %v795_v32  ;;  %v261_v53 = vmul.f32 %v1703_v38, %v2295_v24  ;;  %v1918_v47 = vld [vmem:[%s2247_s3] ss:$0 sm:$0xff]  ;;  %v262_v55 = vmul.f32 %v1793_v7, %v2295_v24 }
  0x49   : > { %v286_v57 = vmul.f32 %v1716_v49, %v2296_v37  ;;  %v287_v61 = vmul.f32 %v1816_v12, %v2296_v37  ;;  %v594_v17 = vadd.f32 %v586_v19, %v569_v16  ;;  %v595_v32 = vadd.f32 %v587_v27, %v570_v1 }
  0x4a   : > { %v844_v6 = vadd.f32 %v836_v13, %v819_v28  ;;  %v845_v56 = vadd.f32 %v837_v63, %v820_v15  ;;  %v311_v38 = vmul.f32 %v1723_v54, %v2297_v30  ;;  %v312_v48 = vmul.f32 %v1829_v50, %v2297_v30 }
  0x4b   : > { %v294_v31 = vadd.f32 %v286_v57, %v261_v53  ;;  %v295_v28 = vadd.f32 %v287_v61, %v262_v55  ;;  %v619_v24 = vadd.f32 %v611_v20, %v594_v17  ;;  %v620_v51 = vadd.f32 %v612_v2, %v595_v32 }
  0x4c   : > { %v869_v13 = vadd.f32 %v861_v41, %v844_v6  ;;  %v870_v52 = vadd.f32 %v862_v5, %v845_v56  ;;  %v336_v49 = vmul.f32 %v1741_v62, %v1557_v8  ;;  %v337_v54 = vmul.f32 %v1842_v22, %v1557_v8  ;;  %v1956_v6 = vld [vmem:[%s1552_s17 + $0x70] sm:$0xff] }
  0x4d   : > { %v319_v63 = vadd.f32 %v311_v38, %v294_v31  ;;  %v320_v19 = vadd.f32 %v312_v48, %v295_v28  ;;  %v645_v41 = vadd.f32 %v637_v10, %v619_v24  ;;  %v646_v27 = vadd.f32 %v638_v11, %v620_v51  ;;  %v1945_v10 = vld [vmem:[%s1552_s17 + $0x64] sm:$0xff]  ;;  %v1967_v38 = vld [vmem:[%s1552_s17 + $0x71] sm:$0xff] }
  0x4e   : > { %v881_v37 = vadd.f32 %v1918_v47, %v869_v13  ;;  %v882_v57 = vadd.f32 %v1918_v47, %v870_v52  ;;  %v361_v5 = vmul.f32 %v1755_v14, %v1568_v18  ;;  %v362_v62 = vmul.f32 %v1855_v4, %v1568_v18 }
  0x4f   : > { %v344_v20 = vadd.f32 %v336_v49, %v319_v63  ;;  %v345_v2 = vadd.f32 %v337_v54, %v320_v19  ;;  %v387_v15 = vmul.f32 %v1793_v7, %v1581_v29  ;;  %v670_v16 = vadd.f32 %v662_v60, %v645_v41  ;;  %v1978_v19 = vld [vmem:[%s1552_s17 + $0x72] sm:$0xff] }
  0x50   : > { %v889_v48 = vpack.c.bf16 %v882_v57, %v881_v37  ;;  %v671_v1 = vadd.f32 %v663_v43, %v646_v27  ;;  %v388_v52 = vmul.f32 %v1886_v25, %v1581_v29  ;;  %v412_v14 = vmul.f32 %v1816_v12, %v1588_v35  ;;  %v2298_v37 = vld [vmem:[#allocation15_spill] sm:$0xff] }
  0x51   : > { %v369_v51 = vadd.f32 %v361_v5, %v344_v20  ;;  %v370_v11 = vadd.f32 %v362_v62, %v345_v2  ;;  %v413_v24 = vmul.f32 %v1891_v23, %v1588_v35  ;;  %v695_v53 = vadd.f32 %v687_v9, %v670_v16  ;;  %v1989_v62 = vld [vmem:[%s1552_s17 + $0x73] sm:$0xff] }
  0x52   : > { %965 = vmatmul.bf16.vlgmr.msra.gmra.mxu0 %v889_v48  ;;  %v696_v7 = vadd.f32 %v688_v44, %v671_v1  ;;  %v737_v60 = vmul.f32 %v1855_v4, %v2298_v37  ;;  %v738_v43 = vmul.f32 %v1945_v10, %v2298_v37  ;;  %v437_v12 = vmul.f32 %v1829_v50, %v1590_v36 }
  0x53   : > { %v395_v55 = vadd.f32 %v387_v15, %v369_v51  ;;  %v396_v61 = vadd.f32 %v388_v52, %v370_v11  ;;  %v438_v56 = vmul.f32 %v1900_v34, %v1590_v36  ;;  %v720_v17 = vadd.f32 %v712_v58, %v695_v53 }
  0x54   : > { %v721_v9 = vadd.f32 %v713_v59, %v696_v7  ;;  %v763_v44 = vmul.f32 %v1886_v25, %v1765_v42  ;;  %v764_v32 = vmul.f32 %v1956_v6, %v1765_v42  ;;  %v462_v28 = vmul.f32 %v1842_v22, %v1593_v39 }
  0x55   : > { %v420_v13 = vadd.f32 %v412_v14, %v395_v55  ;;  %v421_v31 = vadd.f32 %v413_v24, %v396_v61  ;;  %v463_v50 = vmul.f32 %v1905_v33, %v1593_v39  ;;  %v745_v49 = vadd.f32 %v737_v60, %v720_v17  ;;  %v2000_v14 = vld [vmem:[%s1552_s17 + $0x74] sm:$0xff] }
  0x56   : > { %v746_v58 = vadd.f32 %v738_v43, %v721_v9  ;;  %v788_v59 = vmul.f32 %v1891_v23, %v1777_v0  ;;  %v789_v63 = vmul.f32 %v1967_v38, %v1777_v0  ;;  %v487_v41 = vmul.f32 %v1855_v4, %v1595_v40  ;;  %v2299_v9 = vld [vmem:[#allocation8_spill] sm:$0xff] }
  0x57   : > { %v445_v54 = vadd.f32 %v437_v12, %v420_v13  ;;  %v446_v57 = vadd.f32 %v438_v56, %v421_v31  ;;  %v488_v22 = vmul.f32 %v1945_v10, %v1595_v40  ;;  %v771_v27 = vadd.f32 %v763_v44, %v745_v49  ;;  %v2300_v49 = vld [vmem:[#allocation9_spill] sm:$0xff] }
  0x58   : > { %v772_v5 = vadd.f32 %v764_v32, %v746_v58  ;;  %v813_v20 = vmul.f32 %v1900_v34, %v1783_v21  ;;  %v814_v2 = vmul.f32 %v1978_v19, %v1783_v21  ;;  %v513_v16 = vmul.f32 %v1886_v25, %v1604_v45 }
  0x59   : > { %v470_v15 = vadd.f32 %v462_v28, %v445_v54  ;;  %v471_v48 = vadd.f32 %v463_v50, %v446_v57  ;;  %v514_v4 = vmul.f32 %v1956_v6, %v1604_v45  ;;  %v796_v1 = vadd.f32 %v788_v59, %v771_v27  ;;  %v2301_v57 = vld [vmem:[#allocation10_spill] sm:$0xff] }
  0x5a   : > { %v797_v52 = vadd.f32 %v789_v63, %v772_v5  ;;  %v838_v51 = vmul.f32 %v1905_v33, %v1785_v3  ;;  %v839_v11 = vmul.f32 %v1989_v62, %v1785_v3  ;;  %v538_v7 = vmul.f32 %v1891_v23, %v1606_v46 }
  0x5b   : > { %v495_v24 = vadd.f32 %v487_v41, %v470_v15  ;;  %v496_v53 = vadd.f32 %v488_v22, %v471_v48  ;;  %v539_v60 = vmul.f32 %v1967_v38, %v1606_v46  ;;  %v821_v43 = vadd.f32 %v813_v20, %v796_v1  ;;  %v2023_v20 = vld [vmem:[%s1552_s17 + $0x80] sm:$0xff] }
  0x5c   : > { %v822_v55 = vadd.f32 %v814_v2, %v797_v52  ;;  %v863_v61 = vmul.f32 %v1945_v10, %v1810_v26  ;;  %v864_v12 = vmul.f32 %v2000_v14, %v1810_v26  ;;  %v563_v44 = vmul.f32 %v1900_v34, %v2299_v9  ;;  %v2302_v2 = vld [vmem:[#allocation11_spill] sm:$0xff]  ;;  %v2032_v1 = vld [vmem:[%s1552_s17 + $0x81] sm:$0xff]  ;;  %v2303_v52 = vld [vmem:[#allocation12_spill] sm:$0xff] }
  0x5d   : > { %v521_v56 = vadd.f32 %v513_v16, %v495_v24  ;;  %v522_v17 = vadd.f32 %v514_v4, %v496_v53  ;;  %v564_v32 = vmul.f32 %v1978_v19, %v2299_v9  ;;  %v846_v13 = vadd.f32 %v838_v51, %v821_v43 }
  0x5e   : > { %v847_v31 = vadd.f32 %v839_v11, %v822_v55  ;;  %v588_v58 = vmul.f32 %v1905_v33, %v2300_v49  ;;  %v589_v59 = vmul.f32 %v1989_v62, %v2300_v49  ;;  %v613_v41 = vmul.f32 %v1945_v10, %v2301_v57  ;;  %v2305_v55 = vld [vmem:[#allocation5_spill] sm:$0xff] }
  0x5f   : > { %v546_v28 = vadd.f32 %v538_v7, %v521_v56  ;;  %v547_v50 = vadd.f32 %v539_v60, %v522_v17  ;;  %v871_v63 = vadd.f32 %v863_v61, %v846_v13  ;;  %v614_v5 = vmul.f32 %v2000_v14, %v2301_v57  ;;  %v2304_v7 = vld [vmem:[#allocation13_spill] sm:$0xff]  ;;  %v2306_v56 = vld [vmem:[#allocation6_spill] sm:$0xff] }
  0x60   : > { %v872_v54 = vadd.f32 %v864_v12, %v847_v31  ;;  %v639_v15 = vmul.f32 %v1956_v6, %v2302_v2  ;;  %v640_v4 = vmul.f32 %v2023_v20, %v2302_v2  ;;  %v664_v51 = vmul.f32 %v1967_v38, %v2303_v52  ;;  %v2047_v13 = vld [vmem:[%s1552_s17 + $0x82] sm:$0xff] }
  0x61   : > { %v571_v22 = vadd.f32 %v563_v44, %v546_v28  ;;  %v572_v27 = vadd.f32 %v564_v32, %v547_v50  ;;  %v883_v48 = vadd.f32 %v1918_v47, %v871_v63  ;;  %v665_v53 = vmul.f32 %v2032_v1, %v2303_v52 }
  0x62   : > { %v884_v16 = vadd.f32 %v1918_v47, %v872_v54  ;;  %v689_v60 = vmul.f32 %v1978_v19, %v2304_v7  ;;  %v263_v61 = vmul.f32 %v1886_v25, %v2305_v55  ;;  %v264_v12 = vmul.f32 %v1956_v6, %v2305_v55  ;;  %v2060_v54 = vld [vmem:[%s1552_s17 + $0x83] sm:$0xff] }
  0x63   : > { %v596_v11 = vadd.f32 %v588_v58, %v571_v22  ;;  %v597_v24 = vadd.f32 %v589_v59, %v572_v27  ;;  %v288_v17 = vmul.f32 %v1891_v23, %v2306_v56  ;;  %v289_v31 = vmul.f32 %v1967_v38, %v2306_v56  ;;  %v2307_v22 = vld [vmem:[#allocation14_spill] sm:$0xff] }
  0x64   : > { %v890_v43 = vpack.c.bf16 %v884_v16, %v883_v48  ;;  %v313_v28 = vmul.f32 %v1900_v34, %v2297_v30  ;;  %v690_v25 = vmul.f32 %v2047_v13, %v2304_v7  ;;  %v314_v58 = vmul.f32 %v1978_v19, %v2297_v30  ;;  %v2071_v16 = vld [vmem:[%s1552_s17 + $0x84] sm:$0xff] }
  0x65   : > { %v621_v44 = vadd.f32 %v613_v41, %v596_v11  ;;  %v622_v32 = vadd.f32 %v614_v5, %v597_v24  ;;  %v296_v50 = vadd.f32 %v288_v17, %v263_v61  ;;  %v338_v23 = vmul.f32 %v1905_v33, %v1557_v8 }
  0x66   : > { %970 = vmatmul.bf16.vlgmr.msra.gmra.mxu1 %v890_v43  ;;  %v297_v41 = vadd.f32 %v289_v31, %v264_v12  ;;  %v339_v34 = vmul.f32 %v1989_v62, %v1557_v8  ;;  %v714_v27 = vmul.f32 %v1989_v62, %v2307_v22  ;;  %v715_v5 = vmul.f32 %v2060_v54, %v2307_v22 }
  0x67   : > { %v647_v59 = vadd.f32 %v639_v15, %v621_v44  ;;  %v648_v63 = vadd.f32 %v640_v4, %v622_v32  ;;  %v321_v48 = vadd.f32 %v313_v28, %v296_v50  ;;  %v363_v30 = vmul.f32 %v1945_v10, %v1568_v18  ;;  %v2093_v32 = vld [vmem:[%s1552_s17 + $0x91] sm:$0xff] }
  0x68   : > { %v322_v4 = vadd.f32 %v314_v58, %v297_v41  ;;  %v364_v11 = vmul.f32 %v2000_v14, %v1568_v18  ;;  %v739_v8 = vmul.f32 %v2000_v14, %v2298_v37  ;;  %v740_v24 = vmul.f32 %v2071_v16, %v2298_v37 }
  0x69   : > { %v672_v33 = vadd.f32 %v664_v51, %v647_v59  ;;  %v673_v15 = vadd.f32 %v665_v53, %v648_v63  ;;  %v346_v43 = vadd.f32 %v338_v23, %v321_v48  ;;  %v389_v55 = vmul.f32 %v1956_v6, %v1581_v29  ;;  %v2082_v53 = vld [vmem:[%s1552_s17 + $0x90] sm:$0xff] }
  0x6a   : > { %v347_v61 = vadd.f32 %v339_v34, %v322_v4  ;;  %v390_v12 = vmul.f32 %v2023_v20, %v1581_v29  ;;  %v765_v18 = vmul.f32 %v2023_v20, %v1765_v42  ;;  %v766_v56 = vmul.f32 %v2082_v53, %v1765_v42  ;;  %v2104_v59 = vld [vmem:[%s1552_s17 + $0x92] sm:$0xff] }
  0x6b   : > { %v697_v10 = vadd.f32 %v689_v60, %v672_v33  ;;  %v698_v51 = vadd.f32 %v690_v25, %v673_v15  ;;  %v371_v17 = vadd.f32 %v363_v30, %v346_v43  ;;  %v414_v44 = vmul.f32 %v1967_v38, %v1588_v35  ;;  %v1257_v30 = vld [vmem:[%s1552_s17 + $0x93] sm:$0xff] }
  0x6c   : > { %v372_v31 = vadd.f32 %v364_v11, %v347_v61  ;;  %v415_v28 = vmul.f32 %v2032_v1, %v1588_v35  ;;  %v790_v29 = vmul.f32 %v2032_v1, %v1777_v0  ;;  %v791_v25 = vmul.f32 %v2093_v32, %v1777_v0 }
  0x6d   : > { %v722_v6 = vadd.f32 %v714_v27, %v697_v10  ;;  %v723_v60 = vadd.f32 %v715_v5, %v698_v51  ;;  %v397_v50 = vadd.f32 %v389_v55, %v371_v17  ;;  %v439_v58 = vmul.f32 %v1978_v19, %v1590_v36  ;;  %v1265_v55 = vld [vmem:[%s1552_s17 + $0x94] sm:$0xff] }
  0x6e   : > { %v398_v63 = vadd.f32 %v390_v12, %v372_v31  ;;  %v440_v41 = vmul.f32 %v2047_v13, %v1590_v36  ;;  %v815_v35 = vmul.f32 %v2047_v13, %v1783_v21  ;;  %v816_v34 = vmul.f32 %v2104_v59, %v1783_v21 }
  0x6f   : > { %v747_v38 = vadd.f32 %v739_v8, %v722_v6  ;;  %v748_v23 = vadd.f32 %v740_v24, %v723_v60  ;;  %v422_v27 = vadd.f32 %v414_v44, %v397_v50  ;;  %v464_v5 = vmul.f32 %v1989_v62, %v1593_v39 }
  0x70   : > { %v423_v33 = vadd.f32 %v415_v28, %v398_v63  ;;  %v465_v15 = vmul.f32 %v2060_v54, %v1593_v39  ;;  %v840_v36 = vmul.f32 %v2060_v54, %v1785_v3  ;;  %v841_v4 = vmul.f32 %v1257_v30, %v1785_v3 }
  0x71   : > { %v773_v19 = vadd.f32 %v765_v18, %v747_v38  ;;  %v774_v48 = vadd.f32 %v766_v56, %v748_v23  ;;  %v447_v11 = vadd.f32 %v439_v58, %v422_v27  ;;  %v489_v8 = vmul.f32 %v2000_v14, %v1595_v40 }
  0x72   : > { %v448_v62 = vadd.f32 %v440_v41, %v423_v33  ;;  %v490_v10 = vmul.f32 %v2071_v16, %v1595_v40  ;;  %v865_v51 = vmul.f32 %v2071_v16, %v1810_v26  ;;  %v866_v39 = vmul.f32 %v1265_v55, %v1810_v26 }
  0x73   : > { %v798_v24 = vadd.f32 %v790_v29, %v773_v19  ;;  %v799_v43 = vadd.f32 %v791_v25, %v774_v48  ;;  %v472_v61 = vadd.f32 %v464_v5, %v447_v11  ;;  %v515_v12 = vmul.f32 %v2023_v20, %v1604_v45  ;;  %v1203_v48 = vld [vmem:[%s1552_s17 + $0xa1] sm:$0xff] }
  0x74   : > { %v473_v17 = vadd.f32 %v465_v15, %v448_v62  ;;  %v516_v14 = vmul.f32 %v2082_v53, %v1604_v45  ;;  %v540_v6 = vmul.f32 %v2032_v1, %v1606_v46  ;;  %v541_v28 = vmul.f32 %v2093_v32, %v1606_v46 }
  0x75   : > { %v823_v18 = vadd.f32 %v815_v35, %v798_v24  ;;  %v824_v56 = vadd.f32 %v816_v34, %v799_v43  ;;  %v497_v44 = vadd.f32 %v489_v8, %v472_v61  ;;  %v565_v20 = vmul.f32 %v2047_v13, %v2299_v9  ;;  %v1195_v34 = vld [vmem:[%s1552_s17 + $0xa0] sm:$0xff]  ;;  %v1235_v61 = vld [vmem:[%s1552_s17 + $0xb0] sm:$0xff] }
  0x76   : > { %v498_v31 = vadd.f32 %v490_v10, %v473_v17  ;;  %v566_v45 = vmul.f32 %v2104_v59, %v2299_v9  ;;  %v590_v1 = vmul.f32 %v2060_v54, %v2300_v49  ;;  %v591_v41 = vmul.f32 %v1257_v30, %v2300_v49  ;;  %v1227_v10 = vld [vmem:[%s1552_s17 + $0xa4] sm:$0xff] }
  0x77   : > { %v848_v40 = vadd.f32 %v840_v36, %v823_v18  ;;  %v849_v60 = vadd.f32 %v841_v4, %v824_v56  ;;  %v523_v29 = vadd.f32 %v515_v12, %v497_v44  ;;  %v615_v35 = vmul.f32 %v2071_v16, %v2301_v57  ;;  %v1211_v36 = vld [vmem:[%s1552_s17 + $0xa2] sm:$0xff] }
  0x78   : > { %v524_v58 = vadd.f32 %v516_v14, %v498_v31  ;;  %v616_v5 = vmul.f32 %v1265_v55, %v2301_v57  ;;  %v641_v54 = vmul.f32 %v2082_v53, %v2302_v2  ;;  %v642_v49 = vmul.f32 %v1195_v34, %v2302_v2  ;;  %v1219_v53 = vld [vmem:[%s1552_s17 + $0xa3] sm:$0xff]  ;;  %v1259_v31 = vld [vmem:[%s1552_s17 + $0xb3] sm:$0xff] }
  0x79   : > { %v873_v25 = vadd.f32 %v865_v51, %v848_v40  ;;  %v874_v50 = vadd.f32 %v866_v39, %v849_v60  ;;  %v548_v38 = vadd.f32 %v540_v6, %v523_v29  ;;  %v666_v16 = vmul.f32 %v2093_v32, %v2303_v52 }
  0x7a   : > { %v549_v46 = vadd.f32 %v541_v28, %v524_v58  ;;  %v667_v11 = vmul.f32 %v1203_v48, %v2303_v52  ;;  %v691_v8 = vmul.f32 %v2104_v59, %v2304_v7  ;;  %v692_v43 = vmul.f32 %v1211_v36, %v2304_v7  ;;  %v1243_v7 = vld [vmem:[%s1552_s17 + $0xb1] sm:$0xff] }
  0x7b   : > { %v885_v23 = vadd.f32 %v1918_v47, %v873_v25  ;;  %v886_v63 = vadd.f32 %v1918_v47, %v874_v50  ;;  %v573_v13 = vadd.f32 %v565_v20, %v548_v38  ;;  %v716_v2 = vmul.f32 %v1257_v30, %v2307_v22  ;;  %v1267_v25 = vld [vmem:[%s1552_s17 + $0xb4] sm:$0xff] }
  0x7c   : > { %v574_v9 = vadd.f32 %v566_v45, %v549_v46  ;;  %v717_v51 = vmul.f32 %v1219_v53, %v2307_v22  ;;  %v741_v52 = vmul.f32 %v1265_v55, %v2298_v37  ;;  %v742_v59 = vmul.f32 %v1227_v10, %v2298_v37  ;;  %v1251_v22 = vld [vmem:[%s1552_s17 + $0xb2] sm:$0xff]  ;;  %s1305_s17 = sshll.u32 %s1534_s9, 6  ;;  %s1314_s9 = sshll.u32 %s1499_s22, 6 }
  0x7d   : > { %v891_v27 = vpack.c.bf16 %v886_v63, %v885_v23  ;;  %v598_v19 = vadd.f32 %v590_v1, %v573_v13  ;;  %v767_v56 = vmul.f32 %v1195_v34, %v1765_v42  ;;  %v768_v30 = vmul.f32 %v1235_v61, %v1765_v42  ;;  %s2188_s12 = scalar_lea.vmem %s2244_s0, %s1305_s17  ;;  %s1022_s23 = scalar_lea.hbm %s2249_s5, %s1314_s9 }
  0x7e   : > { %v599_v33 = vadd.f32 %v591_v41, %v574_v9  ;;  %v792_v44 = vmul.f32 %v1203_v48, %v1777_v0  ;;  %v793_v55 = vmul.f32 %v1243_v7, %v1777_v0  ;;  %v817_v60 = vmul.f32 %v1211_v36, %v1783_v21  ;;  %v990_v9 = vld [vmem:[%s2188_s12 + $0x20] sm:$0xff]  ;;  %v989_v48 = vld [vmem:[%s2188_s12 + $0x18] sm:$0xff]  ;;  %v991_v36 = vld [vmem:[%s2188_s12 + $0x28] sm:$0xff]  ;;  %s1025_s26 = sshll.u32 %s1022_s23, 4  ;;  %s1026_s26 = int_to_ptr.hbm [resolvable:$true] %s1025_s26 }
  0x7f   : > { %975 = vmatmul.bf16.vlgmr.msra.gmra.mxu2 %v891_v27  ;;  %v623_v15 = vadd.f32 %v615_v35, %v598_v19  ;;  %v818_v28 = vmul.f32 %v1251_v22, %v1783_v21  ;;  %v842_v20 = vmul.f32 %v1219_v53, %v1785_v3  ;;  %v843_v50 = vmul.f32 %v1259_v31, %v1785_v3  ;;  %v986_v3 = vld [vmem:[%s2188_s12] sm:$0xff]  ;;  %v987_v19 = vld [vmem:[%s2188_s12 + $0x8] sm:$0xff]  ;;  %s1396_s6 = sshra.s32 %s1026_s26, 4  ;;  %s1397_s6 = int_to_ptr.hbm [resolvable:$true] %s1396_s6 }
  0x80   : > { %v624_v4 = vadd.f32 %v616_v5, %v599_v33  ;;  %v867_v0 = vmul.f32 %v1227_v10, %v1810_v26  ;;  %v868_v38 = vmul.f32 %v1267_v25, %v1810_v26  ;;  %s1398_s22 = scalar_lea.hbm %s1397_s6, 64  ;;  %p1403_p0 = scmp.lt.s32.totalorder %s1397_s6, %s2249_s5 }
  0x81   : > { %v649_v57 = vadd.f32 %v641_v54, %v623_v15  ;;  %p1399_p11 = scmp.ne.s32.totalorder %s1397_s6, %s1398_s22  ;;  %p1404_p1 = scmp.lt.s32.totalorder %s1402_s10, %s1398_s22 }
  0x82   : > { %v650_v24 = vadd.f32 %v642_v49, %v624_v4 }
  0x83   : > { %v674_v62 = vadd.f32 %v666_v16, %v649_v57  ;;  %v992_v57 = vld [vmem:[%s2188_s12 + $0x30] sm:$0xff]  ;;  %p1400_p12 = pnand %p1399_p11, %p1516_p5  ;;  %p1405_p2 = por %p1404_p1, %p1403_p0 }
  0x84   : > { %v675_v32 = vadd.f32 %v667_v11, %v650_v24  ;;  %v993_v24 = vld [vmem:[%s2188_s12 + $0x38] sm:$0xff] }
  0x85   : > { %v699_v39 = vadd.f32 %v691_v8, %v674_v62  ;;  %p1401_p13 = pneg %p1400_p12 }
  0x86   : > { %v700_v12 = vadd.f32 %v692_v43, %v675_v32 }
  0x87   : > { %v724_v18 = vadd.f32 %v716_v2, %v699_v39  ;;  %p1406_p3 = pnand %p1405_p2, %p1401_p13 }
  0x88   : > { %v725_v17 = vadd.f32 %v717_v51, %v700_v12 }
  0x89   : > { %v749_v14 = vadd.f32 %v741_v52, %v724_v18 }
  0x8a   : > { %v750_v6 = vadd.f32 %v742_v59, %v725_v17 }
  0x8b   : > { %v775_v40 = vadd.f32 %v767_v56, %v749_v14 }
  0x8c   : > { %v776_v37 = vadd.f32 %v768_v30, %v750_v6 }
  0x8d   : > { %v800_v29 = vadd.f32 %v792_v44, %v775_v40 }
  0x8e   : > { %v801_v42 = vadd.f32 %v793_v55, %v776_v37 }
  0x8f   : > { %v825_v58 = vadd.f32 %v817_v60, %v800_v29 }
  0x90   : > { %v826_v45 = vadd.f32 %v818_v28, %v801_v42 }
  0x91   : > { %v850_v1 = vadd.f32 %v842_v20, %v825_v58 }
  0x92   : > { %v851_v23 = vadd.f32 %v843_v50, %v826_v45 }
  0x93   : > { %v875_v63 = vadd.f32 %v867_v0, %v850_v1 }
  0x94   : > { %v876_v21 = vadd.f32 %v868_v38, %v851_v23 }
  0x95   : > { %v887_v46 = vadd.f32 %v1918_v47, %v875_v63 }
  0x96   : > { %v888_v41 = vadd.f32 %v1918_v47, %v876_v21  ;;  %v988_v47 = vld [vmem:[%s2188_s12 + $0x10] sm:$0xff] }
  0x98   : > { %v892_v13 = vpack.c.bf16 %v888_v41, %v887_v46 }
  0x9a   : > { %980 = vmatmul.bf16.vlgmr.msra.gmra.mxu3 %v892_v13 }
  0xcf   : > { %v966_v26 = vpop.f32.mrf.mxu0 }
  0xd0   : > { %v994_v35 = vadd.f32 %v986_v3, %v966_v26 }
  0xd2   : > { %1002 = vst [vmem:[%s2193_s14] sm:$0xff] %v994_v35 }
  0xd7   : > { %v968_v5 = vpop.f32.mrf.mxu0 }
  0xd8   : > { %v995_v33 = vadd.f32 %v987_v19, %v968_v5 }
  0xda   : > { %1003 = vst [vmem:[%s2193_s14 + $0x8] sm:$0xff] %v995_v33 }
  0xe3   : > { %v971_v34 = vpop.f32.mrf.mxu1 }
  0xe4   : > { %v996_v27 = vadd.f32 %v988_v47, %v971_v34 }
  0xe6   : > { %1004 = vst [vmem:[%s2193_s14 + $0x10] sm:$0xff] %v996_v27 }
  0xeb   : > { %v973_v54 = vpop.f32.mrf.mxu1 }
  0xec   : > { %v997_v49 = vadd.f32 %v989_v48, %v973_v54 }
  0xee   : > { %1005 = vst [vmem:[%s2193_s14 + $0x18] sm:$0xff] %v997_v49 }
 0x102   : > { %v976_v15 = vpop.f32.mrf.mxu2 }
 0x103   : > { %v998_v16 = vadd.f32 %v990_v9, %v976_v15 }
 0x105   : > { %1006 = vst [vmem:[%s2193_s14 + $0x20] sm:$0xff] %v998_v16 }
 0x10a   : > { %v978_v4 = vpop.f32.mrf.mxu2 }
 0x10b   : > { %v999_v11 = vadd.f32 %v991_v36, %v978_v4 }
 0x10d   : > { %1007 = vst [vmem:[%s2193_s14 + $0x28] sm:$0xff] %v999_v11 }
 0x11d   : > { %v981_v8 = vpop.f32.mrf.mxu3 }
 0x11e   : > { %v1000_v53 = vadd.f32 %v992_v57, %v981_v8 }
 0x120   : > { %1008 = vst [vmem:[%s2193_s14 + $0x30] sm:$0xff] %v1000_v53 }
 0x125   : > { %v983_v43 = vpop.f32.mrf.mxu3 }
 0x126   : > { %v1001_v62 = vadd.f32 %v993_v24, %v983_v43 }
 0x128   : > { %1009 = vst [vmem:[%s2193_s14 + $0x38] sm:$0xff] %v1001_v62 }
 0x129   : > { %1409 = shalt.err (!%p1406_p3)
}
 0x12a   : > { %s1446_s8 = smov 128   ;;  %s1447_s13 = smov 8  }
 0x12b   : > { %1340 = dma.vmem_to_hbm [thread:$0]  (%p1516_p5), %s1024_s25, 1024, %s1026_s26, %s1011_s30, %s1446_s8, %s1446_s8, %s1447_s13  }
 0x12c PF: > { %p1346_p4 = scmp.ge.s32.totalorder %s1444_s21, 2  ;;  %s1040_s14 = sand.u32 1, %s1432_s18  }
 0x12d   : > { %s1041_s9 = scalar_lea.sflag [#allocation3], %s1040_s14 }
 0x12e   : > { %p1343_p7 = pnand %p1346_p4, %p1520_p6 }
 0x130   : > { %p1344_p8 = pneg %p1343_p7 }
 0x132   : > { %1427 = dma.done.wait (%p1344_p8), %s1041_s9, 1024  }
 0x133   : > { %1429 = vsyncadd (%p1344_p8), %s1041_s9, 4294966272  ;;  %p15_p9 = scmp.ge.s32.totalorder %s1503_s24, 4   ;;  %s2308_s18 = smov %s1436_s19 }
 0x134   : > { %s2309_s19 = smov %s1440_s20  ;;  %s2310_s20 = smov %s1514_s27 }
 0x135   : > { %s2311_s21 = smov %s1503_s24  ;;  %17 = sbr.rel (!%p15_p9) target bundleno = 3 (0x3), region = 82 }
 0x13a   :  { %1047 = vsyncpa [#allocation3], 1 }
 0x13b   :  { %1049 = vsyncpa [#allocation3 + $0x1], 1 }

// kernel: nchw_attention_lepe.2
= control target key start
LH: loop header
LB: loop body
LE: loop exit
PB: predicated region body
PF: predicated region fallthrough
CT: control target
= control target key end

     0   :  { %s3566_s24 = smov 0   ;;  %s4819_s0 = inlined_call_operand.vmem [shape: f32[2,64,128], index: 0, kind: input, shape index: {}]   ;;  %s4820_s1 = inlined_call_operand.vmem [shape: bf16[128,128], index: 1, kind: input, shape index: {}]   ;;  %s4821_s2 = inlined_call_operand.vmem [shape: bf16[128,128], index: 2, kind: input, shape index: {}]   ;;  %s4822_s3 = inlined_call_operand.vmem [shape: bf16[128,128], index: 3, kind: input, shape index: {}]   ;;  %s4823_s4 = inlined_call_operand.vmem [shape: bf16[128,128], index: 4, kind: input, shape index: {}]   ;;  %s4824_s5 = inlined_call_operand.vmem [shape: f32[1,128], index: 5, kind: input, shape index: {}]   ;;  %s4825_s6 = inlined_call_operand.vmem [shape: f32[2,64,128], index: 6, kind: output, shape index: {0}]   ;;  %s4826_s7 = inlined_call_operand.vmem [shape: f32[2,64,128], index: 7, kind: output, shape index: {1}]  }
   0x1 LB: > { %s2954_s25 = sadd.s32 4294967295, %s3517_s24   ;;  %p2958_p0 = scmp.ge.s32.totalorder %s3517_s24, 1  ;;  %s3517_s24 = sphi %s3566_s24, %s18_s24  }
   0x2   : > { %p240_p1 = scmp.lt.s32.totalorder %s3517_s24, 3 }
   0x4   : > { %p241_p2 = pnand %p2958_p0, %p240_p1 }
   0x6   : > { %244 = sbr.rel (%p241_p2) target bundleno = 3072 (0xc00), region = 44 }
   0xb   : > { %v3201_v0 = vld [vmem:[%s4820_s1 + $0x38] sm:$0xff]  ;;  %v3200_v2 = vld [vmem:[%s4820_s1 + $0x30] sm:$0xff]  ;;  %v3199_v4 = vld [vmem:[%s4820_s1 + $0x28] sm:$0xff]  ;;  %p277_p3 = scmp.lt.s32.totalorder %s2954_s25, 1  ;;  %s3519_s17 = smov 112   ;;  %vm664_vm0 = vcmask 130048  }
   0xc   : > { %v3209_v1 = vld [vmem:[%s4821_s2 + $0x38] sm:$0xff]  ;;  %369 = vmatpush.bf16.msra.mxu0 %v3201_v0  ;;  %v3208_v3 = vld [vmem:[%s4821_s2 + $0x30] sm:$0xff]  ;;  %v3207_v5 = vld [vmem:[%s4821_s2 + $0x28] sm:$0xff]  ;;  %s3520_s18 = smov 96   ;;  %vm718_vm1 = vcmask 523264   ;;  %s3521_s19 = smov 80  }
   0xd   : > { %3226 = vmatpush.bf16.msra.mxu1 %v3209_v1  ;;  %v3198_v6 = vld [vmem:[%s4820_s1 + $0x20] sm:$0xff]  ;;  %v3197_v8 = vld [vmem:[%s4820_s1 + $0x18] sm:$0xff]  ;;  %s4830_s25 = smov (!%p277_p3, %s2954_s25), 1  ;;  %v3196_v10 = vld [vmem:[%s4820_s1 + $0x10] sm:$0xff]  ;;  %s3522_s22 = smov 64  }
   0xe   : > { %v3206_v7 = vld [vmem:[%s4821_s2 + $0x20] sm:$0xff]  ;;  %v3205_v9 = vld [vmem:[%s4821_s2 + $0x18] sm:$0xff]  ;;  %v3204_v11 = vld [vmem:[%s4821_s2 + $0x10] sm:$0xff]  ;;  %s3610_s29 = sshll.u32 %s4830_s25, 6  ;;  %s3523_s23 = smov 48  }
   0xf   : > { %v3195_v12 = vld [vmem:[%s4820_s1 + $0x8] sm:$0xff]  ;;  %s281_s13 = scalar_lea.vmem %s4819_s0, %s3610_s29  ;;  %v3194_v14 = vld [vmem:[%s4820_s1] sm:$0xff]  ;;  %s3755_s16 = scalar_lea.vmem %s4826_s7, %s3610_s29 }
  0x10   : > { %370 = vmatpush.bf16.msra.mxu0 %v3200_v2  ;;  %v3203_v13 = vld [vmem:[%s4821_s2 + $0x8] sm:$0xff]  ;;  %v3202_v15 = vld [vmem:[%s4821_s2] sm:$0xff]  ;;  %v295_v18 = vld [vmem:[%s281_s13 + $0x10] sm:$0xff]  ;;  %s3524_s8 = smov 32   ;;  %s3525_s9 = smov 16  }
  0x11   : > { %3227 = vmatpush.bf16.msra.mxu1 %v3208_v3  ;;  %v293_v16 = vld [vmem:[%s281_s13] sm:$0xff]  ;;  %v294_v17 = vld [vmem:[%s281_s13 + $0x8] sm:$0xff]  ;;  %v296_v19 = vld [vmem:[%s281_s13 + $0x18] sm:$0xff] }
  0x12   : > { %v3628_v20 = vpack.c.bf16 %v294_v17, %v293_v16  ;;  %v3630_v21 = vpack.c.bf16 %v296_v19, %v295_v18  ;;  %v297_v22 = vld [vmem:[%s281_s13 + $0x20] sm:$0xff]  ;;  %v298_v23 = vld [vmem:[%s281_s13 + $0x28] sm:$0xff]  ;;  %v299_v25 = vld [vmem:[%s281_s13 + $0x30] sm:$0xff] }
  0x13   : > { %v3634_v24 = vpack.c.bf16 %v298_v23, %v297_v22  ;;  %v300_v26 = vld [vmem:[%s281_s13 + $0x38] sm:$0xff] }
  0x14   : > { %371 = vmatpush.bf16.msra.mxu0 %v3199_v4  ;;  %v3638_v27 = vpack.c.bf16 %v300_v26, %v299_v25 }
  0x15   : > { %3228 = vmatpush.bf16.msra.mxu1 %v3207_v5 }
  0x18   : > { %372 = vmatpush.bf16.msra.mxu0 %v3198_v6 }
  0x19   : > { %3229 = vmatpush.bf16.msra.mxu1 %v3206_v7 }
  0x1c   : > { %373 = vmatpush.bf16.msra.mxu0 %v3197_v8 }
  0x1d   : > { %3230 = vmatpush.bf16.msra.mxu1 %v3205_v9 }
  0x20   : > { %374 = vmatpush.bf16.msra.mxu0 %v3196_v10 }
  0x21   : > { %3231 = vmatpush.bf16.msra.mxu1 %v3204_v11 }
  0x24   : > { %375 = vmatpush.bf16.msra.mxu0 %v3195_v12 }
  0x25   : > { %3232 = vmatpush.bf16.msra.mxu1 %v3203_v13 }
  0x28   : > { %376 = vmatpush.bf16.msra.mxu0 %v3194_v14 }
  0x29   : > { %3233 = vmatpush.bf16.msra.mxu1 %v3202_v15 }
  0x2b   : > { %377 = vmatmul.bf16.vlgmr.msra.gmra.mxu0 %v3628_v20 }
  0x2c   : > { %462 = vmatpush.bf16.msrb.mxu0 %v3209_v1  ;;  %475 = vmatmul.bf16.vlgmr.msra.gmra.mxu1 %v3630_v21 }
  0x30   : > { %463 = vmatpush.bf16.msrb.mxu0 %v3208_v3 }
  0x34   : > { %464 = vmatpush.bf16.msrb.mxu0 %v3207_v5 }
  0x38   : > { %465 = vmatpush.bf16.msrb.mxu0 %v3206_v7 }
  0x3b   : > { %382 = vmatmul.bf16.gmra.mxu0 %v3630_v21 }
  0x3c   : > { %466 = vmatpush.bf16.msrb.mxu0 %v3205_v9  ;;  %480 = vmatmul.bf16.gmra.mxu1 %v3634_v24 }
  0x40   : > { %467 = vmatpush.bf16.msrb.mxu0 %v3204_v11 }
  0x44   : > { %468 = vmatpush.bf16.msrb.mxu0 %v3203_v13 }
  0x48   : > { %469 = vmatpush.bf16.msrb.mxu0 %v3202_v15 }
  0x4b   : > { %387 = vmatmul.bf16.gmra.mxu0 %v3634_v24 }
  0x4c   : > { %485 = vmatmul.bf16.gmra.mxu1 %v3638_v27 }
  0x5b   : > { %392 = vmatmul.bf16.gmra.mxu0 %v3638_v27 }
  0x6b   : > { %470 = vmatmul.bf16.vlgmr.msrb.gmra.mxu0 %v3628_v20 }
  0xa8   : > { %v378_v28 = vpop.f32.mrf.mxu0 }
  0xa9   : > { %v476_v29 = vpop.f32.mrf.mxu1  ;;  %v592_v36 = vmul.f32 0.25, %v378_v28 }
  0xaa   : > { %v610_v30 = vpack.c.bf16 %v476_v29, %v476_v29 }
  0xab   : > { %v600_v40 = vpack.c.bf16 %v592_v36, %v592_v36  ;;  %v3216_v36 = vld [vmem:[%s4822_s3 + $0x30] sm:$0xff] }
  0xac   : > { %v654_v33 = vunpack.c.l.b16 %v610_v30 }
  0xad   : > { %v632_v44 = vunpack.c.l.b16 %v600_v40 }
  0xb0   : > { %v380_v31 = vpop.f32.mrf.mxu0 }
  0xb1   : > { %v478_v32 = vpop.f32.mrf.mxu1  ;;  %v593_v34 = vmul.f32 0.25, %v380_v31 }
  0xb2   : > { %v611_v35 = vpack.c.bf16 %v478_v32, %v478_v32 }
  0xb3   : > { %v601_v38 = vpack.c.bf16 %v593_v34, %v593_v34  ;;  %v3217_v34 = vld [vmem:[%s4822_s3 + $0x38] sm:$0xff] }
  0xb4   : > { %v655_v37 = vunpack.c.l.b16 %v611_v35  ;;  %555 = vmatpush.bf16.msra.mxu2 %v3217_v34 }
  0xb5   : > { %v633_v43 = vunpack.c.l.b16 %v601_v38  ;;  %v3215_v38 = vld [vmem:[%s4822_s3 + $0x28] sm:$0xff] }
  0xb6   : > { %v3644_v39 = vpack.c.b16 %v655_v37, %v654_v33 }
  0xb7   : > { %v3648_v45 = vpack.c.b16 %v633_v43, %v632_v44  ;;  %v3213_v43 = vld [vmem:[%s4822_s3 + $0x18] sm:$0xff] }
  0xb8   : > { %892 = vrot.lane.b32.xlu1 %v3644_v39, %s3519_s17  ;;  %v383_v41 = vpop.f32.mrf.mxu0  ;;  %v681_v9 = vsel %vm664_vm0, %v3644_v39, 0  ;;  %556 = vmatpush.bf16.msra.mxu2 %v3216_v36 }
  0xb9   : > { %v481_v42 = vpop.f32.mrf.mxu1  ;;  %v594_v19 = vmul.f32 0.25, %v383_v41 }
  0xba   : > { %v612_v46 = vpack.c.bf16 %v481_v42, %v481_v42  ;;  %v3214_v42 = vld [vmem:[%s4822_s3 + $0x20] sm:$0xff] }
  0xbb   : > { %v602_v23 = vpack.c.bf16 %v594_v19, %v594_v19 }
  0xbc   : > { %v656_v49 = vunpack.c.l.b16 %v612_v46  ;;  %557 = vmatpush.bf16.msra.mxu2 %v3215_v38 }
  0xbd   : > { %v634_v26 = vunpack.c.l.b16 %v602_v23 }
  0xc0   : > { %882 = vrot.lane.b32.xlu1 %v3648_v45, %s3519_s17  ;;  %v385_v47 = vpop.f32.mrf.mxu0  ;;  %558 = vmatpush.bf16.msra.mxu2 %v3214_v42 }
  0xc1   : > { %v483_v48 = vpop.f32.mrf.mxu1  ;;  %v595_v18 = vmul.f32 0.25, %v385_v47 }
  0xc2   : > { %v613_v50 = vpack.c.bf16 %v483_v48, %v483_v48 }
  0xc3   : > { %v603_v22 = vpack.c.bf16 %v595_v18, %v595_v18 }
  0xc4   : > { %v657_v51 = vunpack.c.l.b16 %v613_v50  ;;  %559 = vmatpush.bf16.msra.mxu2 %v3213_v43  ;;  %v3211_v50 = vld [vmem:[%s4822_s3 + $0x8] sm:$0xff] }
  0xc5   : > { %v635_v25 = vunpack.c.l.b16 %v603_v22 }
  0xc6   : > { %v3652_v52 = vpack.c.b16 %v657_v51, %v656_v49  ;;  %v3212_v49 = vld [vmem:[%s4822_s3 + $0x10] sm:$0xff]  ;;  %v3210_v51 = vld [vmem:[%s4822_s3] sm:$0xff] }
  0xc7   : > { %v3682_v28 = vpack.c.b16 %v635_v25, %v634_v26 }
  0xc8   : > { %894 = vrot.lane.b32.xlu0 %v3652_v52, %s3519_s17  ;;  %v388_v53 = vpop.f32.mrf.mxu0  ;;  %v684_v7 = vsel %vm664_vm0, %v3652_v52, 0  ;;  %560 = vmatpush.bf16.msra.mxu2 %v3212_v49 }
  0xc9   : > { %v486_v54 = vpop.f32.mrf.mxu1  ;;  %v596_v61 = vmul.f32 0.25, %v388_v53 }
  0xca   : > { %v614_v55 = vpack.c.bf16 %v486_v54, %v486_v54 }
  0xcb   : > { %v604_v1 = vpack.c.bf16 %v596_v61, %v596_v61 }
  0xcc   : > { %v658_v58 = vunpack.c.l.b16 %v614_v55  ;;  %561 = vmatpush.bf16.msra.mxu2 %v3211_v50 }
  0xcd   : > { %v636_v5 = vunpack.c.l.b16 %v604_v1 }
  0xd0   : > { %v390_v56 = vpop.f32.mrf.mxu0  ;;  %562 = vmatpush.bf16.msra.mxu2 %v3210_v51 }
  0xd1   : > { %v488_v57 = vpop.f32.mrf.mxu1  ;;  %v597_v59 = vmul.f32 0.25, %v390_v56 }
  0xd2   : > { %v615_v60 = vpack.c.bf16 %v488_v57, %v488_v57 }
  0xd3   : > { %v605_v63 = vpack.c.bf16 %v597_v59, %v597_v59  ;;  %563 = vmatmul.bf16.vlgmr.msra.gmra.mxu2 %v3628_v20 }
  0xd4   : > { %v659_v62 = vunpack.c.l.b16 %v615_v60 }
  0xd5   : > { %v637_v4 = vunpack.c.l.b16 %v605_v63 }
  0xd6   : > { %v3656_v0 = vpack.c.b16 %v659_v62, %v658_v58 }
  0xd7   : > { %v3662_v6 = vpack.c.b16 %v637_v4, %v636_v5 }
  0xd8   : > { %896 = vrot.lane.b32.xlu2 %v3656_v0, %s3519_s17  ;;  %v687_v2 = vsel %vm664_vm0, %v3656_v0, 0  ;;  %v393_v3 = vpop.f32.mrf.mxu0 }
  0xd9   : > { %693 = vmatpush.bf16.xpose.msra.mxu3 %v687_v2  ;;  %v598_v30 = vmul.f32 0.25, %v393_v3 }
  0xdb   : > { %v606_v32 = vpack.c.bf16 %v598_v30, %v598_v30 }
  0xdd   : > { %v638_v35 = vunpack.c.l.b16 %v606_v32 }
  0xe0   : > { %886 = vrot.lane.b32.xlu2 %v3662_v6, %s3519_s17  ;;  %v395_v8 = vpop.f32.mrf.mxu0 }
  0xe1   : > { %694 = vmatpush.bf16.xpose.msra.mxu3 %v684_v7  ;;  %v599_v29 = vmul.f32 0.25, %v395_v8 }
  0xe3   : > { %v607_v31 = vpack.c.bf16 %v599_v29, %v599_v29  ;;  %568 = vmatmul.bf16.gmra.mxu2 %v3630_v21 }
  0xe5   : > { %v639_v33 = vunpack.c.l.b16 %v607_v31 }
  0xe7   : > { %v3694_v37 = vpack.c.b16 %v639_v33, %v638_v35 }
  0xe8   : > { %1210 = vrot.lane.b32.xlu2 %v3656_v0, %s3520_s18  ;;  %v471_v10 = vpop.f32.mrf.mxu0 }
  0xe9   : > { %695 = vmatpush.bf16.xpose.msra.mxu3 %v681_v9  ;;  %v608_v11 = vpack.c.bf16 %v471_v10, %v471_v10 }
  0xeb   : > { %v652_v14 = vunpack.c.l.b16 %v608_v11 }
  0xf0   : > { %1208 = vrot.lane.b32.xlu2 %v3652_v52, %s3520_s18  ;;  %v473_v12 = vpop.f32.mrf.mxu0 }
  0xf1   : > { %v609_v13 = vpack.c.bf16 %v473_v12, %v473_v12 }
  0xf3   : > { %v653_v15 = vunpack.c.l.b16 %v609_v13  ;;  %573 = vmatmul.bf16.gmra.mxu2 %v3634_v24 }
  0xf5   : > { %v3674_v16 = vpack.c.b16 %v653_v15, %v652_v14 }
  0xf7   : > { %890 = vrot.lane.b32.xlu1 %v3674_v16, %s3519_s17  ;;  %v678_v17 = vsel %vm664_vm0, %v3674_v16, 0 }
  0xf8   : > { %696 = vmatpush.bf16.xpose.msra.mxu3 %v678_v17 }
  0xff   : > { %3061 = vmatmul.msk.bf16.vlgmr.msra.gmra.mxu3 %vm664_vm0, %v3648_v45 }
 0x103   : > { %578 = vmatmul.bf16.gmra.mxu2 %v3638_v27 }
 0x10f   : > { %3062 = vmatmul.msk.bf16.gmra.mxu3 %vm664_vm0, %v3682_v28 }
 0x11f   : > { %3063 = vmatmul.msk.bf16.gmra.mxu3 %vm664_vm0, %v3662_v6 }
 0x12a   : > { %v893_v47 = vpop.permute.xlu1 %892 }
 0x12b   : > { %v914_v48 = vsel %vm664_vm0, %v893_v47, 0 }
 0x12f   : > { %3064 = vmatmul.msk.bf16.gmra.mxu3 %vm664_vm0, %v3694_v37 }
 0x132   : > { %v897_v40 = vpop.permute.xlu2 %896  ;;  %v883_v54 = vpop.permute.xlu1 %882 }
 0x133   : > { %v920_v41 = vsel %vm664_vm0, %v897_v40, 0 }
 0x134   : > { %926 = vmatpush.bf16.xpose.msrb.mxu1 %v920_v41 }
 0x13a   : > { %v895_v44 = vpop.permute.xlu0 %894  ;;  %v3720_v53 = vpop.permute.xlu2 %886 }
 0x13b   : > { %v917_v46 = vsel %vm664_vm0, %v895_v44, 0 }
 0x13c   : > { %927 = vmatpush.bf16.xpose.msrb.mxu1 %v917_v46 }
 0x142   : > { %v1211_v55 = vpop.permute.xlu2 %1210 }
 0x143   : > { %v1234_v58 = vsel %vm664_vm0, %v1211_v55, 0 }
 0x144   : > { %928 = vmatpush.bf16.xpose.msrb.mxu1 %v914_v48 }
 0x14a   : > { %v1209_v59 = vpop.permute.xlu2 %1208 }
 0x14b   : > { %v1231_v60 = vsel %vm664_vm0, %v1209_v59, 0 }
 0x156   : > { %v564_v10 = vpop.f32.mrf.mxu2 }
 0x157   : > { %584 = vst [vmem:[%s3755_s16] sm:$0xff] %v564_v10  ;;  %v616_v59 = vpack.c.bf16 %v564_v10, %v564_v10 }
 0x15e   : > { %v566_v12 = vpop.f32.mrf.mxu2 }
 0x15f   : > { %585 = vst [vmem:[%s3755_s16 + $0x8] sm:$0xff] %v566_v12 }
 0x166   : > { %v569_v13 = vpop.f32.mrf.mxu2 }
 0x167   : > { %586 = vst [vmem:[%s3755_s16 + $0x10] sm:$0xff] %v569_v13  ;;  %v618_v50 = vpack.c.bf16 %v569_v13, %v569_v13 }
 0x169   : > { %v891_v56 = vpop.permute.xlu1 %890 }
 0x16a   : > { %v911_v57 = vsel %vm664_vm0, %v891_v56, 0 }
 0x16b   : > { %929 = vmatpush.bf16.xpose.msrb.mxu1 %v911_v57 }
 0x16e   : > { %v571_v14 = vpop.f32.mrf.mxu2 }
 0x16f   : > { %587 = vst [vmem:[%s3755_s16 + $0x18] sm:$0xff] %v571_v14  ;;  %v619_v51 = vpack.c.bf16 %v571_v14, %v571_v14 }
 0x172   : > { %3069 = vmatmul.msk.bf16.vlgmr.msrb.gmra.mxu1 %vm664_vm0, %v883_v54 }
 0x173   : > { %1240 = vmatpush.bf16.xpose.msra.mxu1 %v1234_v58 }
 0x176   : > { %v574_v18 = vpop.f32.mrf.mxu2 }
 0x177   : > { %588 = vst [vmem:[%s3755_s16 + $0x20] sm:$0xff] %v574_v18  ;;  %v620_v42 = vpack.c.bf16 %v574_v18, %v574_v18 }
 0x179   : > { %v823_v55 = vunpack.c.l.b16 %v620_v42  ;;  %v3854_v42 = vld [vmem:[%s4823_s4] sm:$0xff] }
 0x17b   : > { %1241 = vmatpush.bf16.xpose.msra.mxu1 %v1231_v60  ;;  %v617_v60 = vpack.c.bf16 %v566_v12, %v566_v12 }
 0x17e   : > { %v576_v25 = vpop.f32.mrf.mxu2 }
 0x17f   : > { %589 = vst [vmem:[%s3755_s16 + $0x28] sm:$0xff] %v576_v25  ;;  %v621_v43 = vpack.c.bf16 %v576_v25, %v576_v25 }
 0x181   : > { %v824_v56 = vunpack.c.l.b16 %v621_v43 }
 0x182   : > { %v698_v20 = vpop.f32.mrf.mxu3 }
 0x183   : > { %v719_v61 = vsel %vm718_vm1, %v698_v20, -inf }
 0x184   : > { %720 = vmax.xlane.f32.xlu0 %v719_v61  ;;  %v822_v61 = vunpack.c.l.b16 %v619_v51 }
 0x186   : > { %v579_v33 = vpop.f32.mrf.mxu2 }
 0x187   : > { %590 = vst [vmem:[%s3755_s16 + $0x30] sm:$0xff] %v579_v33  ;;  %v622_v38 = vpack.c.bf16 %v579_v33, %v579_v33 }
 0x189   : > { %v825_v48 = vunpack.c.l.b16 %v622_v38 }
 0x18a   : > { %v700_v21 = vpop.f32.mrf.mxu3 }
 0x18b   : > { %v722_v62 = vsel %vm718_vm1, %v700_v21, -inf }
 0x18c   : > { %723 = vmax.xlane.f32.xlu0 %v722_v62 }
 0x18e   : > { %v581_v44 = vpop.f32.mrf.mxu2 }
 0x18f   : > { %591 = vst [vmem:[%s3755_s16 + $0x38] sm:$0xff] %v581_v44  ;;  %v623_v49 = vpack.c.bf16 %v581_v44, %v581_v44 }
 0x191   : > { %v826_v57 = vunpack.c.l.b16 %v623_v49 }
 0x192   : > { %v703_v63 = vpop.f32.mrf.mxu3 }
 0x193   : > { %v725_v1 = vsel %vm718_vm1, %v703_v63, -inf  ;;  %v3779_v58 = vpack.c.b16 %v826_v57, %v825_v48 }
 0x194   : > { %726 = vmax.xlane.f32.xlu1 %v725_v1  ;;  %v819_v1 = vunpack.c.l.b16 %v616_v59 }
 0x195   : > { %851 = vmatpush.bf16.msra.mxu0 %v3779_v58 }
 0x19a   : > { %v705_v2 = vpop.f32.mrf.mxu3 }
 0x19b   : > { %v728_v3 = vsel %vm718_vm1, %v705_v2, -inf }
 0x19c   : > { %729 = vmax.xlane.f32.xlu1 %v728_v3 }
 0x1a0   : > { %888 = vrot.lane.b32.xlu0 %v3694_v37, %s3519_s17 }
 0x1a2   : > { %v3735_v24 = vpop.f32.mrf.mxu3 }
 0x1a3   : > { %v731_v7 = vsel %vm718_vm1, %v3735_v24, -inf }
 0x1aa   : > { %v3737_v4 = vpop.f32.mrf.mxu3 }
 0x1ab   : > { %v734_v11 = vsel %vm718_vm1, %v3737_v4, -inf }
 0x1b2   : > { %v3739_v27 = vpop.f32.mrf.mxu3 }
 0x1b3   : > { %v737_v5 = vsel %vm718_vm1, %v3739_v27, -inf }
 0x1b4   : > { %738 = vmax.xlane.f32.xlu2 %v737_v5 }
 0x1b5   : > { %884 = vrot.lane.b32.xlu1 %v3682_v28, %s3519_s17 }
 0x1ba   : > { %v3747_v8 = vpop.f32.mrf.mxu3 }
 0x1bb   : > { %v740_v9 = vsel %vm718_vm1, %v3747_v8, -inf }
 0x1ca   : > { %732 = vmax.xlane.f32.xlu0 %v731_v7 }
 0x1d2   : > { %741 = vmax.xlane.f32.xlu0 %v740_v9 }
 0x1df   : > { %735 = vmax.xlane.f32.xlu1 %v734_v11 }
 0x1f7   : > { %v721_v15 = vpop.xlane.xlu0 %720 }
 0x1f8   : > { %v743_v17 = vsub.f32 %v698_v20, %v721_v15  ;;  %v821_v20 = vunpack.c.l.b16 %v618_v50 }
 0x1fa   : > { %v751_v19 = vmul.f32 1.442695, %v743_v17  ;;  %v3788_v3 = vpack.c.b16 %v822_v61, %v821_v20 }
 0x1fc   : > { %3255 = vpow2.f32 %v751_v19 }
 0x1ff   : > { %v724_v22 = vpop.xlane.xlu0 %723 }
 0x200   : > { %v744_v23 = vsub.f32 %v700_v21, %v724_v22  ;;  %v3781_v21 = vpack.c.b16 %v824_v56, %v823_v55 }
 0x202   : > { %v3764_v26 = vpop.eup %3255  ;;  %v753_v29 = vmul.f32 1.442695, %v744_v23  ;;  %852 = vmatpush.bf16.msra.mxu0 %v3781_v21 }
 0x203   : > { %v767_v30 = vsel %vm718_vm1, %v3764_v26, 0.0 }
 0x204   : > { %3257 = vpow2.f32 %v753_v29  ;;  %768 = vadd.xlane.f32.xlu2 %v767_v30 }
 0x206   : > { %853 = vmatpush.bf16.msra.mxu0 %v3788_v3 }
 0x207   : > { %v727_v31 = vpop.xlane.xlu1 %726 }
 0x208   : > { %v745_v32 = vsub.f32 %v703_v63, %v727_v31  ;;  %v3839_v31 = vpop.f32.mrf.mxu1 }
 0x20a   : > { %v3769_v34 = vpop.eup %3257  ;;  %v755_v35 = vmul.f32 1.442695, %v745_v32 }
 0x20b   : > { %v770_v36 = vsel %vm718_vm1, %v3769_v34, 0.0 }
 0x20c   : > { %3259 = vpow2.f32 %v755_v35  ;;  %771 = vadd.xlane.f32.xlu2 %v770_v36 }
 0x20f   : > { %v730_v40 = vpop.xlane.xlu1 %729 }
 0x210   : > { %v746_v41 = vsub.f32 %v705_v2, %v730_v40  ;;  %v820_v2 = vunpack.c.l.b16 %v617_v60  ;;  %v3847_v35 = vpop.f32.mrf.mxu1 }
 0x211   : > { %v954_v38 = vsel %vm718_vm1, %v3847_v35, -inf }
 0x212   : > { %v3774_v46 = vpop.eup %3259  ;;  %v757_v47 = vmul.f32 1.442695, %v746_v41  ;;  %v3791_v5 = vpack.c.b16 %v820_v2, %v819_v1  ;;  %v889_v9 = vpop.permute.xlu0 %888 }
 0x213   : > { %v773_v54 = vsel %vm718_vm1, %v3774_v46, 0.0 }
 0x214   : > { %3261 = vpow2.f32 %v757_v47  ;;  %774 = vadd.xlane.f32.xlu0 %v773_v54  ;;  %854 = vmatpush.bf16.msra.mxu0 %v3791_v5 }
 0x218   : > { %1174 = vmatpush.bf16.msrb.mxu0 %v3854_v42 }
 0x21a   : > { %v3784_v62 = vpop.eup %3261 }
 0x21b   : > { %v776_v63 = vsel %vm718_vm1, %v3784_v62, 0.0 }
 0x21c   : > { %777 = vadd.xlane.f32.xlu1 %v776_v63  ;;  %v951_v63 = vsel %vm718_vm1, %v3839_v31, -inf }
 0x224   : > { %1206 = vrot.lane.b32.xlu2 %v3644_v39, %s3520_s18 }
 0x227   : > { %v885_v7 = vpop.permute.xlu1 %884  ;;  %v739_v13 = vpop.xlane.xlu2 %738 }
 0x228   : > { %3070 = vmatmul.msk.bf16.gmra.mxu1 %vm664_vm0, %v885_v7  ;;  %1483 = vrot.lane.b32.xlu0 %v3652_v52, %s3521_s19  ;;  %v749_v15 = vsub.f32 %v3739_v27, %v739_v13 }
 0x22a   : > { %v763_v19 = vmul.f32 1.442695, %v749_v15 }
 0x22c   : > { %1204 = vrot.lane.b32.xlu2 %v3674_v16, %s3520_s18 }
 0x230   : > { %1481 = vrot.lane.b32.xlu0 %v3644_v39, %s3521_s19 }
 0x234   : > { %1196 = vrot.lane.b32.xlu2 %v3648_v45, %s3520_s18 }
 0x235   : > { %1485 = vrot.lane.b32.xlu1 %v3656_v0, %s3521_s19 }
 0x238   : > { %3071 = vmatmul.msk.bf16.gmra.mxu1 %vm664_vm0, %v3720_v53  ;;  %1479 = vrot.lane.b32.xlu0 %v3674_v16, %s3521_s19 }
 0x23c   : > { %1198 = vrot.lane.b32.xlu2 %v3682_v28, %s3520_s18 }
 0x23d   : > { %1471 = vrot.lane.b32.xlu1 %v3648_v45, %s3521_s19  ;;  %v733_v12 = vpop.xlane.xlu0 %732 }
 0x23e   : > { %v747_v14 = vsub.f32 %v3735_v24, %v733_v12 }
 0x240   : > { %1473 = vrot.lane.b32.xlu0 %v3682_v28, %s3521_s19  ;;  %v759_v18 = vmul.f32 1.442695, %v747_v14 }
 0x245   : > { %1200 = vrot.lane.b32.xlu1 %v3662_v6, %s3520_s18  ;;  %v742_v23 = vpop.xlane.xlu0 %741 }
 0x248   : > { %3072 = vmatmul.msk.bf16.gmra.mxu1 %vm664_vm0, %v889_v9  ;;  %1202 = vrot.lane.b32.xlu0 %v3694_v37, %s3520_s18 }
 0x252   : > { %v736_v53 = vpop.xlane.xlu1 %735 }
 0x253   : > { %v748_v10 = vsub.f32 %v3737_v4, %v736_v53  ;;  %v750_v4 = vsub.f32 %v3747_v8, %v742_v23 }
 0x255   : > { %v761_v11 = vmul.f32 1.442695, %v748_v10  ;;  %v765_v29 = vmul.f32 1.442695, %v750_v4 }
 0x257   : > { %3263 = vpow2.f32 %v761_v11 }
 0x258   : > { %3265 = vpow2.f32 %v759_v18 }
 0x259   : > { %3267 = vpow2.f32 %v763_v19 }
 0x25a   : > { %3269 = vpow2.f32 %v765_v29 }
 0x25d   : > { %v3826_v17 = vpop.eup %3263 }
 0x25e   : > { %v782_v22 = vsel %vm718_vm1, %v3826_v17, 0.0  ;;  %v3831_v25 = vpop.eup %3265 }
 0x25f   : > { %v3833_v30 = vpop.eup %3267  ;;  %v779_v24 = vsel %vm718_vm1, %v3831_v25, 0.0 }
 0x260   : > { %v785_v27 = vsel %vm718_vm1, %v3833_v30, 0.0  ;;  %v3841_v32 = vpop.eup %3269 }
 0x261   : > { %v788_v8 = vsel %vm718_vm1, %v3841_v32, 0.0 }
 0x265   : > { %783 = vadd.xlane.f32.xlu2 %v782_v22 }
 0x26f   : > { %780 = vadd.xlane.f32.xlu1 %v779_v24 }
 0x272   : > { %786 = vadd.xlane.f32.xlu0 %v785_v27 }
 0x277   : > { %v769_v33 = vpop.xlane.xlu2 %768 }
 0x278   : > { %3271 = vrcp.f32 %v769_v33 }
 0x27a   : > { %789 = vadd.xlane.f32.xlu0 %v788_v8 }
 0x27d   : > { %1475 = vrot.lane.b32.xlu2 %v3662_v6, %s3521_s19 }
 0x27e   : > { %v3272_v40 = vpop.eup %3271 }
 0x27f   : > { %v772_v36 = vpop.xlane.xlu2 %771  ;;  %v799_v43 = vmul.f32 %v3272_v40, %v3764_v26 }
 0x280   : > { %3273 = vrcp.f32 %v772_v36 }
 0x282   : > { %955 = vmax.xlane.f32.xlu0 %v954_v38 }
 0x286   : > { %v3274_v41 = vpop.eup %3273 }
 0x287   : > { %v800_v44 = vmul.f32 %v3274_v41, %v3769_v34  ;;  %v1207_v47 = vpop.permute.xlu2 %1206  ;;  %v775_v50 = vpop.xlane.xlu0 %774 }
 0x288   : > { %1477 = vrot.lane.b32.xlu1 %v3694_v37, %s3521_s19  ;;  %v1228_v48 = vsel %vm664_vm0, %v1207_v47, 0  ;;  %3275 = vrcp.f32 %v775_v50 }
 0x289   : > { %v807_v49 = vpack.c.bf16 %v800_v44, %v799_v43  ;;  %1242 = vmatpush.bf16.xpose.msra.mxu1 %v1228_v48 }
 0x28b   : > { %3065 = vmatmul.msk.bf16.vlgmr.msra.gmra.mxu0 %vm718_vm1, %v807_v49 }
 0x28e   : > { %v3276_v34 = vpop.eup %3275 }
 0x28f   : > { %v778_v51 = vpop.xlane.xlu1 %777  ;;  %v1205_v54 = vpop.permute.xlu2 %1204  ;;  %v801_v57 = vmul.f32 %v3276_v34, %v3774_v46 }
 0x290   : > { %3277 = vrcp.f32 %v778_v51  ;;  %v1225_v26 = vsel %vm664_vm0, %v1205_v54, 0 }
 0x291   : > { %1243 = vmatpush.bf16.xpose.msra.mxu1 %v1225_v26 }
 0x296   : > { %v3278_v55 = vpop.eup %3277 }
 0x297   : > { %v1197_v56 = vpop.permute.xlu2 %1196  ;;  %v802_v59 = vmul.f32 %v3278_v55, %v3784_v62 }
 0x298   : > { %3093 = vmatmul.msk.bf16.vlgmr.msra.gmra.mxu1 %vm664_vm0, %v1197_v56 }
 0x299   : > { %v808_v60 = vpack.c.bf16 %v802_v59, %v801_v57 }
 0x29a   : > { %v1484_v20 = vpop.permute.xlu0 %1483 }
 0x29b   : > { %3066 = vmatmul.msk.bf16.gmra.mxu0 %vm718_vm1, %v808_v60  ;;  %v1506_v10 = vsel %vm664_vm0, %v1484_v20, 0 }
 0x29f   : > { %v1199_v1 = vpop.permute.xlu2 %1198 }
 0x2a2   : > { %v1482_v46 = vpop.permute.xlu0 %1481 }
 0x2a3   : > { %v1503_v18 = vsel %vm664_vm0, %v1482_v46, 0 }
 0x2a5   : > { %v3868_v61 = vpop.f32.mrf.mxu1 }
 0x2a6   : > { %952 = vmax.xlane.f32.xlu2 %v951_v63  ;;  %v957_v11 = vsel %vm718_vm1, %v3868_v61, -inf }
 0x2a7   : > { %v1486_v2 = vpop.permute.xlu1 %1485 }
 0x2a8   : > { %v1509_v7 = vsel %vm664_vm0, %v1486_v2, 0  ;;  %3094 = vmatmul.msk.bf16.gmra.mxu1 %vm664_vm0, %v1199_v1 }
 0x2a9   : > { %1515 = vmatpush.bf16.xpose.msra.mxu0 %v1509_v7 }
 0x2aa   : > { %v1480_v12 = vpop.permute.xlu0 %1479 }
 0x2ab   : > { %v1500_v4 = vsel %vm664_vm0, %v1480_v12, 0 }
 0x2ad   : > { %v3874_v62 = vpop.f32.mrf.mxu1 }
 0x2ae   : > { %v960_v9 = vsel %vm718_vm1, %v3874_v62, -inf }
 0x2af   : > { %v3878_v53 = vpop.permute.xlu1 %1471  ;;  %961 = vmax.xlane.f32.xlu2 %v960_v9 }
 0x2b1   : > { %1516 = vmatpush.bf16.xpose.msra.mxu0 %v1506_v10 }
 0x2b2   : > { %958 = vmax.xlane.f32.xlu1 %v957_v11  ;;  %v3889_v19 = vpop.permute.xlu0 %1473 }
 0x2b5   : > { %v3883_v13 = vpop.f32.mrf.mxu1 }
 0x2b6   : > { %v963_v14 = vsel %vm718_vm1, %v3883_v13, -inf }
 0x2b7   : > { %v1201_v15 = vpop.permute.xlu1 %1200  ;;  %964 = vmax.xlane.f32.xlu0 %v963_v14 }
 0x2b8   : > { %3095 = vmatmul.msk.bf16.gmra.mxu1 %vm664_vm0, %v1201_v15 }
 0x2b9   : > { %1517 = vmatpush.bf16.xpose.msra.mxu0 %v1503_v18 }
 0x2ba   : > { %v1203_v27 = vpop.permute.xlu0 %1202 }
 0x2bd   : > { %v3891_v22 = vpop.f32.mrf.mxu1 }
 0x2be   : > { %v966_v23 = vsel %vm718_vm1, %v3891_v22, -inf }
 0x2bf   : > { %967 = vmax.xlane.f32.xlu1 %v966_v23 }
 0x2c1   : > { %1518 = vmatpush.bf16.xpose.msra.mxu0 %v1500_v4 }
 0x2c5   : > { %v3896_v29 = vpop.f32.mrf.mxu1 }
 0x2c6   : > { %v969_v24 = vsel %vm718_vm1, %v3896_v29, -inf }
 0x2c7   : > { %970 = vmax.xlane.f32.xlu2 %v969_v24 }
 0x2c8   : > { %3096 = vmatmul.msk.bf16.gmra.mxu1 %vm664_vm0, %v1203_v27 }
 0x2cd   : > { %v3901_v33 = vpop.f32.mrf.mxu1 }
 0x2ce   : > { %v972_v8 = vsel %vm718_vm1, %v3901_v33, -inf }
 0x2cf   : > { %973 = vmax.xlane.f32.xlu0 %v972_v8 }
 0x2d8   : > { %1049 = vrot.lane.b32.xlu1 %v3779_v58, %s3519_s17  ;;  %v784_v36 = vpop.xlane.xlu2 %783 }
 0x2d9   : > { %3279 = vrcp.f32 %v784_v36 }
 0x2df   : > { %1047 = vrot.lane.b32.xlu2 %v3781_v21, %s3519_s17  ;;  %v3280_v41 = vpop.eup %3279 }
 0x2e0   : > { %1043 = vrot.lane.b32.xlu1 %v3791_v5, %s3519_s17  ;;  %v804_v47 = vmul.f32 %v3280_v41, %v3826_v17  ;;  %v1476_v2 = vpop.permute.xlu2 %1475 }
 0x2e2   : > { %v781_v38 = vpop.xlane.xlu1 %780 }
 0x2e3   : > { %3281 = vrcp.f32 %v781_v38  ;;  %1045 = vrot.lane.b32.xlu0 %v3788_v3, %s3519_s17 }
 0x2e5   : > { %v787_v40 = vpop.xlane.xlu0 %786 }
 0x2e9   : > { %v3282_v43 = vpop.eup %3281 }
 0x2ea   : > { %v803_v44 = vmul.f32 %v3282_v43, %v3831_v25 }
 0x2ec   : > { %v809_v48 = vpack.c.bf16 %v804_v47, %v803_v44 }
 0x2ed   : > { %v790_v49 = vpop.xlane.xlu0 %789 }
 0x2ee   : > { %3067 = vmatmul.msk.bf16.gmra.mxu0 %vm718_vm1, %v809_v48  ;;  %3283 = vrcp.f32 %v790_v49 }
 0x2ef   : > { %3285 = vrcp.f32 %v787_v40 }
 0x2f4   : > { %v3284_v50 = vpop.eup %3283 }
 0x2f5   : > { %v3286_v51 = vpop.eup %3285  ;;  %v806_v54 = vmul.f32 %v3284_v50, %v3841_v32  ;;  %v956_v14 = vpop.xlane.xlu0 %955 }
 0x2f6   : > { %v805_v26 = vmul.f32 %v3286_v51, %v3833_v30  ;;  %v976_v27 = vsub.f32 %v3847_v35, %v956_v14 }
 0x2f8   : > { %v810_v34 = vpack.c.bf16 %v806_v54, %v805_v26  ;;  %v985_v40 = vmul.f32 1.442695, %v976_v27 }
 0x2fa   : > { %v3935_v46 = vpop.permute.xlu1 %1477 }
 0x2fe   : > { %3068 = vmatmul.msk.bf16.gmra.mxu0 %vm718_vm1, %v810_v34 }
 0x308   : > { %v856_v55 = vpop.f32.mrf.mxu0 }
 0x310   : > { %v858_v56 = vpop.f32.mrf.mxu0 }
 0x311   : > { %v876_v25 = vpack.c.bf16 %v858_v56, %v856_v55 }
 0x313   : > { %3089 = vmatmul.msk.bf16.vlgmr.msrb.gmra.mxu0 %vm664_vm0, %v876_v25 }
 0x315   : > { %v3920_v17 = vpop.f32.mrf.mxu1 }
 0x316   : > { %v1265_v57 = vsel %vm718_vm1, %v3920_v17, -inf }
 0x317   : > { %1266 = vmax.xlane.f32.xlu0 %v1265_v57 }
 0x318   : > { %v861_v59 = vpop.f32.mrf.mxu0 }
 0x319   : > { %v3937_v9 = vpop.xlane.xlu2 %952 }
 0x31d   : > { %v3924_v60 = vpop.f32.mrf.mxu1 }
 0x31e   : > { %v1268_v30 = vsel %vm718_vm1, %v3924_v60, -inf }
 0x31f   : > { %1269 = vmax.xlane.f32.xlu2 %v1268_v30 }
 0x320   : > { %v863_v32 = vpop.f32.mrf.mxu0 }
 0x321   : > { %v877_v20 = vpack.c.bf16 %v863_v32, %v861_v59 }
 0x322   : > { %v962_v12 = vpop.xlane.xlu2 %961 }
 0x323   : > { %3090 = vmatmul.msk.bf16.gmra.mxu0 %vm664_vm0, %v877_v20  ;;  %v978_v35 = vsub.f32 %v3874_v62, %v962_v12 }
 0x325   : > { %v3929_v63 = vpop.f32.mrf.mxu1  ;;  %v959_v11 = vpop.xlane.xlu1 %958  ;;  %v989_v51 = vmul.f32 1.442695, %v978_v35 }
 0x326   : > { %v1271_v1 = vsel %vm718_vm1, %v3929_v63, -inf  ;;  %v977_v18 = vsub.f32 %v3868_v61, %v959_v11 }
 0x327   : > { %1272 = vmax.xlane.f32.xlu0 %v1271_v1 }
 0x328   : > { %v987_v4 = vmul.f32 1.442695, %v977_v18 }
 0x32a   : > { %v3953_v8 = vpop.xlane.xlu0 %964  ;;  %3287 = vpow2.f32 %v987_v4 }
 0x32b   : > { %3289 = vpow2.f32 %v985_v40 }
 0x32d   : > { %v3933_v7 = vpop.f32.mrf.mxu1 }
 0x32e   : > { %v1274_v1 = vsel %vm718_vm1, %v3933_v7, -inf }
 0x332   : > { %v968_v24 = vpop.xlane.xlu1 %967 }
 0x333   : > { %3109 = vmatmul.msk.bf16.vlgmr.msra.gmra.mxu0 %vm664_vm0, %v3878_v53  ;;  %v980_v38 = vsub.f32 %v3891_v22, %v968_v24 }
 0x335   : > { %v3941_v10 = vpop.f32.mrf.mxu1  ;;  %v993_v41 = vmul.f32 1.442695, %v980_v38 }
 0x336   : > { %v1277_v12 = vsel %vm718_vm1, %v3941_v10, -inf }
 0x337   : > { %1363 = vrot.lane.b32.xlu2 %v3779_v58, %s3520_s18  ;;  %3291 = vpow2.f32 %v993_v41 }
 0x338   : > { %3293 = vpow2.f32 %v989_v51 }
 0x33a   : > { %v971_v53 = vpop.xlane.xlu2 %970 }
 0x33b   : > { %v981_v22 = vsub.f32 %v3896_v29, %v971_v53 }
 0x33d   : > { %v3945_v15 = vpop.f32.mrf.mxu1  ;;  %v995_v54 = vmul.f32 1.442695, %v981_v22 }
 0x33e   : > { %v1280_v23 = vsel %vm718_vm1, %v3945_v15, -inf }
 0x33f   : > { %1281 = vmax.xlane.f32.xlu1 %v1280_v23  ;;  %3295 = vpow2.f32 %v995_v54 }
 0x342   : > { %v974_v44 = vpop.xlane.xlu0 %973  ;;  %v1048_v48 = vpop.permute.xlu2 %1047 }
 0x343   : > { %3110 = vmatmul.msk.bf16.gmra.mxu0 %vm664_vm0, %v3889_v19  ;;  %v3960_v19 = vpop.eup %3287  ;;  %v982_v34 = vsub.f32 %v3901_v33, %v974_v44  ;;  %v975_v33 = vsub.f32 %v3839_v31, %v3937_v9  ;;  %v979_v31 = vsub.f32 %v3883_v13, %v3953_v8 }
 0x344   : > { %v1005_v50 = vsel %vm718_vm1, %v3960_v19, 0.0  ;;  %v3970_v62 = vpop.eup %3289 }
 0x345   : > { %v3955_v36 = vpop.f32.mrf.mxu1  ;;  %v3973_v26 = vpop.eup %3291  ;;  %v1002_v56 = vsel %vm718_vm1, %v3970_v62, 0.0  ;;  %v997_v57 = vmul.f32 1.442695, %v982_v34  ;;  %v991_v14 = vmul.f32 1.442695, %v979_v31 }
 0x346   : > { %v1283_v61 = vsel %vm718_vm1, %v3955_v36, -inf  ;;  %v1014_v55 = vsel %vm718_vm1, %v3973_v26, 0.0  ;;  %v3980_v59 = vpop.eup %3293 }
 0x347   : > { %1284 = vmax.xlane.f32.xlu1 %v1283_v61  ;;  %v3982_v30 = vpop.eup %3295  ;;  %3297 = vpow2.f32 %v997_v57  ;;  %v1008_v20 = vsel %vm718_vm1, %v3980_v59, 0.0 }
 0x348   : > { %v1017_v32 = vsel %vm718_vm1, %v3982_v30, 0.0 }
 0x34a   : > { %v1050_v43 = vpop.permute.xlu1 %1049 }
 0x34b   : > { %1071 = vmatpush.bf16.msrb.mxu2 %v1050_v43  ;;  %3234 = vmatpush.bf16.msrb.mxu3 %v1050_v43 }
 0x34d   : > { %v3963_v47 = vpop.f32.mrf.mxu1  ;;  %v3994_v11 = vpop.eup %3297 }
 0x34e   : > { %v1286_v49 = vsel %vm718_vm1, %v3963_v47, -inf  ;;  %v1020_v9 = vsel %vm718_vm1, %v3994_v11, 0.0 }
 0x34f   : > { %1072 = vmatpush.bf16.msrb.mxu2 %v1048_v48  ;;  %3235 = vmatpush.bf16.msrb.mxu3 %v1048_v48 }
 0x350   : > { %1006 = vadd.xlane.f32.xlu1 %v1005_v50  ;;  %1287 = vmax.xlane.f32.xlu0 %v1286_v49 }
 0x352   : > { %v1044_v25 = vpop.permute.xlu1 %1043 }
 0x353   : > { %3111 = vmatmul.msk.bf16.gmra.mxu0 %vm664_vm0, %v1476_v2  ;;  %v983_v2 = vmul.f32 1.442695, %v975_v33 }
 0x355   : > { %v1046_v29 = vpop.permute.xlu0 %1045  ;;  %3299 = vpow2.f32 %v983_v2 }
 0x356   : > { %1073 = vmatpush.bf16.msrb.mxu2 %v1046_v29  ;;  %3236 = vmatpush.bf16.msrb.mxu3 %v1046_v29  ;;  %3301 = vpow2.f32 %v991_v14 }
 0x358   : > { %1015 = vadd.xlane.f32.xlu1 %v1014_v55  ;;  %1003 = vadd.xlane.f32.xlu0 %v1002_v56 }
 0x35a   : > { %1074 = vmatpush.bf16.msrb.mxu2 %v1044_v25  ;;  %3237 = vmatpush.bf16.msrb.mxu3 %v1044_v25 }
 0x35b   : > { %v4004_v23 = vpop.eup %3299 }
 0x35c   : > { %v4010_v13 = vpop.eup %3301 }
 0x35d   : > { %v1011_v24 = vsel %vm718_vm1, %v4010_v13, 0.0 }
 0x360   : > { %1018 = vadd.xlane.f32.xlu1 %v1017_v32  ;;  %1009 = vadd.xlane.f32.xlu0 %v1008_v20 }
 0x361   : > { %1275 = vmax.xlane.f32.xlu2 %v1274_v1 }
 0x363   : > { %3112 = vmatmul.msk.bf16.gmra.mxu0 %vm664_vm0, %v3935_v46  ;;  %v999_v46 = vsel %vm718_vm1, %v4004_v23, 0.0 }
 0x368   : > { %1021 = vadd.xlane.f32.xlu0 %v1020_v9 }
 0x369   : > { %1278 = vmax.xlane.f32.xlu2 %v1277_v12 }
 0x36b   : > { %v4002_v18 = vpop.f32.mrf.mxu0 }
 0x371   : > { %1000 = vadd.xlane.f32.xlu2 %v999_v46 }
 0x373   : > { %v4008_v4 = vpop.f32.mrf.mxu0 }
 0x379   : > { %1012 = vadd.xlane.f32.xlu2 %v1011_v24 }
 0x37b   : > { %v4014_v53 = vpop.f32.mrf.mxu0 }
 0x383   : > { %v4016_v27 = vpop.f32.mrf.mxu0 }
 0x38a   : > { %v1267_v8 = vpop.xlane.xlu0 %1266 }
 0x38b   : > { %v1289_v38 = vsub.f32 %v3920_v17, %v1267_v8 }
 0x38d   : > { %v1297_v61 = vmul.f32 1.442695, %v1289_v38 }
 0x38f   : > { %3303 = vpow2.f32 %v1297_v61 }
 0x390   : > { %v4019_v40 = vpop.f32.mrf.mxu0 }
 0x392   : > { %v1270_v41 = vpop.xlane.xlu2 %1269 }
 0x393   : > { %v1290_v43 = vsub.f32 %v3924_v60, %v1270_v41 }
 0x395   : > { %v4022_v35 = vpop.eup %3303  ;;  %v1299_v44 = vmul.f32 1.442695, %v1290_v43 }
 0x396   : > { %v1313_v22 = vsel %vm718_vm1, %v4022_v35, 0.0 }
 0x397   : > { %3305 = vpow2.f32 %v1299_v44  ;;  %1314 = vadd.xlane.f32.xlu1 %v1313_v22 }
 0x398   : > { %v4026_v48 = vpop.f32.mrf.mxu0 }
 0x39a   : > { %v1364_v49 = vpop.permute.xlu2 %1363  ;;  %v1273_v57 = vpop.xlane.xlu0 %1272 }
 0x39b   : > { %1385 = vmatpush.bf16.msra.mxu2 %v1364_v49  ;;  %v1291_v49 = vsub.f32 %v3929_v63, %v1273_v57 }
 0x39d   : > { %v4028_v17 = vpop.eup %3305 }
 0x39e   : > { %v1316_v50 = vsel %vm718_vm1, %v4028_v17, 0.0 }
 0x39f   : > { %1317 = vadd.xlane.f32.xlu0 %v1316_v50 }
 0x3a0   : > { %v4032_v51 = vpop.f32.mrf.mxu0 }
 0x3a8   : > { %v4034_v60 = vpop.f32.mrf.mxu0 }
 0x3b0   : > { %v4036_v54 = vpop.f32.mrf.mxu0 }
 0x3b1   : > { %v1540_v29 = vsel %vm718_vm1, %v4036_v54, -inf }
 0x3b2   : > { %v4040_v34 = vpop.xlane.xlu1 %1281  ;;  %1541 = vmax.xlane.f32.xlu2 %v1540_v29 }
 0x3b3   : > { %1638 = vrot.lane.b32.xlu0 %v3779_v58, %s3521_s19 }
 0x3b8   : > { %v4044_v55 = vpop.f32.mrf.mxu0 }
 0x3b9   : > { %v1543_v56 = vsel %vm718_vm1, %v4044_v55, -inf }
 0x3ba   : > { %v4048_v25 = vpop.xlane.xlu1 %1284  ;;  %1544 = vmax.xlane.f32.xlu1 %v1543_v56  ;;  %v1301_v56 = vmul.f32 1.442695, %v1291_v49 }
 0x3bb   : > { %1357 = vrot.lane.b32.xlu0 %v3791_v5, %s3520_s18 }
 0x3c0   : > { %v4058_v2 = vpop.f32.mrf.mxu0 }
 0x3c3   : > { %v1007_v33 = vpop.xlane.xlu1 %1006  ;;  %v4052_v32 = vpop.xlane.xlu0 %1287  ;;  %1636 = vrot.lane.b32.xlu0 %v3781_v21, %s3521_s19 }
 0x3c8   : > { %v4064_v14 = vpop.f32.mrf.mxu0 }
 0x3ca   : > { %1359 = vrot.lane.b32.xlu2 %v3788_v3, %s3520_s18 }
 0x3cb   : > { %v1004_v20 = vpop.xlane.xlu0 %1003  ;;  %v1016_v1 = vpop.xlane.xlu1 %1015 }
 0x3d0   : > { %v4068_v61 = vpop.f32.mrf.mxu0 }
 0x3d3   : > { %v1010_v31 = vpop.xlane.xlu0 %1009  ;;  %1361 = vrot.lane.b32.xlu1 %v3781_v21, %s3520_s18  ;;  %v1019_v12 = vpop.xlane.xlu1 %1018  ;;  %s4799_s18 = scalar_lea.vmem %s4825_s6, %s3610_s29 }
 0x3d4   : > { %v4062_v9 = vpop.xlane.xlu2 %1275  ;;  %3307 = vrcp.f32 %v1019_v12 }
 0x3da   : > { %v3308_v8 = vpop.eup %3307 }
 0x3db   : > { %v1022_v46 = vpop.xlane.xlu0 %1021  ;;  %v1037_v41 = vmul.f32 %v3308_v8, %v3982_v30  ;;  %v4078_v30 = vpop.f32.mrf.mxu0 }
 0x3dc   : > { %3309 = vrcp.f32 %v1022_v46  ;;  %v4066_v24 = vpop.xlane.xlu2 %1278  ;;  %v1549_v46 = vsel %vm718_vm1, %v4064_v14, -inf  ;;  %v1555_v63 = vsel %vm718_vm1, %v4078_v30, -inf }
 0x3dd   : > { %3311 = vrcp.f32 %v1004_v20 }
 0x3e2   : > { %v3310_v38 = vpop.eup %3309 }
 0x3e3   : > { %v1038_v43 = vmul.f32 %v3310_v38, %v3994_v11  ;;  %v3312_v50 = vpop.eup %3311  ;;  %v4087_v8 = vpop.f32.mrf.mxu0 }
 0x3e4   : > { %v1001_v44 = vpop.xlane.xlu2 %1000  ;;  %v1032_v12 = vmul.f32 %v3312_v50, %v3970_v62  ;;  %v1552_v62 = vsel %vm718_vm1, %v4068_v61, -inf }
 0x3e5   : > { %3313 = vrcp.f32 %v1001_v44  ;;  %v1042_v22 = vpack.c.bf16 %v1038_v43, %v1037_v41  ;;  %v1546_v43 = vsel %vm718_vm1, %v4058_v2, -inf }
 0x3e6   : > { %3315 = vpow2.f32 %v1301_v56 }
 0x3e7   : > { %3076 = vmatmul.msk.bf16.vlgmr.msrb.gmra.mxu3 %vm718_vm1, %v1042_v22  ;;  %3317 = vrcp.f32 %v1010_v31 }
 0x3e8   : > { %3319 = vrcp.f32 %v1007_v33  ;;  %v1558_v33 = vsel %vm718_vm1, %v4087_v8, -inf }
 0x3eb   : > { %v3314_v29 = vpop.eup %3313  ;;  %v4098_v50 = vpop.f32.mrf.mxu0 }
 0x3ec   : > { %v1031_v20 = vmul.f32 %v3314_v29, %v4004_v23  ;;  %v4085_v23 = vpop.eup %3315  ;;  %v1013_v22 = vpop.xlane.xlu2 %1012 }
 0x3ed   : > { %1550 = vmax.xlane.f32.xlu0 %v1549_v46  ;;  %v3318_v57 = vpop.eup %3317  ;;  %v1319_v41 = vsel %vm718_vm1, %v4085_v23, 0.0  ;;  %3321 = vrcp.f32 %v1013_v22 }
 0x3ee   : > { %v1039_v11 = vpack.c.bf16 %v1032_v12, %v1031_v20  ;;  %v3320_v38 = vpop.eup %3319  ;;  %v1034_v31 = vmul.f32 %v3318_v57, %v3980_v59  ;;  %3323 = vrcp.f32 %v1016_v1  ;;  %v1561_v59 = vsel %vm718_vm1, %v4098_v50, -inf }
 0x3ef   : > { %v1033_v44 = vmul.f32 %v3320_v38, %v3960_v19  ;;  %v1293_v57 = vsub.f32 %v3941_v10, %v4066_v24 }
 0x3f0   : > { %3073 = vmatmul.msk.bf16.vlgmr.msrb.gmra.mxu2 %vm718_vm1, %v1039_v11 }
 0x3f1   : > { %v1040_v49 = vpack.c.bf16 %v1034_v31, %v1033_v44  ;;  %v1292_v44 = vsub.f32 %v3933_v7, %v4062_v9 }
 0x3f3   : > { %1556 = vmax.xlane.f32.xlu2 %v1555_v63  ;;  %v3322_v29 = vpop.eup %3321  ;;  %v1303_v10 = vmul.f32 1.442695, %v1292_v44 }
 0x3f4   : > { %v3324_v56 = vpop.eup %3323  ;;  %v1035_v12 = vmul.f32 %v3322_v29, %v4010_v13  ;;  %v1305_v13 = vmul.f32 1.442695, %v1293_v57 }
 0x3f5   : > { %1553 = vmax.xlane.f32.xlu0 %v1552_v62  ;;  %v1036_v19 = vmul.f32 %v3324_v56, %v3973_v26 }
 0x3f7   : > { %v1041_v20 = vpack.c.bf16 %v1036_v19, %v1035_v12 }
 0x3fb   : > { %1320 = vadd.xlane.f32.xlu2 %v1319_v41 }
 0x3fd   : > { %1559 = vmax.xlane.f32.xlu0 %v1558_v33  ;;  %1547 = vmax.xlane.f32.xlu1 %v1546_v43 }
 0x400   : > { %3074 = vmatmul.msk.bf16.gmra.mxu2 %vm718_vm1, %v1040_v49 }
 0x405   : > { %1562 = vmax.xlane.f32.xlu0 %v1561_v59 }
 0x40a   : > { %v1315_v11 = vpop.xlane.xlu1 %1314 }
 0x410   : > { %3075 = vmatmul.msk.bf16.gmra.mxu2 %vm718_vm1, %v1041_v20 }
 0x412   : > { %v1318_v46 = vpop.xlane.xlu0 %1317 }
 0x419   : > { %1634 = vrot.lane.b32.xlu0 %v3788_v3, %s3521_s19 }
 0x425   : > { %v1542_v63 = vpop.xlane.xlu2 %1541  ;;  %v1639_v1 = vpop.permute.xlu0 %1638 }
 0x426   : > { %v1564_v62 = vsub.f32 %v4036_v54, %v1542_v63  ;;  %1660 = vmatpush.bf16.msrb.mxu1 %v1639_v1 }
 0x428   : > { %v1572_v38 = vmul.f32 1.442695, %v1564_v62 }
 0x42a   : > { %3325 = vpow2.f32 %v1572_v38 }
 0x42b   : > { %3327 = vpow2.f32 %v1305_v13 }
 0x42d   : > { %v1545_v26 = vpop.xlane.xlu1 %1544  ;;  %v1358_v31 = vpop.permute.xlu0 %1357 }
 0x42e   : > { %v1565_v41 = vsub.f32 %v4044_v55, %v1545_v26  ;;  %v1295_v55 = vsub.f32 %v3955_v36, %v4048_v25  ;;  %v1360_v19 = vpop.permute.xlu2 %1359 }
 0x430   : > { %v4111_v33 = vpop.eup %3325  ;;  %v1574_v43 = vmul.f32 1.442695, %v1565_v41  ;;  %v1309_v9 = vmul.f32 1.442695, %v1295_v55 }
 0x431   : > { %v1588_v54 = vsel %vm718_vm1, %v4111_v33, 0.0  ;;  %v4117_v24 = vpop.eup %3327 }
 0x432   : > { %3329 = vpow2.f32 %v1574_v43  ;;  %1589 = vadd.xlane.f32.xlu2 %v1588_v54  ;;  %v1325_v7 = vsel %vm718_vm1, %v4117_v24, 0.0 }
 0x433   : > { %3331 = vpow2.f32 %v1303_v10 }
 0x434   : > { %3333 = vpow2.f32 %v1309_v9 }
 0x435   : > { %v1637_v22 = vpop.permute.xlu0 %1636  ;;  %3335 = vrcp.f32 %v1318_v46 }
 0x436   : > { %1661 = vmatpush.bf16.msrb.mxu1 %v1637_v22  ;;  %3337 = vrcp.f32 %v1315_v11  ;;  %v3219_v11 = vld [vmem:[%s4823_s4 + $0x8] sm:$0xff] }
 0x437   : > { %1127 = vmatpush.bf16.msra.mxu3 %v3219_v11 }
 0x438   : > { %v4119_v49 = vpop.eup %3329 }
 0x439   : > { %v1591_v59 = vsel %vm718_vm1, %v4119_v49, 0.0  ;;  %v4127_v29 = vpop.eup %3331 }
 0x43a   : > { %1592 = vadd.xlane.f32.xlu1 %v1591_v59  ;;  %1326 = vadd.xlane.f32.xlu2 %v1325_v7  ;;  %v1322_v56 = vsel %vm718_vm1, %v4127_v29, 0.0  ;;  %v4131_v25 = vpop.eup %3333 }
 0x43b   : > { %v3336_v12 = vpop.eup %3335  ;;  %v1331_v63 = vsel %vm718_vm1, %v4131_v25, 0.0  ;;  %3238 = vmatpush.bf16.msrb.mxu3 %v3854_v42 }
 0x43c   : > { %v3338_v20 = vpop.eup %3337  ;;  %v1346_v1 = vmul.f32 %v3336_v12, %v4028_v17 }
 0x43d   : > { %v1345_v46 = vmul.f32 %v3338_v20, %v4022_v35 }
 0x43f   : > { %v1353_v62 = vpack.c.bf16 %v1346_v1, %v1345_v46  ;;  %v1296_v46 = vsub.f32 %v3963_v47, %v4052_v32 }
 0x443   : > { %1323 = vadd.xlane.f32.xlu0 %v1322_v56 }
 0x445   : > { %v1362_v36 = vpop.permute.xlu1 %1361 }
 0x446   : > { %1386 = vmatpush.bf16.msra.mxu2 %v1362_v36 }
 0x44a   : > { %1387 = vmatpush.bf16.msra.mxu2 %v1360_v19 }
 0x44b   : > { %1332 = vadd.xlane.f32.xlu0 %v1331_v63 }
 0x44e   : > { %1388 = vmatpush.bf16.msra.mxu2 %v1358_v31 }
 0x451   : > { %3097 = vmatmul.msk.bf16.vlgmr.msra.gmra.mxu2 %vm718_vm1, %v1353_v62 }
 0x453   : > { %1632 = vrot.lane.b32.xlu1 %v3791_v5, %s3521_s19 }
 0x460   : > { %v1551_v57 = vpop.xlane.xlu0 %1550 }
 0x461   : > { %v1567_v43 = vsub.f32 %v4064_v14, %v1551_v57 }
 0x463   : > { %v1578_v42 = vmul.f32 1.442695, %v1567_v43 }
 0x468   : > { %v1554_v38 = vpop.xlane.xlu0 %1553 }
 0x469   : > { %v1568_v17 = vsub.f32 %v4068_v61, %v1554_v38  ;;  %v1294_v61 = vsub.f32 %v3945_v15, %v4040_v34  ;;  %v1557_v34 = vpop.xlane.xlu2 %1556  ;;  %v1311_v38 = vmul.f32 1.442695, %v1296_v46 }
 0x46a   : > { %v1569_v36 = vsub.f32 %v4078_v30, %v1557_v34  ;;  %v1091_v43 = vpop.f32.mrf.mxu3 }
 0x46b   : > { %v1580_v13 = vmul.f32 1.442695, %v1568_v17  ;;  %v1307_v15 = vmul.f32 1.442695, %v1294_v61 }
 0x46c   : > { %v1582_v63 = vmul.f32 1.442695, %v1569_v36 }
 0x46d   : > { %3339 = vpow2.f32 %v1580_v13 }
 0x470   : > { %v1548_v35 = vpop.xlane.xlu1 %1547  ;;  %v1560_v26 = vpop.xlane.xlu0 %1559 }
 0x471   : > { %v1566_v41 = vsub.f32 %v4058_v2, %v1548_v35  ;;  %v1570_v31 = vsub.f32 %v4087_v8, %v1560_v26  ;;  %v1321_v61 = vpop.xlane.xlu2 %1320 }
 0x473   : > { %v1576_v44 = vmul.f32 1.442695, %v1566_v41  ;;  %v1584_v54 = vmul.f32 1.442695, %v1570_v31  ;;  %v1076_v10 = vpop.f32.mrf.mxu2  ;;  %v4148_v22 = vpop.eup %3339 }
 0x474   : > { %v1600_v7 = vsel %vm718_vm1, %v4148_v22, 0.0 }
 0x475   : > { %3341 = vpow2.f32 %v1576_v44 }
 0x476   : > { %3343 = vpow2.f32 %v1584_v54 }
 0x477   : > { %3345 = vpow2.f32 %v1578_v42 }
 0x478   : > { %3347 = vpow2.f32 %v1307_v15  ;;  %v1563_v12 = vpop.xlane.xlu0 %1562  ;;  %v3220_v15 = vld [vmem:[%s4823_s4 + $0x10] sm:$0xff] }
 0x479   : > { %3349 = vpow2.f32 %v1582_v63  ;;  %v1571_v47 = vsub.f32 %v4098_v50, %v1563_v12 }
 0x47a   : > { %3351 = vpow2.f32 %v1311_v38 }
 0x47b   : > { %v4150_v55 = vpop.eup %3341  ;;  %v1078_v2 = vpop.f32.mrf.mxu2  ;;  %v1586_v35 = vmul.f32 1.442695, %v1571_v47 }
 0x47c   : > { %v4154_v59 = vpop.eup %3343  ;;  %v1096_v8 = vpack.c.bf16 %v1078_v2, %v1076_v10  ;;  %v1594_v14 = vsel %vm718_vm1, %v4150_v55, 0.0  ;;  %v1093_v10 = vpop.f32.mrf.mxu3 }
 0x47d   : > { %1595 = vadd.xlane.f32.xlu2 %v1594_v14  ;;  %1601 = vadd.xlane.f32.xlu1 %v1600_v7  ;;  %v1606_v9 = vsel %vm718_vm1, %v4154_v59, 0.0  ;;  %v4163_v56 = vpop.eup %3345  ;;  %3353 = vpow2.f32 %v1586_v35  ;;  %v1099_v42 = vpack.c.bf16 %v1093_v10, %v1091_v43 }
 0x47e   : > { %3081 = vmatmul.msk.bf16.vlgmr.msra.gmra.mxu3 %vm664_vm0, %v1096_v8  ;;  %1607 = vadd.xlane.f32.xlu0 %v1606_v9  ;;  %v1597_v20 = vsel %vm718_vm1, %v4163_v56, 0.0  ;;  %v4168_v1 = vpop.eup %3347  ;;  %3355 = vrcp.f32 %v1321_v61  ;;  %v878_v9 = vpack.c.bf16 %v4008_v4, %v4002_v18 }
 0x47f   : > { %v1328_v30 = vsel %vm718_vm1, %v4168_v1, 0.0  ;;  %v4175_v17 = vpop.eup %3349  ;;  %1441 = vmatpush.bf16.msra.mxu3 %v3220_v15 }
 0x480   : > { %v1603_v13 = vsel %vm718_vm1, %v4175_v17, 0.0  ;;  %v4184_v26 = vpop.eup %3351 }
 0x481   : > { %v1334_v50 = vsel %vm718_vm1, %v4184_v26, 0.0 }
 0x483   : > { %v1081_v19 = vpop.f32.mrf.mxu2  ;;  %v4193_v44 = vpop.eup %3353 }
 0x484   : > { %v1609_v54 = vsel %vm718_vm1, %v4193_v44, 0.0  ;;  %v3356_v7 = vpop.eup %3355 }
 0x485   : > { %1598 = vadd.xlane.f32.xlu2 %v1597_v20  ;;  %v1347_v36 = vmul.f32 %v3356_v7, %v4085_v23 }
 0x48b   : > { %v1083_v62 = vpop.f32.mrf.mxu2  ;;  %v1635_v11 = vpop.permute.xlu0 %1634 }
 0x48c   : > { %v1097_v57 = vpack.c.bf16 %v1083_v62, %v1081_v19  ;;  %1662 = vmatpush.bf16.msrb.mxu1 %v1635_v11 }
 0x48d   : > { %1329 = vadd.xlane.f32.xlu2 %v1328_v30 }
 0x48e   : > { %3082 = vmatmul.msk.bf16.gmra.mxu3 %vm664_vm0, %v1097_v57 }
 0x492   : > { %1760 = vrot.lane.b32.xlu0 %v3656_v0, %s3522_s22 }
 0x493   : > { %v1086_v32 = vpop.f32.mrf.mxu2 }
 0x495   : > { %1604 = vadd.xlane.f32.xlu2 %v1603_v13 }
 0x496   : > { %1758 = vrot.lane.b32.xlu1 %v3652_v52, %s3522_s22 }
 0x49a   : > { %2033 = vrot.lane.b32.xlu0 %v3652_v52, %s3523_s23 }
 0x49b   : > { %v1088_v41 = vpop.f32.mrf.mxu2 }
 0x49c   : > { %v1098_v31 = vpack.c.bf16 %v1088_v41, %v1086_v32 }
 0x49d   : > { %1335 = vadd.xlane.f32.xlu2 %v1334_v50 }
 0x49e   : > { %3083 = vmatmul.msk.bf16.gmra.mxu3 %vm664_vm0, %v1098_v31  ;;  %1746 = vrot.lane.b32.xlu1 %v3648_v45, %s3522_s22  ;;  %v3221_v31 = vld [vmem:[%s4823_s4 + $0x18] sm:$0xff] }
 0x49f   : > { %1716 = vmatpush.bf16.msrb.mxu2 %v3221_v31 }
 0x4a2   : > { %1756 = vrot.lane.b32.xlu0 %v3644_v39, %s3522_s22 }
 0x4a5   : > { %1610 = vadd.xlane.f32.xlu2 %v1609_v54  ;;  %v1590_v14 = vpop.xlane.xlu2 %1589 }
 0x4a6   : > { %2023 = vrot.lane.b32.xlu1 %v3682_v28, %s3523_s23 }
 0x4aa   : > { %1754 = vrot.lane.b32.xlu0 %v3674_v16, %s3522_s22 }
 0x4ad   : > { %v1593_v8 = vpop.xlane.xlu1 %1592 }
 0x4ae   : > { %3084 = vmatmul.msk.bf16.gmra.mxu3 %vm664_vm0, %v1099_v42  ;;  %1752 = vrot.lane.b32.xlu1 %v3694_v37, %s3522_s22 }
 0x4b2   : > { %2021 = vrot.lane.b32.xlu0 %v3648_v45, %s3523_s23 }
 0x4b6   : > { %v1324_v2 = vpop.xlane.xlu0 %1323 }
 0x4b7   : > { %3357 = vrcp.f32 %v1324_v2 }
 0x4b8   : > { %3359 = vrcp.f32 %v1593_v8 }
 0x4b9   : > { %3361 = vrcp.f32 %v1590_v14 }
 0x4ba   : > { %1750 = vrot.lane.b32.xlu0 %v3662_v6, %s3522_s22 }
 0x4bd   : > { %v3358_v34 = vpop.eup %3357  ;;  %2035 = vrot.lane.b32.xlu2 %v3656_v0, %s3523_s23 }
 0x4be   : > { %3091 = vmatmul.msk.bf16.vlgmr.msrb.gmra.mxu3 %vm664_vm0, %v878_v9  ;;  %v1348_v12 = vmul.f32 %v3358_v34, %v4127_v29  ;;  %v3360_v19 = vpop.eup %3359  ;;  %v879_v29 = vpack.c.bf16 %v4016_v27, %v4014_v53  ;;  %v1327_v53 = vpop.xlane.xlu2 %1326 }
 0x4bf   : > { %v3362_v63 = vpop.eup %3361  ;;  %v1621_v18 = vmul.f32 %v3360_v19, %v4119_v49  ;;  %v1333_v11 = vpop.xlane.xlu0 %1332 }
 0x4c0   : > { %v1354_v20 = vpack.c.bf16 %v1348_v12, %v1347_v36  ;;  %v1620_v4 = vmul.f32 %v3362_v63, %v4111_v33 }
 0x4c2   : > { %2027 = vrot.lane.b32.xlu0 %v3694_v37, %s3523_s23  ;;  %3098 = vmatmul.msk.bf16.gmra.mxu2 %vm718_vm1, %v1354_v20  ;;  %v1628_v23 = vpack.c.bf16 %v1621_v18, %v1620_v4 }
 0x4c5   : > { %v1633_v46 = vpop.permute.xlu1 %1632  ;;  %2031 = vrot.lane.b32.xlu2 %v3644_v39, %s3523_s23 }
 0x4c6   : > { %1663 = vmatpush.bf16.msrb.mxu1 %v1633_v46 }
 0x4c9   : > { %3113 = vmatmul.msk.bf16.vlgmr.msrb.gmra.mxu1 %vm718_vm1, %v1628_v23 }
 0x4cd   : > { %2029 = vrot.lane.b32.xlu2 %v3674_v16, %s3523_s23 }
 0x4ce   : > { %3092 = vmatmul.msk.bf16.gmra.mxu3 %vm664_vm0, %v879_v29 }
 0x4d4   : > { %v1390_v62 = vpop.f32.mrf.mxu2 }
 0x4d5   : > { %1748 = vrot.lane.b32.xlu2 %v3682_v28, %s3522_s22 }
 0x4dc   : > { %v1392_v33 = vpop.f32.mrf.mxu2 }
 0x4dd   : > { %v1410_v49 = vpack.c.bf16 %v1392_v33, %v1390_v62  ;;  %2025 = vrot.lane.b32.xlu2 %v3662_v6, %s3523_s23 }
 0x4df   : > { %3105 = vmatmul.msk.bf16.vlgmr.msra.gmra.mxu3 %vm664_vm0, %v1410_v49 }
 0x4e5   : > { %1913 = vrot.lane.b32.xlu2 %v3779_v58, %s3522_s22 }
 0x4f0   : > { %v1596_v27 = vpop.xlane.xlu2 %1595  ;;  %v1602_v50 = vpop.xlane.xlu1 %1601 }
 0x4f1   : > { %3363 = vrcp.f32 %v1596_v27  ;;  %v1608_v30 = vpop.xlane.xlu0 %1607 }
 0x4f7   : > { %v3364_v38 = vpop.eup %3363 }
 0x4f8   : > { %v1599_v57 = vpop.xlane.xlu2 %1598  ;;  %v1622_v32 = vmul.f32 %v3364_v38, %v4150_v55 }
 0x4f9   : > { %3365 = vrcp.f32 %v1599_v57 }
 0x4fa   : > { %3367 = vrcp.f32 %v1327_v53 }
 0x4ff   : > { %v3366_v47 = vpop.eup %3365 }
 0x500   : > { %v1623_v13 = vmul.f32 %v3366_v47, %v4163_v56  ;;  %v1330_v35 = vpop.xlane.xlu2 %1329  ;;  %v3368_v10 = vpop.eup %3367 }
 0x501   : > { %v4242_v41 = vpop.f32.mrf.mxu3  ;;  %3369 = vrcp.f32 %v1330_v35  ;;  %v1349_v61 = vmul.f32 %v3368_v10, %v4117_v24 }
 0x502   : > { %v1629_v43 = vpack.c.bf16 %v1623_v13, %v1622_v32  ;;  %3371 = vrcp.f32 %v1602_v50 }
 0x504   : > { %v1761_v54 = vpop.permute.xlu0 %1760  ;;  %3114 = vmatmul.msk.bf16.gmra.mxu1 %vm718_vm1, %v1629_v43 }
 0x505   : > { %v1784_v42 = vsel %vm664_vm0, %v1761_v54, 0 }
 0x506   : > { %1790 = vmatpush.bf16.xpose.msrb.mxu3 %v1784_v42 }
 0x507   : > { %v3370_v55 = vpop.eup %3369 }
 0x508   : > { %v1605_v56 = vpop.xlane.xlu2 %1604  ;;  %v1350_v2 = vmul.f32 %v3370_v55, %v4168_v1  ;;  %v1759_v14 = vpop.permute.xlu1 %1758 }
 0x509   : > { %v4251_v8 = vpop.f32.mrf.mxu3  ;;  %3373 = vrcp.f32 %v1605_v56  ;;  %v3372_v15 = vpop.eup %3371  ;;  %v1781_v34 = vsel %vm664_vm0, %v1759_v14, 0 }
 0x50a   : > { %v1355_v7 = vpack.c.bf16 %v1350_v2, %v1349_v61  ;;  %3375 = vrcp.f32 %v1333_v11  ;;  %v1624_v12 = vmul.f32 %v3372_v15, %v4148_v22 }
 0x50c   : > { %v2034_v9 = vpop.permute.xlu0 %2033  ;;  %3099 = vmatmul.msk.bf16.gmra.mxu2 %vm718_vm1, %v1355_v7 }
 0x50d   : > { %v2056_v32 = vsel %vm664_vm0, %v2034_v9, 0 }
 0x50e   : > { %1791 = vmatpush.bf16.xpose.msrb.mxu3 %v1781_v34 }
 0x50f   : > { %v3374_v36 = vpop.eup %3373 }
 0x510   : > { %v1625_v24 = vmul.f32 %v3374_v36, %v4175_v17  ;;  %v1336_v19 = vpop.xlane.xlu2 %1335  ;;  %v3376_v18 = vpop.eup %3375 }
 0x511   : > { %v4257_v1 = vpop.f32.mrf.mxu3  ;;  %3377 = vrcp.f32 %v1336_v19  ;;  %v1351_v29 = vmul.f32 %v3376_v18, %v4131_v25 }
 0x512   : > { %v1630_v20 = vpack.c.bf16 %v1625_v24, %v1624_v12  ;;  %3379 = vrcp.f32 %v1608_v30  ;;  %v1177_v24 = vadd.f32 %v4019_v40, %v4242_v41 }
 0x514   : > { %v1757_v63 = vpop.permute.xlu0 %1756  ;;  %3115 = vmatmul.msk.bf16.gmra.mxu1 %vm718_vm1, %v1630_v20 }
 0x515   : > { %v1778_v4 = vsel %vm664_vm0, %v1757_v63, 0 }
 0x516   : > { %1792 = vmatpush.bf16.xpose.msrb.mxu3 %v1778_v4 }
 0x517   : > { %v3378_v46 = vpop.eup %3377 }
 0x518   : > { %v1611_v23 = vpop.xlane.xlu2 %1610  ;;  %v1352_v22 = vmul.f32 %v3378_v46, %v4184_v26  ;;  %v3380_v49 = vpop.eup %3379 }
 0x519   : > { %v4263_v17 = vpop.f32.mrf.mxu3  ;;  %3381 = vrcp.f32 %v1611_v23  ;;  %v1626_v11 = vmul.f32 %v3380_v49, %v4154_v59 }
 0x51a   : > { %v1356_v62 = vpack.c.bf16 %v1352_v22, %v1351_v29 }
 0x51c   : > { %v1755_v33 = vpop.permute.xlu0 %1754  ;;  %3100 = vmatmul.msk.bf16.gmra.mxu2 %vm718_vm1, %v1356_v62 }
 0x51d   : > { %v1775_v53 = vsel %vm664_vm0, %v1755_v33, 0 }
 0x51e   : > { %1793 = vmatpush.bf16.xpose.msrb.mxu3 %v1775_v53 }
 0x51f   : > { %v3382_v27 = vpop.eup %3381 }
 0x520   : > { %v1627_v57 = vmul.f32 %v3382_v27, %v4193_v44  ;;  %v2036_v30 = vpop.permute.xlu2 %2035 }
 0x521   : > { %v1139_v25 = vpop.f32.mrf.mxu3  ;;  %v2059_v26 = vsel %vm664_vm0, %v2036_v30, 0 }
 0x522   : > { %2065 = vmatpush.bf16.xpose.msra.mxu2 %v2059_v26  ;;  %v1631_v38 = vpack.c.bf16 %v1627_v57, %v1626_v11  ;;  %v1747_v57 = vpop.permute.xlu1 %1746 }
 0x524   : > { %3116 = vmatmul.msk.bf16.gmra.mxu1 %vm718_vm1, %v1631_v38  ;;  %v2022_v30 = vpop.permute.xlu0 %2021  ;;  %v1182_v38 = vadd.f32 %v4032_v51, %v4257_v1 }
 0x528   : > { %v2032_v47 = vpop.permute.xlu2 %2031 }
 0x529   : > { %v4272_v13 = vpop.f32.mrf.mxu3  ;;  %v2053_v31 = vsel %vm664_vm0, %v2032_v47, 0 }
 0x52a   : > { %2066 = vmatpush.bf16.xpose.msra.mxu2 %v2056_v32 }
 0x530   : > { %v2030_v35 = vpop.permute.xlu2 %2029 }
 0x531   : > { %v1144_v59 = vpop.f32.mrf.mxu3  ;;  %v2050_v50 = vsel %vm664_vm0, %v2030_v35, 0 }
 0x532   : > { %2067 = vmatpush.bf16.xpose.msra.mxu2 %v2053_v31 }
 0x538   : > { %v1749_v44 = vpop.permute.xlu2 %1748 }
 0x539   : > { %v4276_v43 = vpop.f32.mrf.mxu3 }
 0x53a   : > { %2068 = vmatpush.bf16.xpose.msra.mxu2 %v2050_v50 }
 0x540   : > { %v2026_v54 = vpop.permute.xlu2 %2025 }
 0x541   : > { %v1186_v10 = vpop.f32.mrf.mxu3 }
 0x542   : > { %v4278_v42 = vadd.f32 %v1186_v10, %v1139_v25  ;;  %v2024_v25 = vpop.permute.xlu1 %2023 }
 0x545   : > { %v1395_v55 = vpop.f32.mrf.mxu2 }
 0x546   : > { %v1665_v56 = vpop.f32.mrf.mxu1 }
 0x548   : > { %v1914_v61 = vpop.permute.xlu2 %1913 }
 0x549   : > { %v4280_v2 = vpop.f32.mrf.mxu3  ;;  %1935 = vmatpush.bf16.msrb.mxu0 %v1914_v61 }
 0x54a   : > { %v1753_v50 = vpop.permute.xlu1 %1752 }
 0x54d   : > { %v1397_v14 = vpop.f32.mrf.mxu2 }
 0x54e   : > { %v1411_v7 = vpack.c.bf16 %v1397_v14, %v1395_v55  ;;  %v1667_v9 = vpop.f32.mrf.mxu1 }
 0x54f   : > { %v1685_v15 = vpack.c.bf16 %v1667_v9, %v1665_v56 }
 0x550   : > { %3106 = vmatmul.msk.bf16.gmra.mxu3 %vm664_vm0, %v1411_v7 }
 0x551   : > { %v1191_v34 = vpop.f32.mrf.mxu3  ;;  %3121 = vmatmul.msk.bf16.vlgmr.msrb.gmra.mxu2 %vm664_vm0, %v1685_v15 }
 0x552   : > { %v1192_v36 = vadd.f32 %v1191_v34, %v1144_v59  ;;  %v1751_v59 = vpop.permute.xlu0 %1750 }
 0x559   : > { %v4284_v12 = vpop.f32.mrf.mxu3 }
 0x562   : > { %v1443_v19 = vpop.f32.mrf.mxu3 }
 0x563   : > { %v1463_v20 = vadd.f32 %v1443_v19, %v1177_v24 }
 0x56a   : > { %v4296_v26 = vpop.f32.mrf.mxu3 }
 0x581   : > { %v1670_v63 = vpop.f32.mrf.mxu1 }
 0x589   : > { %v1672_v18 = vpop.f32.mrf.mxu1 }
 0x58a   : > { %v1686_v4 = vpack.c.bf16 %v1672_v18, %v1670_v63 }
 0x58c   : > { %3122 = vmatmul.msk.bf16.gmra.mxu2 %vm664_vm0, %v1686_v4 }
 0x58f   : > { %v1400_v46 = vpop.f32.mrf.mxu2 }
 0x591   : > { %v1675_v23 = vpop.f32.mrf.mxu1 }
 0x597   : > { %v1402_v29 = vpop.f32.mrf.mxu2 }
 0x598   : > { %v1412_v22 = vpack.c.bf16 %v1402_v29, %v1400_v46 }
 0x599   : > { %v1677_v62 = vpop.f32.mrf.mxu1 }
 0x59a   : > { %v1687_v33 = vpack.c.bf16 %v1677_v62, %v1675_v23  ;;  %3107 = vmatmul.msk.bf16.gmra.mxu3 %vm664_vm0, %v1412_v22 }
 0x59c   : > { %3123 = vmatmul.msk.bf16.gmra.mxu2 %vm664_vm0, %v1687_v33 }
 0x59f   : > { %v1405_v49 = vpop.f32.mrf.mxu2 }
 0x5a1   : > { %v1680_v53 = vpop.f32.mrf.mxu1 }
 0x5a7   : > { %v1407_v40 = vpop.f32.mrf.mxu2 }
 0x5a8   : > { %v1413_v41 = vpack.c.bf16 %v1407_v40, %v1405_v49 }
 0x5a9   : > { %v1682_v27 = vpop.f32.mrf.mxu1 }
 0x5aa   : > { %v1688_v11 = vpack.c.bf16 %v1682_v27, %v1680_v53  ;;  %3108 = vmatmul.msk.bf16.gmra.mxu3 %vm664_vm0, %v1413_v41 }
 0x5ac   : > { %3124 = vmatmul.msk.bf16.gmra.mxu2 %vm664_vm0, %v1688_v11 }
 0x5ba   : > { %3125 = vmatmul.msk.bf16.vlgmr.msrb.gmra.mxu3 %vm664_vm0, %v1747_v57 }
 0x5bc   : > { %3141 = vmatmul.msk.bf16.vlgmr.msra.gmra.mxu2 %vm664_vm0, %v2022_v30 }
 0x5ca   : > { %3126 = vmatmul.msk.bf16.gmra.mxu3 %vm664_vm0, %v1749_v44  ;;  %v2028_v44 = vpop.permute.xlu0 %2027 }
 0x5cc   : > { %3142 = vmatmul.msk.bf16.gmra.mxu2 %vm664_vm0, %v2024_v25 }
 0x5d3   : > { %v1448_v47 = vpop.f32.mrf.mxu3 }
 0x5d4   : > { %v1465_v32 = vadd.f32 %v1448_v47, %v1182_v38  ;;  %v1718_v35 = vpop.f32.mrf.mxu2 }
 0x5d5   : > { %v4301_v31 = vadd.f32 %v1718_v35, %v1463_v20 }
 0x5da   : > { %3127 = vmatmul.msk.bf16.gmra.mxu3 %vm664_vm0, %v1751_v59 }
 0x5db   : > { %v4311_v1 = vpop.f32.mrf.mxu3 }
 0x5dc   : > { %3143 = vmatmul.msk.bf16.gmra.mxu2 %vm664_vm0, %v2026_v54  ;;  %v4307_v10 = vpop.f32.mrf.mxu2 }
 0x5dd   : > { %4827 = vst [vmem:[#allocation2_spill] sm:$0xff] %v4307_v10 }
 0x5ea   : > { %3128 = vmatmul.msk.bf16.gmra.mxu3 %vm664_vm0, %v1753_v50 }
 0x5ec   : > { %3144 = vmatmul.msk.bf16.gmra.mxu2 %vm664_vm0, %v2028_v44 }
 0x60f   : > { %v1723_v55 = vpop.f32.mrf.mxu2 }
 0x610   : > { %v4309_v51 = vadd.f32 %v1723_v55, %v1465_v32 }
 0x617   : > { %v4313_v56 = vpop.f32.mrf.mxu2 }
 0x61d   : > { %v1453_v61 = vpop.f32.mrf.mxu3 }
 0x61e   : > { %v1467_v14 = vadd.f32 %v1453_v61, %v4278_v42 }
 0x61f   : > { %v1728_v7 = vpop.f32.mrf.mxu2 }
 0x620   : > { %v4316_v54 = vadd.f32 %v1728_v7, %v1467_v14 }
 0x625   : > { %v4318_v9 = vpop.f32.mrf.mxu3 }
 0x627   : > { %v4320_v15 = vpop.f32.mrf.mxu2 }
 0x62d   : > { %v1458_v34 = vpop.f32.mrf.mxu3 }
 0x62e   : > { %v1469_v24 = vadd.f32 %v1458_v34, %v1192_v36 }
 0x62f   : > { %v1733_v19 = vpop.f32.mrf.mxu2 }
 0x630   : > { %v4322_v20 = vadd.f32 %v1733_v19, %v1469_v24 }
 0x635   : > { %v4324_v63 = vpop.f32.mrf.mxu3 }
 0x637   : > { %v4332_v22 = vpop.f32.mrf.mxu2 }
 0x63d   : > { %v1795_v18 = vpop.f32.mrf.mxu3 }
 0x63e   : > { %v1815_v4 = vsel %vm718_vm1, %v1795_v18, -inf }
 0x63f   : > { %1816 = vmax.xlane.f32.xlu2 %v1815_v4  ;;  %v4338_v33 = vpop.f32.mrf.mxu2 }
 0x640   : > { %v2090_v38 = vsel %vm718_vm1, %v4338_v33, -inf }
 0x645   : > { %v1797_v46 = vpop.f32.mrf.mxu3 }
 0x646   : > { %v1818_v42 = vsel %vm718_vm1, %v1797_v46, -inf }
 0x647   : > { %1819 = vmax.xlane.f32.xlu1 %v1818_v42  ;;  %v2072_v40 = vpop.f32.mrf.mxu2 }
 0x648   : > { %v2093_v27 = vsel %vm718_vm1, %v2072_v40, -inf }
 0x64d   : > { %v4328_v23 = vpop.f32.mrf.mxu3 }
 0x64e   : > { %v1821_v29 = vsel %vm718_vm1, %v4328_v23, -inf }
 0x64f   : > { %1822 = vmax.xlane.f32.xlu1 %v1821_v29  ;;  %v4359_v32 = vpop.f32.mrf.mxu2 }
 0x650   : > { %v2096_v35 = vsel %vm718_vm1, %v4359_v32, -inf }
 0x655   : > { %v4334_v36 = vpop.f32.mrf.mxu3 }
 0x656   : > { %v1824_v62 = vsel %vm718_vm1, %v4334_v36, -inf }
 0x657   : > { %1825 = vmax.xlane.f32.xlu2 %v1824_v62  ;;  %v4369_v59 = vpop.f32.mrf.mxu2 }
 0x65d   : > { %v4340_v49 = vpop.f32.mrf.mxu3 }
 0x65e   : > { %v1827_v53 = vsel %vm718_vm1, %v4340_v49, -inf }
 0x65f   : > { %1828 = vmax.xlane.f32.xlu2 %v1827_v53  ;;  %v4371_v50 = vpop.f32.mrf.mxu2 }
 0x665   : > { %v4344_v41 = vpop.f32.mrf.mxu3 }
 0x666   : > { %v1830_v11 = vsel %vm718_vm1, %v4344_v41, -inf }
 0x667   : > { %2094 = vmax.xlane.f32.xlu2 %v2093_v27  ;;  %1831 = vmax.xlane.f32.xlu0 %v1830_v11  ;;  %v4373_v44 = vpop.f32.mrf.mxu2  ;;  %v2099_v27 = vsel %vm718_vm1, %v4369_v59, -inf }
 0x668   : > { %v2105_v55 = vsel %vm718_vm1, %v4373_v44, -inf }
 0x66d   : > { %v4349_v57 = vpop.f32.mrf.mxu3 }
 0x66e   : > { %v1833_v30 = vsel %vm718_vm1, %v4349_v57, -inf }
 0x66f   : > { %1834 = vmax.xlane.f32.xlu0 %v1833_v30  ;;  %v4377_v34 = vpop.f32.mrf.mxu2  ;;  %v2102_v30 = vsel %vm718_vm1, %v4371_v50, -inf }
 0x670   : > { %v2108_v4 = vsel %vm718_vm1, %v4377_v34, -inf }
 0x675   : > { %v4353_v25 = vpop.f32.mrf.mxu3 }
 0x676   : > { %v1836_v47 = vsel %vm718_vm1, %v4353_v25, -inf }
 0x677   : > { %2091 = vmax.xlane.f32.xlu0 %v2090_v38  ;;  %1837 = vmax.xlane.f32.xlu1 %v1836_v47 }
 0x67f   : > { %1911 = vrot.lane.b32.xlu2 %v3781_v21, %s3522_s22  ;;  %2097 = vmax.xlane.f32.xlu0 %v2096_v35  ;;  %v4401_v35 = vpop.f32.mrf.mxu2 }
 0x687   : > { %2186 = vrot.lane.b32.xlu2 %v3781_v21, %s3523_s23 }
 0x693   : > { %2188 = vrot.lane.b32.xlu0 %v3779_v58, %s3523_s23 }
 0x6b0   : > { %2106 = vmax.xlane.f32.xlu2 %v2105_v55 }
 0x6b2   : > { %v1817_v61 = vpop.xlane.xlu2 %1816 }
 0x6b3   : > { %v1839_v14 = vsub.f32 %v1795_v18, %v1817_v61 }
 0x6b5   : > { %v1847_v7 = vmul.f32 1.442695, %v1839_v14  ;;  %v2111_v14 = vsel %vm718_vm1, %v4401_v35, -inf }
 0x6b7   : > { %3383 = vpow2.f32 %v1847_v7 }
 0x6ba   : > { %v1820_v24 = vpop.xlane.xlu1 %1819 }
 0x6bb   : > { %v1840_v19 = vsub.f32 %v1797_v46, %v1820_v24 }
 0x6bd   : > { %v4381_v42 = vpop.eup %3383  ;;  %v1849_v29 = vmul.f32 1.442695, %v1840_v19  ;;  %2109 = vmax.xlane.f32.xlu0 %v2108_v4 }
 0x6be   : > { %v1863_v62 = vsel %vm718_vm1, %v4381_v42, 0.0 }
 0x6bf   : > { %3385 = vpow2.f32 %v1849_v29  ;;  %1864 = vadd.xlane.f32.xlu1 %v1863_v62 }
 0x6c5   : > { %v4385_v53 = vpop.eup %3385 }
 0x6c6   : > { %v1866_v18 = vsel %vm718_vm1, %v4385_v53, 0.0 }
 0x6c7   : > { %1867 = vadd.xlane.f32.xlu1 %v1866_v18 }
 0x6c8   : > { %2184 = vrot.lane.b32.xlu2 %v3788_v3, %s3523_s23 }
 0x6ca   : > { %v1826_v46 = vpop.xlane.xlu2 %1825 }
 0x6cf   : > { %2100 = vmax.xlane.f32.xlu1 %v2099_v27  ;;  %v1842_v27 = vsub.f32 %v4334_v36, %v1826_v46 }
 0x6d0   : > { %1907 = vrot.lane.b32.xlu2 %v3791_v5, %s3522_s22 }
 0x6d2   : > { %v1829_v11 = vpop.xlane.xlu2 %1828 }
 0x6d7   : > { %2103 = vmax.xlane.f32.xlu1 %v2102_v30 }
 0x6d8   : > { %2182 = vrot.lane.b32.xlu2 %v3791_v5, %s3523_s23 }
 0x6da   : > { %v2095_v38 = vpop.xlane.xlu2 %2094  ;;  %v4399_v47 = vpop.xlane.xlu0 %1831 }
 0x6db   : > { %v2115_v55 = vsub.f32 %v2072_v40, %v2095_v38  ;;  %v1843_v40 = vsub.f32 %v4340_v49, %v1829_v11  ;;  %v1853_v38 = vmul.f32 1.442695, %v1842_v27  ;;  %v1823_v27 = vpop.xlane.xlu1 %1822 }
 0x6dd   : > { %v2124_v61 = vmul.f32 1.442695, %v2115_v55  ;;  %v1855_v30 = vmul.f32 1.442695, %v1843_v40 }
 0x6df   : > { %3387 = vpow2.f32 %v2124_v61  ;;  %2112 = vmax.xlane.f32.xlu1 %v2111_v14 }
 0x6e2   : > { %v1912_v7 = vpop.permute.xlu2 %1911  ;;  %v1835_v24 = vpop.xlane.xlu0 %1834 }
 0x6e3   : > { %1936 = vmatpush.bf16.msrb.mxu0 %v1912_v7  ;;  %v1845_v7 = vsub.f32 %v4349_v57, %v1835_v24 }
 0x6e5   : > { %v4405_v19 = vpop.eup %3387  ;;  %v1859_v11 = vmul.f32 1.442695, %v1845_v7 }
 0x6e6   : > { %v2141_v4 = vsel %vm718_vm1, %v4405_v19, 0.0 }
 0x6e7   : > { %2142 = vadd.xlane.f32.xlu1 %v2141_v4 }
 0x6ea   : > { %v2092_v29 = vpop.xlane.xlu0 %2091 }
 0x6eb   : > { %v2114_v62 = vsub.f32 %v4338_v33, %v2092_v29 }
 0x6ed   : > { %v2122_v18 = vmul.f32 1.442695, %v2114_v62 }
 0x6ef   : > { %3389 = vpow2.f32 %v2122_v18  ;;  %v2187_v18 = vpop.permute.xlu2 %2186 }
 0x6f0   : > { %3391 = vpow2.f32 %v1855_v30  ;;  %v1841_v30 = vsub.f32 %v4328_v23, %v1823_v27 }
 0x6f1   : > { %3393 = vpow2.f32 %v1853_v38 }
 0x6f2   : > { %v2098_v55 = vpop.xlane.xlu0 %2097  ;;  %v1851_v38 = vmul.f32 1.442695, %v1841_v30 }
 0x6f3   : > { %v2116_v14 = vsub.f32 %v4359_v32, %v2098_v55 }
 0x6f5   : > { %v4412_v61 = vpop.eup %3389  ;;  %v2126_v49 = vmul.f32 1.442695, %v2116_v14 }
 0x6f6   : > { %v2138_v33 = vsel %vm718_vm1, %v4412_v61, 0.0  ;;  %v4418_v4 = vpop.eup %3391 }
 0x6f7   : > { %2139 = vadd.xlane.f32.xlu0 %v2138_v33  ;;  %v4420_v36 = vpop.eup %3393  ;;  %3395 = vpow2.f32 %v2126_v49  ;;  %v1875_v46 = vsel %vm718_vm1, %v4418_v4, 0.0 }
 0x6f8   : > { %3397 = vpow2.f32 %v1859_v11  ;;  %v1872_v57 = vsel %vm718_vm1, %v4420_v36, 0.0  ;;  %v1838_v11 = vpop.xlane.xlu1 %1837 }
 0x6f9   : > { %3399 = vpow2.f32 %v1851_v38 }
 0x6fd   : > { %v4428_v32 = vpop.eup %3395 }
 0x6fe   : > { %v4430_v24 = vpop.eup %3397  ;;  %v2144_v62 = vsel %vm718_vm1, %v4428_v32, 0.0 }
 0x6ff   : > { %1876 = vadd.xlane.f32.xlu0 %v1875_v46  ;;  %v1881_v40 = vsel %vm718_vm1, %v4430_v24, 0.0  ;;  %v4438_v7 = vpop.eup %3399 }
 0x700   : > { %1909 = vrot.lane.b32.xlu1 %v3788_v3, %s3522_s22  ;;  %v1869_v49 = vsel %vm718_vm1, %v4438_v7, 0.0 }
 0x701   : > { %1873 = vadd.xlane.f32.xlu2 %v1872_v57 }
 0x705   : > { %v2189_v29 = vpop.permute.xlu0 %2188 }
 0x706   : > { %2210 = vmatpush.bf16.msra.mxu3 %v2189_v29 }
 0x707   : > { %2145 = vadd.xlane.f32.xlu0 %v2144_v62 }
 0x709   : > { %1882 = vadd.xlane.f32.xlu2 %v1881_v40 }
 0x70a   : > { %2211 = vmatpush.bf16.msra.mxu3 %v2187_v18 }
 0x723   : > { %v2107_v55 = vpop.xlane.xlu2 %2106 }
 0x724   : > { %v2119_v14 = vsub.f32 %v4373_v44, %v2107_v55 }
 0x726   : > { %v2132_v33 = vmul.f32 1.442695, %v2119_v14 }
 0x728   : > { %3401 = vpow2.f32 %v2132_v33  ;;  %v1844_v33 = vsub.f32 %v4344_v41, %v4399_v47  ;;  %v1846_v41 = vsub.f32 %v4353_v25, %v1838_v11 }
 0x72a   : > { %1870 = vadd.xlane.f32.xlu1 %v1869_v49 }
 0x72b   : > { %v2185_v46 = vpop.permute.xlu2 %2184 }
 0x72c   : > { %2212 = vmatpush.bf16.msra.mxu3 %v2185_v46  ;;  %v1857_v46 = vmul.f32 1.442695, %v1844_v33 }
 0x72e   : > { %v4442_v57 = vpop.eup %3401 }
 0x72f   : > { %v2153_v62 = vsel %vm718_vm1, %v4442_v57, 0.0 }
 0x730   : > { %v2110_v29 = vpop.xlane.xlu0 %2109 }
 0x731   : > { %v2120_v23 = vsub.f32 %v4377_v34, %v2110_v29 }
 0x732   : > { %v1865_v44 = vpop.xlane.xlu1 %1864  ;;  %2154 = vadd.xlane.f32.xlu1 %v2153_v62 }
 0x733   : > { %v2134_v40 = vmul.f32 1.442695, %v2120_v23  ;;  %v4447_v18 = vpop.permute.xlu2 %1907 }
 0x735   : > { %3403 = vpow2.f32 %v2134_v40 }
 0x73a   : > { %v1868_v27 = vpop.xlane.xlu1 %1867 }
 0x73b   : > { %v4449_v30 = vpop.eup %3403  ;;  %v2183_v38 = vpop.permute.xlu2 %2182 }
 0x73c   : > { %2213 = vmatpush.bf16.msra.mxu3 %v2183_v38  ;;  %v2156_v55 = vsel %vm718_vm1, %v4449_v30, 0.0 }
 0x73d   : > { %2157 = vadd.xlane.f32.xlu1 %v2156_v55 }
 0x742   : > { %v2101_v14 = vpop.xlane.xlu1 %2100 }
 0x743   : > { %v2117_v34 = vsub.f32 %v4369_v59, %v2101_v14  ;;  %v1861_v14 = vmul.f32 1.442695, %v1846_v41 }
 0x745   : > { %v2128_v49 = vmul.f32 1.442695, %v2117_v34 }
 0x747   : > { %3405 = vpow2.f32 %v2128_v49 }
 0x748   : > { %3407 = vpow2.f32 %v1857_v46 }
 0x74a   : > { %v2104_v29 = vpop.xlane.xlu1 %2103 }
 0x74b   : > { %v2118_v62 = vsub.f32 %v4371_v50, %v2104_v29 }
 0x74d   : > { %v4456_v23 = vpop.eup %3405  ;;  %v2130_v38 = vmul.f32 1.442695, %v2118_v62 }
 0x74e   : > { %v2147_v40 = vsel %vm718_vm1, %v4456_v23, 0.0  ;;  %v4461_v10 = vpop.eup %3407 }
 0x74f   : > { %2148 = vadd.xlane.f32.xlu0 %v2147_v40  ;;  %3409 = vpow2.f32 %v2130_v38  ;;  %v1878_v50 = vsel %vm718_vm1, %v4461_v10, 0.0 }
 0x752   : > { %v2113_v55 = vpop.xlane.xlu1 %2112 }
 0x753   : > { %v2121_v59 = vsub.f32 %v4401_v35, %v2113_v55 }
 0x755   : > { %v2136_v47 = vmul.f32 1.442695, %v2121_v59  ;;  %v4469_v34 = vpop.eup %3409 }
 0x756   : > { %2308 = vrot.lane.b32.xlu1 %v3652_v52, %s3524_s8  ;;  %v2150_v35 = vsel %vm718_vm1, %v4469_v34, 0.0 }
 0x757   : > { %3411 = vpow2.f32 %v2136_v47  ;;  %1879 = vadd.xlane.f32.xlu0 %v1878_v50 }
 0x758   : > { %3413 = vpow2.f32 %v1861_v14 }
 0x75a   : > { %v2143_v46 = vpop.xlane.xlu1 %2142 }
 0x75b   : > { %3415 = vrcp.f32 %v2143_v46 }
 0x75c   : > { %3417 = vrcp.f32 %v1868_v27 }
 0x75d   : > { %v4471_v33 = vpop.eup %3411 }
 0x75e   : > { %2583 = vrot.lane.b32.xlu1 %v3652_v52, %s3525_s9  ;;  %v2159_v25 = vsel %vm718_vm1, %v4471_v33, 0.0  ;;  %v4479_v11 = vpop.eup %3413 }
 0x75f   : > { %2160 = vadd.xlane.f32.xlu2 %v2159_v25  ;;  %2151 = vadd.xlane.f32.xlu0 %v2150_v35  ;;  %v1884_v49 = vsel %vm718_vm1, %v4479_v11, 0.0 }
 0x761   : > { %v3416_v29 = vpop.eup %3415 }
 0x762   : > { %v3418_v62 = vpop.eup %3417  ;;  %v2171_v59 = vmul.f32 %v3416_v29, %v4405_v19 }
 0x763   : > { %v1896_v47 = vmul.f32 %v3418_v62, %v4385_v53 }
 0x766   : > { %2296 = vrot.lane.b32.xlu1 %v3648_v45, %s3524_s8 }
 0x767   : > { %1885 = vadd.xlane.f32.xlu0 %v1884_v49 }
 0x76a   : > { %v2140_v52 = vpop.xlane.xlu0 %2139 }
 0x76b   : > { %3419 = vrcp.f32 %v2140_v52  ;;  %v3222_v52 = vld [vmem:[%s4823_s4 + $0x20] sm:$0xff] }
 0x76c   : > { %3421 = vrcp.f32 %v1865_v44  ;;  %1991 = vmatpush.bf16.msra.mxu1 %v3222_v52 }
 0x76e   : > { %2298 = vrot.lane.b32.xlu1 %v3682_v28, %s3524_s8 }
 0x771   : > { %v3420_v40 = vpop.eup %3419 }
 0x772   : > { %v1910_v38 = vpop.permute.xlu1 %1909  ;;  %v3422_v55 = vpop.eup %3421  ;;  %v2170_v41 = vmul.f32 %v3420_v40, %v4412_v61 }
 0x773   : > { %1937 = vmatpush.bf16.msrb.mxu0 %v1910_v38  ;;  %v1895_v27 = vmul.f32 %v3422_v55, %v4381_v42 }
 0x774   : > { %v2178_v50 = vpack.c.bf16 %v2171_v59, %v2170_v41 }
 0x775   : > { %v1903_v44 = vpack.c.bf16 %v1896_v47, %v1895_v27 }
 0x776   : > { %2575 = vrot.lane.b32.xlu1 %v3662_v6, %s3525_s9  ;;  %3145 = vmatmul.msk.bf16.vlgmr.msra.gmra.mxu3 %vm718_vm1, %v2178_v50 }
 0x777   : > { %1938 = vmatpush.bf16.msrb.mxu0 %v4447_v18  ;;  %2585 = vrot.lane.b32.xlu2 %v3656_v0, %s3525_s9 }
 0x77a   : > { %3129 = vmatmul.msk.bf16.vlgmr.msrb.gmra.mxu0 %vm718_vm1, %v1903_v44 }
 0x77b   : > { %2310 = vrot.lane.b32.xlu0 %v3656_v0, %s3524_s8  ;;  %v1874_v0 = vpop.xlane.xlu2 %1873 }
 0x77c   : > { %3423 = vrcp.f32 %v1874_v0 }
 0x77e   : > { %2459 = vrot.lane.b32.xlu1 %v3788_v3, %s3524_s8 }
 0x77f   : > { %2304 = vrot.lane.b32.xlu2 %v3674_v16, %s3524_s8 }
 0x783   : > { %2306 = vrot.lane.b32.xlu0 %v3644_v39, %s3524_s8 }
 0x787   : > { %2579 = vrot.lane.b32.xlu2 %v3674_v16, %s3525_s9 }
 0x78b   : > { %2581 = vrot.lane.b32.xlu0 %v3644_v39, %s3525_s9  ;;  %v3424_v39 = vpop.eup %3423 }
 0x78f   : > { %2573 = vrot.lane.b32.xlu2 %v3682_v28, %s3525_s9 }
 0x793   : > { %2571 = vrot.lane.b32.xlu0 %v3648_v45, %s3525_s9  ;;  %v1898_v45 = vmul.f32 %v3424_v39, %v4420_v36 }
 0x797   : > { %2302 = vrot.lane.b32.xlu2 %v3694_v37, %s3524_s8 }
 0x79b   : > { %2300 = vrot.lane.b32.xlu0 %v3662_v6, %s3524_s8  ;;  %v1877_v6 = vpop.xlane.xlu0 %1876 }
 0x79d   : > { %v1871_v42 = vpop.xlane.xlu1 %1870 }
 0x79e   : > { %3425 = vrcp.f32 %v1871_v42 }
 0x79f   : > { %2461 = vrot.lane.b32.xlu2 %v3781_v21, %s3524_s8 }
 0x7a3   : > { %2577 = vrot.lane.b32.xlu0 %v3694_v37, %s3525_s9  ;;  %v2146_v19 = vpop.xlane.xlu0 %2145  ;;  %v3223_v37 = vld [vmem:[%s4823_s4 + $0x28] sm:$0xff] }
 0x7a4   : > { %v3426_v16 = vpop.eup %3425  ;;  %2266 = vmatpush.bf16.msra.mxu0 %v3223_v37  ;;  %3427 = vrcp.f32 %v2146_v19 }
 0x7a5   : > { %v1897_v28 = vmul.f32 %v3426_v16, %v4438_v7  ;;  %v2155_v36 = vpop.xlane.xlu1 %2154 }
 0x7a7   : > { %v1904_v53 = vpack.c.bf16 %v1898_v45, %v1897_v28  ;;  %2738 = vrot.lane.b32.xlu2 %v3779_v58, %s3525_s9 }
 0x7a9   : > { %3130 = vmatmul.msk.bf16.gmra.mxu0 %vm718_vm1, %v1904_v53 }
 0x7aa   : > { %v3428_v7 = vpop.eup %3427 }
 0x7ab   : > { %2463 = vrot.lane.b32.xlu0 %v3779_v58, %s3524_s8  ;;  %v2172_v14 = vmul.f32 %v3428_v7, %v4428_v32  ;;  %v1883_v58 = vpop.xlane.xlu2 %1882 }
 0x7b0   : > { %v2158_v46 = vpop.xlane.xlu1 %2157 }
 0x7b3   : > { %2457 = vrot.lane.b32.xlu0 %v3791_v5, %s3524_s8 }
 0x7c2   : > { %v2149_v61 = vpop.xlane.xlu0 %2148 }
 0x7c3   : > { %3429 = vrcp.f32 %v2149_v61 }
 0x7c4   : > { %3431 = vrcp.f32 %v1877_v6 }
 0x7c8   : > { %v2309_v59 = vpop.permute.xlu1 %2308 }
 0x7c9   : > { %v3430_v18 = vpop.eup %3429 }
 0x7ca   : > { %v2173_v25 = vmul.f32 %v3430_v18, %v4456_v23  ;;  %v1880_v35 = vpop.xlane.xlu0 %1879  ;;  %v3432_v29 = vpop.eup %3431 }
 0x7cb   : > { %3433 = vrcp.f32 %v1880_v35  ;;  %v1899_v40 = vmul.f32 %v3432_v29, %v4418_v4 }
 0x7cc   : > { %v2179_v49 = vpack.c.bf16 %v2173_v25, %v2172_v14  ;;  %3435 = vrcp.f32 %v2155_v36 }
 0x7ce   : > { %3146 = vmatmul.msk.bf16.gmra.mxu3 %vm718_vm1, %v2179_v49 }
 0x7d0   : > { %v2584_v39 = vpop.permute.xlu1 %2583 }
 0x7d1   : > { %v3434_v62 = vpop.eup %3433 }
 0x7d2   : > { %v1900_v32 = vmul.f32 %v3434_v62, %v4461_v10  ;;  %v2161_v38 = vpop.xlane.xlu2 %2160  ;;  %v2152_v23 = vpop.xlane.xlu0 %2151 }
 0x7d3   : > { %3437 = vrcp.f32 %v2152_v23  ;;  %v3436_v41 = vpop.eup %3435 }
 0x7d4   : > { %v1905_v55 = vpack.c.bf16 %v1900_v32, %v1899_v40  ;;  %3439 = vrcp.f32 %v1883_v58  ;;  %v2175_v44 = vmul.f32 %v3436_v41, %v4442_v57  ;;  %v2606_v57 = vsel %vm664_vm0, %v2584_v39, 0 }
 0x7d5   : > { %v2331_v58 = vsel %vm664_vm0, %v2309_v59, 0 }
 0x7d6   : > { %3131 = vmatmul.msk.bf16.gmra.mxu0 %vm718_vm1, %v1905_v55 }
 0x7d8   : > { %v2297_v59 = vpop.permute.xlu1 %2296 }
 0x7d9   : > { %v3438_v47 = vpop.eup %3437 }
 0x7da   : > { %v2586_v50 = vpop.permute.xlu2 %2585  ;;  %v1886_v27 = vpop.xlane.xlu0 %1885  ;;  %v2174_v0 = vmul.f32 %v3438_v47, %v4469_v34 }
 0x7db   : > { %v2609_v4 = vsel %vm664_vm0, %v2586_v50, 0  ;;  %3441 = vrcp.f32 %v1886_v27  ;;  %v3440_v42 = vpop.eup %3439 }
 0x7dc   : > { %2615 = vmatpush.bf16.xpose.msrb.mxu0 %v2609_v4  ;;  %v2180_v10 = vpack.c.bf16 %v2175_v44, %v2174_v0  ;;  %3443 = vrcp.f32 %v2161_v38  ;;  %v1901_v45 = vmul.f32 %v3440_v42, %v4430_v24 }
 0x7dd   : > { %3445 = vrcp.f32 %v2158_v46 }
 0x7de   : > { %3147 = vmatmul.msk.bf16.gmra.mxu3 %vm718_vm1, %v2180_v10 }
 0x7e0   : > { %v2299_v50 = vpop.permute.xlu1 %2298 }
 0x7e1   : > { %v3442_v16 = vpop.eup %3441 }
 0x7e2   : > { %v1902_v28 = vmul.f32 %v3442_v16, %v4479_v11  ;;  %v2305_v53 = vpop.permute.xlu2 %2304  ;;  %v3444_v6 = vpop.eup %3443 }
 0x7e3   : > { %v3446_v19 = vpop.eup %3445  ;;  %v2177_v37 = vmul.f32 %v3444_v6, %v4471_v33  ;;  %v2325_v23 = vsel %vm664_vm0, %v2305_v53, 0 }
 0x7e4   : > { %2616 = vmatpush.bf16.xpose.msrb.mxu0 %v2606_v57  ;;  %v1906_v34 = vpack.c.bf16 %v1902_v28, %v1901_v45  ;;  %v2176_v36 = vmul.f32 %v3446_v19, %v4449_v30 }
 0x7e6   : > { %3132 = vmatmul.msk.bf16.gmra.mxu0 %vm718_vm1, %v1906_v34  ;;  %v2181_v18 = vpack.c.bf16 %v2177_v37, %v2176_v36 }
 0x7e8   : > { %v2576_v44 = vpop.permute.xlu1 %2575 }
 0x7ea   : > { %v2580_v61 = vpop.permute.xlu2 %2579 }
 0x7eb   : > { %v2600_v55 = vsel %vm664_vm0, %v2580_v61, 0 }
 0x7ed   : > { %v2311_v7 = vpop.permute.xlu0 %2310 }
 0x7ee   : > { %v2334_v24 = vsel %vm664_vm0, %v2311_v7, 0  ;;  %3148 = vmatmul.msk.bf16.gmra.mxu3 %vm718_vm1, %v2181_v18 }
 0x7ef   : > { %2340 = vmatpush.bf16.xpose.msrb.mxu1 %v2334_v24 }
 0x7f0   : > { %v2460_v4 = vpop.permute.xlu1 %2459 }
 0x7f2   : > { %v4555_v11 = vpop.permute.xlu2 %2573 }
 0x7f5   : > { %v2307_v14 = vpop.permute.xlu0 %2306 }
 0x7f6   : > { %v2328_v30 = vsel %vm664_vm0, %v2307_v14, 0 }
 0x7f7   : > { %v1940_v25 = vpop.f32.mrf.mxu0  ;;  %2341 = vmatpush.bf16.xpose.msrb.mxu1 %v2331_v58 }
 0x7f9   : > { %v2215_v35 = vpop.f32.mrf.mxu3 }
 0x7fa   : > { %v4558_v49 = vpop.permute.xlu2 %2302 }
 0x7fd   : > { %v2582_v33 = vpop.permute.xlu0 %2581 }
 0x7fe   : > { %v2603_v46 = vsel %vm664_vm0, %v2582_v33, 0 }
 0x7ff   : > { %v1942_v52 = vpop.f32.mrf.mxu0  ;;  %2342 = vmatpush.bf16.xpose.msrb.mxu1 %v2328_v30  ;;  %2617 = vmatpush.bf16.xpose.msrb.mxu0 %v2603_v46 }
 0x800   : > { %v1960_v29 = vpack.c.bf16 %v1942_v52, %v1940_v25 }
 0x801   : > { %v2217_v62 = vpop.f32.mrf.mxu3 }
 0x802   : > { %3137 = vmatmul.msk.bf16.vlgmr.msra.gmra.mxu1 %vm664_vm0, %v1960_v29  ;;  %v2462_v40 = vpop.permute.xlu2 %2461  ;;  %v2235_v32 = vpack.c.bf16 %v2217_v62, %v2215_v35 }
 0x804   : > { %3153 = vmatmul.msk.bf16.vlgmr.msra.gmra.mxu0 %vm664_vm0, %v2235_v32 }
 0x805   : > { %v2572_v38 = vpop.permute.xlu0 %2571 }
 0x807   : > { %2343 = vmatpush.bf16.xpose.msrb.mxu1 %v2325_v23  ;;  %2618 = vmatpush.bf16.xpose.msrb.mxu0 %v2600_v55 }
 0x80a   : > { %v2739_v41 = vpop.permute.xlu2 %2738 }
 0x80d   : > { %v2301_v47 = vpop.permute.xlu0 %2300 }
 0x80f   : > { %2760 = vmatpush.bf16.msra.mxu1 %v2739_v41 }
 0x815   : > { %v2578_v27 = vpop.permute.xlu0 %2577 }
 0x81d   : > { %v2464_v0 = vpop.permute.xlu0 %2463 }
 0x81e   : > { %2485 = vmatpush.bf16.msrb.mxu2 %v2464_v0 }
 0x822   : > { %2486 = vmatpush.bf16.msrb.mxu2 %v2462_v40 }
 0x825   : > { %v2458_v42 = vpop.permute.xlu0 %2457 }
 0x826   : > { %v1945_v10 = vpop.f32.mrf.mxu0  ;;  %2487 = vmatpush.bf16.msrb.mxu2 %v2460_v4 }
 0x82a   : > { %2488 = vmatpush.bf16.msrb.mxu2 %v2458_v42  ;;  %v1194_v42 = vadd.f32 %v4284_v12, %v4276_v43 }
 0x82e   : > { %v1947_v39 = vpop.f32.mrf.mxu0 }
 0x82f   : > { %v1961_v16 = vpack.c.bf16 %v1947_v39, %v1945_v10 }
 0x831   : > { %3138 = vmatmul.msk.bf16.gmra.mxu1 %vm664_vm0, %v1961_v16 }
 0x851   : > { %v2220_v45 = vpop.f32.mrf.mxu3 }
 0x853   : > { %v1950_v28 = vpop.f32.mrf.mxu0 }
 0x859   : > { %v2222_v53 = vpop.f32.mrf.mxu3 }
 0x85a   : > { %v2236_v57 = vpack.c.bf16 %v2222_v53, %v2220_v45 }
 0x85b   : > { %v1952_v34 = vpop.f32.mrf.mxu0 }
 0x85c   : > { %v1962_v6 = vpack.c.bf16 %v1952_v34, %v1950_v28  ;;  %3154 = vmatmul.msk.bf16.gmra.mxu0 %vm664_vm0, %v2236_v57 }
 0x85e   : > { %3139 = vmatmul.msk.bf16.gmra.mxu1 %vm664_vm0, %v1962_v6 }
 0x861   : > { %v2225_v19 = vpop.f32.mrf.mxu3 }
 0x863   : > { %v1955_v37 = vpop.f32.mrf.mxu0 }
 0x869   : > { %v2227_v61 = vpop.f32.mrf.mxu3 }
 0x86a   : > { %v2237_v36 = vpack.c.bf16 %v2227_v61, %v2225_v19 }
 0x86b   : > { %v1957_v7 = vpop.f32.mrf.mxu0 }
 0x86c   : > { %v1963_v18 = vpack.c.bf16 %v1957_v7, %v1955_v37  ;;  %3155 = vmatmul.msk.bf16.gmra.mxu0 %vm664_vm0, %v2237_v36 }
 0x86e   : > { %3140 = vmatmul.msk.bf16.gmra.mxu1 %vm664_vm0, %v1963_v18 }
 0x871   : > { %v2230_v24 = vpop.f32.mrf.mxu3 }
 0x879   : > { %v2232_v14 = vpop.f32.mrf.mxu3 }
 0x87a   : > { %v2238_v58 = vpack.c.bf16 %v2232_v14, %v2230_v24 }
 0x87c   : > { %3156 = vmatmul.msk.bf16.gmra.mxu0 %vm664_vm0, %v2238_v58 }
 0x87e   : > { %3157 = vmatmul.msk.bf16.vlgmr.msrb.gmra.mxu1 %vm664_vm0, %v2297_v59 }
 0x87f   : > { %v1993_v25 = vpop.f32.mrf.mxu1 }
 0x880   : > { %v2013_v35 = vadd.f32 %v1993_v25, %v4301_v31 }
 0x881   : > { %v2268_v33 = vpop.f32.mrf.mxu0 }
 0x882   : > { %v4574_v30 = vadd.f32 %v2268_v33, %v2013_v35 }
 0x887   : > { %v4581_v46 = vpop.f32.mrf.mxu1 }
 0x889   : > { %v4588_v29 = vpop.f32.mrf.mxu0 }
 0x88c   : > { %3173 = vmatmul.msk.bf16.vlgmr.msrb.gmra.mxu0 %vm664_vm0, %v2572_v38 }
 0x88e   : > { %3158 = vmatmul.msk.bf16.gmra.mxu1 %vm664_vm0, %v2299_v50  ;;  %v1189_v50 = vadd.f32 %v4280_v2, %v4272_v13  ;;  %v1470_v13 = vadd.f32 %v4324_v63, %v1194_v42 }
 0x89c   : > { %3174 = vmatmul.msk.bf16.gmra.mxu0 %vm664_vm0, %v4555_v11  ;;  %v1184_v11 = vadd.f32 %v4034_v60, %v4263_v17  ;;  %v1468_v60 = vadd.f32 %v4318_v9, %v1189_v50 }
 0x89e   : > { %3159 = vmatmul.msk.bf16.gmra.mxu1 %vm664_vm0, %v2301_v47  ;;  %v1466_v23 = vadd.f32 %v4311_v1, %v1184_v11 }
 0x8ac   : > { %3175 = vmatmul.msk.bf16.gmra.mxu0 %vm664_vm0, %v2576_v44 }
 0x8ae   : > { %v1998_v52 = vpop.f32.mrf.mxu1  ;;  %3160 = vmatmul.msk.bf16.gmra.mxu1 %vm664_vm0, %v4558_v49  ;;  %v1741_v49 = vadd.f32 %v4313_v56, %v1466_v23 }
 0x8af   : > { %v2015_v31 = vadd.f32 %v1998_v52, %v4309_v51 }
 0x8b6   : > { %v2000_v62 = vpop.f32.mrf.mxu1 }
 0x8b7   : > { %v2016_v59 = vadd.f32 %v2000_v62, %v1741_v49 }
 0x8bc   : > { %3176 = vmatmul.msk.bf16.gmra.mxu0 %vm664_vm0, %v2578_v27 }
 0x8d9   : > { %v2273_v40 = vpop.f32.mrf.mxu0 }
 0x8da   : > { %v4592_v32 = vadd.f32 %v2273_v40, %v2015_v31 }
 0x8db   : > { %v2003_v38 = vpop.f32.mrf.mxu1 }
 0x8dc   : > { %v2017_v55 = vadd.f32 %v2003_v38, %v4316_v54  ;;  %v1743_v54 = vadd.f32 %v4320_v15, %v1468_v60 }
 0x8e1   : > { %v2275_v51 = vpop.f32.mrf.mxu0 }
 0x8e2   : > { %v4597_v41 = vadd.f32 %v2275_v51, %v2016_v59 }
 0x8e3   : > { %v2005_v47 = vpop.f32.mrf.mxu1 }
 0x8e4   : > { %v2018_v0 = vadd.f32 %v2005_v47, %v1743_v54 }
 0x8e9   : > { %v2278_v27 = vpop.f32.mrf.mxu0 }
 0x8ea   : > { %v4602_v17 = vadd.f32 %v2278_v27, %v2017_v55 }
 0x8eb   : > { %v2008_v44 = vpop.f32.mrf.mxu1 }
 0x8ec   : > { %v2019_v1 = vadd.f32 %v2008_v44, %v4322_v20  ;;  %v1745_v20 = vadd.f32 %v4332_v22, %v1470_v13 }
 0x8f1   : > { %v2280_v56 = vpop.f32.mrf.mxu0 }
 0x8f2   : > { %v4606_v4 = vadd.f32 %v2280_v56, %v2018_v0 }
 0x8f3   : > { %v2010_v10 = vpop.f32.mrf.mxu1 }
 0x8f4   : > { %v2020_v15 = vadd.f32 %v2010_v10, %v1745_v20 }
 0x8f9   : > { %v2283_v39 = vpop.f32.mrf.mxu0 }
 0x8fa   : > { %v4611_v2 = vadd.f32 %v2283_v39, %v2019_v1 }
 0x8fb   : > { %v2345_v9 = vpop.f32.mrf.mxu1 }
 0x8fc   : > { %v2365_v16 = vsel %vm718_vm1, %v2345_v9, -inf }
 0x8fd   : > { %2366 = vmax.xlane.f32.xlu1 %v2365_v16 }
 0x901   : > { %v2285_v45 = vpop.f32.mrf.mxu0 }
 0x902   : > { %v4615_v28 = vadd.f32 %v2285_v45, %v2020_v15 }
 0x903   : > { %v2347_v53 = vpop.f32.mrf.mxu1 }
 0x904   : > { %v2368_v57 = vsel %vm718_vm1, %v2347_v53, -inf }
 0x905   : > { %2369 = vmax.xlane.f32.xlu2 %v2368_v57 }
 0x909   : > { %v4618_v43 = vpop.f32.mrf.mxu0 }
 0x90a   : > { %v2640_v18 = vsel %vm718_vm1, %v4618_v43, -inf }
 0x90b   : > { %v4620_v12 = vpop.f32.mrf.mxu1 }
 0x90c   : > { %v2371_v63 = vsel %vm718_vm1, %v4620_v12, -inf }
 0x90d   : > { %2372 = vmax.xlane.f32.xlu1 %v2371_v63 }
 0x911   : > { %v4624_v34 = vpop.f32.mrf.mxu0 }
 0x912   : > { %v2643_v60 = vsel %vm718_vm1, %v4624_v34, -inf }
 0x913   : > { %v2352_v6 = vpop.f32.mrf.mxu1 }
 0x914   : > { %v2374_v22 = vsel %vm718_vm1, %v2352_v6, -inf }
 0x915   : > { %2375 = vmax.xlane.f32.xlu0 %v2374_v22 }
 0x919   : > { %v4627_v19 = vpop.f32.mrf.mxu0 }
 0x91a   : > { %v2646_v0 = vsel %vm718_vm1, %v4627_v19, -inf }
 0x91b   : > { %v2355_v37 = vpop.f32.mrf.mxu1 }
 0x91c   : > { %v2377_v61 = vsel %vm718_vm1, %v2355_v37, -inf }
 0x91d   : > { %2378 = vmax.xlane.f32.xlu0 %v2377_v61 }
 0x921   : > { %v4630_v36 = vpop.f32.mrf.mxu0 }
 0x922   : > { %v2649_v56 = vsel %vm718_vm1, %v4630_v36, -inf }
 0x923   : > { %v2357_v7 = vpop.f32.mrf.mxu1 }
 0x924   : > { %v2380_v24 = vsel %vm718_vm1, %v2357_v7, -inf }
 0x925   : > { %2641 = vmax.xlane.f32.xlu0 %v2640_v18  ;;  %2381 = vmax.xlane.f32.xlu2 %v2380_v24 }
 0x929   : > { %v4635_v14 = vpop.f32.mrf.mxu0 }
 0x92a   : > { %v2652_v20 = vsel %vm718_vm1, %v4635_v14, -inf }
 0x92b   : > { %v4637_v58 = vpop.f32.mrf.mxu1 }
 0x92c   : > { %v2383_v25 = vsel %vm718_vm1, %v4637_v58, -inf }
 0x92d   : > { %2384 = vmax.xlane.f32.xlu2 %v2383_v25 }
 0x931   : > { %v4641_v35 = vpop.f32.mrf.mxu0 }
 0x932   : > { %v2655_v33 = vsel %vm718_vm1, %v4641_v35, -inf }
 0x933   : > { %v4645_v52 = vpop.f32.mrf.mxu1  ;;  %2656 = vmax.xlane.f32.xlu0 %v2655_v33 }
 0x934   : > { %v2386_v31 = vsel %vm718_vm1, %v4645_v52, -inf }
 0x935   : > { %2387 = vmax.xlane.f32.xlu1 %v2386_v31 }
 0x939   : > { %v4649_v62 = vpop.f32.mrf.mxu0 }
 0x93a   : > { %v2658_v61 = vsel %vm718_vm1, %v4649_v62, -inf }
 0x941   : > { %v4651_v40 = vpop.f32.mrf.mxu0 }
 0x942   : > { %v2661_v11 = vsel %vm718_vm1, %v4651_v40, -inf }
 0x943   : > { %2662 = vmax.xlane.f32.xlu0 %v2661_v11 }
 0x957   : > { %2736 = vrot.lane.b32.xlu0 %v3781_v21, %s3525_s9 }
 0x970   : > { %v2367_v38 = vpop.xlane.xlu1 %2366 }
 0x971   : > { %v2389_v23 = vsub.f32 %v2345_v9, %v2367_v38 }
 0x973   : > { %v2397_v55 = vmul.f32 1.442695, %v2389_v23 }
 0x975   : > { %3447 = vpow2.f32 %v2397_v55 }
 0x978   : > { %v2370_v49 = vpop.xlane.xlu2 %2369 }
 0x979   : > { %v2390_v59 = vsub.f32 %v2347_v53, %v2370_v49 }
 0x97b   : > { %v4657_v51 = vpop.eup %3447  ;;  %v2399_v47 = vmul.f32 1.442695, %v2390_v59 }
 0x97c   : > { %v2413_v50 = vsel %vm718_vm1, %v4657_v51, 0.0 }
 0x97d   : > { %3449 = vpow2.f32 %v2399_v47  ;;  %2414 = vadd.xlane.f32.xlu2 %v2413_v50 }
 0x980   : > { %v2373_v10 = vpop.xlane.xlu1 %2372 }
 0x981   : > { %v2391_v9 = vsub.f32 %v4620_v12, %v2373_v10 }
 0x983   : > { %v4661_v27 = vpop.eup %3449  ;;  %v2401_v45 = vmul.f32 1.442695, %v2391_v9 }
 0x984   : > { %v2416_v21 = vsel %vm718_vm1, %v4661_v27, 0.0 }
 0x985   : > { %2644 = vmax.xlane.f32.xlu2 %v2643_v60  ;;  %2417 = vadd.xlane.f32.xlu1 %v2416_v21 }
 0x988   : > { %v2376_v44 = vpop.xlane.xlu0 %2375 }
 0x989   : > { %v2392_v1 = vsub.f32 %v2352_v6, %v2376_v44 }
 0x98b   : > { %v2403_v54 = vmul.f32 1.442695, %v2392_v1 }
 0x98d   : > { %3451 = vpow2.f32 %v2403_v54  ;;  %2647 = vmax.xlane.f32.xlu2 %v2646_v0  ;;  %2650 = vmax.xlane.f32.xlu1 %v2649_v56 }
 0x990   : > { %v2379_v42 = vpop.xlane.xlu0 %2378 }
 0x991   : > { %v2393_v39 = vsub.f32 %v2355_v37, %v2379_v42 }
 0x993   : > { %v4671_v13 = vpop.eup %3451  ;;  %v2405_v16 = vmul.f32 1.442695, %v2393_v39 }
 0x994   : > { %v2422_v15 = vsel %vm718_vm1, %v4671_v13, 0.0 }
 0x995   : > { %3453 = vpow2.f32 %v2405_v16  ;;  %2653 = vmax.xlane.f32.xlu1 %v2652_v20  ;;  %2423 = vadd.xlane.f32.xlu0 %v2422_v15 }
 0x996   : > { %3455 = vpow2.f32 %v2401_v45 }
 0x998   : > { %v2382_v53 = vpop.xlane.xlu2 %2381  ;;  %v2642_v57 = vpop.xlane.xlu0 %2641 }
 0x999   : > { %v2394_v63 = vsub.f32 %v2357_v7, %v2382_v53  ;;  %v2664_v6 = vsub.f32 %v4618_v43, %v2642_v57 }
 0x99b   : > { %v4679_v22 = vpop.eup %3453  ;;  %v2407_v12 = vmul.f32 1.442695, %v2394_v63  ;;  %v2672_v37 = vmul.f32 1.442695, %v2664_v6 }
 0x99c   : > { %v2425_v18 = vsel %vm718_vm1, %v4679_v22, 0.0  ;;  %v4685_v24 = vpop.eup %3455 }
 0x99d   : > { %3457 = vpow2.f32 %v2407_v12  ;;  %2659 = vmax.xlane.f32.xlu1 %v2658_v61  ;;  %2426 = vadd.xlane.f32.xlu0 %v2425_v18  ;;  %v2419_v25 = vsel %vm718_vm1, %v4685_v24, 0.0 }
 0x99e   : > { %3459 = vpow2.f32 %v2672_v37 }
 0x9a0   : > { %v2385_v55 = vpop.xlane.xlu2 %2384 }
 0x9a1   : > { %v2395_v15 = vsub.f32 %v4637_v58, %v2385_v55 }
 0x9a3   : > { %v4687_v7 = vpop.eup %3457  ;;  %v2409_v57 = vmul.f32 1.442695, %v2395_v15 }
 0x9a4   : > { %v4689_v43 = vpop.eup %3459  ;;  %v2428_v33 = vsel %vm718_vm1, %v4687_v7, 0.0 }
 0x9a5   : > { %2420 = vadd.xlane.f32.xlu1 %v2419_v25  ;;  %2429 = vadd.xlane.f32.xlu0 %v2428_v33  ;;  %v2688_v31 = vsel %vm718_vm1, %v4689_v43, 0.0 }
 0x9a6   : > { %2689 = vadd.xlane.f32.xlu2 %v2688_v31  ;;  %v2657_v11 = vpop.xlane.xlu0 %2656 }
 0x9a7   : > { %v2669_v9 = vsub.f32 %v4641_v35, %v2657_v11 }
 0x9a8   : > { %v2388_v49 = vpop.xlane.xlu1 %2387 }
 0x9a9   : > { %v2396_v45 = vsub.f32 %v4645_v52, %v2388_v49 }
 0x9ab   : > { %v2411_v6 = vmul.f32 1.442695, %v2396_v45 }
 0x9b6   : > { %v4699_v38 = vpop.xlane.xlu0 %2662 }
 0x9be   : > { %2734 = vrot.lane.b32.xlu2 %v3788_v3, %s3525_s9 }
 0x9c9   : > { %v2737_v23 = vpop.permute.xlu0 %2736 }
 0x9ca   : > { %2761 = vmatpush.bf16.msra.mxu1 %v2737_v23 }
 0x9f0   : > { %v2415_v59 = vpop.xlane.xlu2 %2414 }
 0x9f1   : > { %3461 = vrcp.f32 %v2415_v59 }
 0x9f7   : > { %v3462_v44 = vpop.eup %3461 }
 0x9f8   : > { %v2645_v47 = vpop.xlane.xlu2 %2644  ;;  %v2418_v50 = vpop.xlane.xlu1 %2417  ;;  %v2445_v54 = vmul.f32 %v3462_v44, %v4657_v51  ;;  %v2682_v51 = vmul.f32 1.442695, %v2669_v9  ;;  %v2671_v9 = vsub.f32 %v4651_v40, %v4699_v38 }
 0x9f9   : > { %v2665_v60 = vsub.f32 %v4624_v34, %v2645_v47  ;;  %3463 = vrcp.f32 %v2418_v50 }
 0x9fb   : > { %v2674_v21 = vmul.f32 1.442695, %v2665_v60 }
 0x9fd   : > { %3465 = vpow2.f32 %v2674_v21 }
 0x9ff   : > { %v3464_v1 = vpop.eup %3463 }
 0xa00   : > { %v2446_v3 = vmul.f32 %v3464_v1, %v4661_v27  ;;  %v2648_v0 = vpop.xlane.xlu2 %2647  ;;  %v4704_v56 = vpop.xlane.xlu1 %2650 }
 0xa01   : > { %v2666_v10 = vsub.f32 %v4627_v19, %v2648_v0 }
 0xa02   : > { %v2453_v42 = vpack.c.bf16 %v2446_v3, %v2445_v54 }
 0xa03   : > { %v4707_v39 = vpop.eup %3465  ;;  %v2676_v34 = vmul.f32 1.442695, %v2666_v10  ;;  %v2667_v10 = vsub.f32 %v4630_v36, %v4704_v56  ;;  %v3224_v36 = vld [vmem:[%s4823_s4 + $0x30] sm:$0xff] }
 0xa04   : > { %3161 = vmatmul.msk.bf16.vlgmr.msrb.gmra.mxu2 %vm718_vm1, %v2453_v42  ;;  %v2691_v16 = vsel %vm718_vm1, %v4707_v39, 0.0  ;;  %2541 = vmatpush.bf16.msrb.mxu3 %v3224_v36 }
 0xa05   : > { %3467 = vpow2.f32 %v2676_v34  ;;  %2692 = vadd.xlane.f32.xlu1 %v2691_v16  ;;  %v2678_v42 = vmul.f32 1.442695, %v2667_v10  ;;  %v2686_v34 = vmul.f32 1.442695, %v2671_v9 }
 0xa06   : > { %3469 = vpow2.f32 %v2682_v51 }
 0xa08   : > { %v2654_v27 = vpop.xlane.xlu1 %2653  ;;  %v2424_v63 = vpop.xlane.xlu0 %2423 }
 0xa09   : > { %v2668_v20 = vsub.f32 %v4635_v14, %v2654_v27 }
 0xa0b   : > { %v4715_v19 = vpop.eup %3467  ;;  %v2680_v35 = vmul.f32 1.442695, %v2668_v20 }
 0xa0c   : > { %v2694_v53 = vsel %vm718_vm1, %v4715_v19, 0.0  ;;  %v4720_v37 = vpop.eup %3469 }
 0xa0d   : > { %3471 = vpow2.f32 %v2680_v35  ;;  %2695 = vadd.xlane.f32.xlu2 %v2694_v53  ;;  %v2703_v61 = vsel %vm718_vm1, %v4720_v37, 0.0 }
 0xa0e   : > { %3473 = vpow2.f32 %v2409_v57 }
 0xa0f   : > { %3475 = vpow2.f32 %v2411_v6 }
 0xa10   : > { %v2660_v12 = vpop.xlane.xlu1 %2659  ;;  %3477 = vrcp.f32 %v2424_v63  ;;  %v2427_v33 = vpop.xlane.xlu0 %2426 }
 0xa11   : > { %v2670_v58 = vsub.f32 %v4649_v62, %v2660_v12 }
 0xa13   : > { %v4722_v14 = vpop.eup %3471  ;;  %v2684_v18 = vmul.f32 1.442695, %v2670_v58 }
 0xa14   : > { %v2700_v52 = vsel %vm718_vm1, %v4722_v14, 0.0  ;;  %v4729_v25 = vpop.eup %3473 }
 0xa15   : > { %2701 = vadd.xlane.f32.xlu0 %v2700_v52  ;;  %2704 = vadd.xlane.f32.xlu2 %v2703_v61  ;;  %v4731_v11 = vpop.eup %3475  ;;  %v2431_v62 = vsel %vm718_vm1, %v4729_v25, 0.0 }
 0xa16   : > { %v2434_v55 = vsel %vm718_vm1, %v4731_v11, 0.0  ;;  %v3478_v49 = vpop.eup %3477 }
 0xa17   : > { %v2448_v47 = vmul.f32 %v3478_v49, %v4671_v13 }
 0xa18   : > { %v2421_v31 = vpop.xlane.xlu1 %2420  ;;  %v2430_v44 = vpop.xlane.xlu0 %2429 }
 0xa19   : > { %3479 = vrcp.f32 %v2421_v31  ;;  %v2690_v23 = vpop.xlane.xlu2 %2689 }
 0xa1a   : > { %3481 = vpow2.f32 %v2684_v18 }
 0xa1b   : > { %3483 = vrcp.f32 %v2430_v44 }
 0xa1c   : > { %3485 = vrcp.f32 %v2427_v33 }
 0xa1d   : > { %2432 = vadd.xlane.f32.xlu0 %v2431_v62  ;;  %2435 = vadd.xlane.f32.xlu2 %v2434_v55  ;;  %3487 = vpow2.f32 %v2678_v42 }
 0xa1e   : > { %2732 = vrot.lane.b32.xlu1 %v3791_v5, %s3525_s9  ;;  %3489 = vpow2.f32 %v2686_v34 }
 0xa1f   : > { %v3480_v59 = vpop.eup %3479 }
 0xa20   : > { %v2447_v50 = vmul.f32 %v3480_v59, %v4685_v24  ;;  %v4741_v60 = vpop.eup %3481 }
 0xa21   : > { %v2735_v21 = vpop.permute.xlu2 %2734  ;;  %v2706_v54 = vsel %vm718_vm1, %v4741_v60, 0.0  ;;  %v3484_v5 = vpop.eup %3483 }
 0xa22   : > { %2762 = vmatpush.bf16.msra.mxu1 %v2735_v21  ;;  %v2454_v1 = vpack.c.bf16 %v2448_v47, %v2447_v50  ;;  %v3486_v3 = vpop.eup %3485  ;;  %v2450_v13 = vmul.f32 %v3484_v5, %v4687_v7 }
 0xa23   : > { %v2449_v24 = vmul.f32 %v3486_v3, %v4679_v22  ;;  %v3488_v16 = vpop.eup %3487  ;;  %v3225_v3 = vld [vmem:[%s4823_s4 + $0x38] sm:$0xff] }
 0xa24   : > { %3162 = vmatmul.msk.bf16.gmra.mxu2 %vm718_vm1, %v2454_v1  ;;  %v2697_v51 = vsel %vm718_vm1, %v3488_v16, 0.0  ;;  %v4754_v7 = vpop.eup %3489 }
 0xa25   : > { %2707 = vadd.xlane.f32.xlu0 %v2706_v54  ;;  %v2455_v0 = vpack.c.bf16 %v2450_v13, %v2449_v24  ;;  %v2709_v22 = vsel %vm718_vm1, %v4754_v7, 0.0  ;;  %2816 = vmatpush.bf16.msra.mxu2 %v3225_v3 }
 0xa34   : > { %3163 = vmatmul.msk.bf16.gmra.mxu2 %vm718_vm1, %v2455_v0 }
 0xa48   : > { %2698 = vadd.xlane.f32.xlu1 %v2697_v51 }
 0xa50   : > { %2710 = vadd.xlane.f32.xlu1 %v2709_v22 }
 0xa78   : > { %v2693_v40 = vpop.xlane.xlu1 %2692 }
 0xa79   : > { %3491 = vrcp.f32 %v2693_v40 }
 0xa7a   : > { %3493 = vrcp.f32 %v2690_v23 }
 0xa7f   : > { %v3492_v15 = vpop.eup %3491 }
 0xa80   : > { %v2696_v56 = vpop.xlane.xlu2 %2695  ;;  %v3494_v45 = vpop.eup %3493  ;;  %v2721_v35 = vmul.f32 %v3492_v15, %v4707_v39 }
 0xa81   : > { %v2720_v6 = vmul.f32 %v3494_v45, %v4689_v43 }
 0xa83   : > { %v2728_v31 = vpack.c.bf16 %v2721_v35, %v2720_v6  ;;  %v4828_v6 = vld [vmem:[#allocation2_spill] sm:$0xff] }
 0xa87   : > { %v2490_v38 = vpop.f32.mrf.mxu2 }
 0xa88   : > { %v2705_v27 = vpop.xlane.xlu2 %2704  ;;  %v2702_v20 = vpop.xlane.xlu0 %2701 }
 0xa89   : > { %3495 = vrcp.f32 %v2705_v27 }
 0xa8a   : > { %3497 = vrcp.f32 %v2702_v20 }
 0xa8f   : > { %v3496_v53 = vpop.eup %3495  ;;  %v2492_v57 = vpop.f32.mrf.mxu2 }
 0xa90   : > { %v3498_v63 = vpop.eup %3497  ;;  %v2725_v12 = vmul.f32 %v3496_v53, %v4720_v37  ;;  %v2510_v58 = vpack.c.bf16 %v2492_v57, %v2490_v38  ;;  %v2733_v52 = vpop.permute.xlu1 %2732  ;;  %v1179_v57 = vadd.f32 %v4026_v48, %v4251_v8 }
 0xa91   : > { %v2436_v61 = vpop.xlane.xlu2 %2435  ;;  %v2724_v18 = vmul.f32 %v3498_v63, %v4722_v14  ;;  %v2433_v33 = vpop.xlane.xlu0 %2432  ;;  %2763 = vmatpush.bf16.msra.mxu1 %v2733_v52  ;;  %v3254_v52 = vld [vmem:[%s4824_s5] ss:$0 sm:$0xff] }
 0xa92   : > { %3499 = vrcp.f32 %v2436_v61  ;;  %3169 = vmatmul.msk.bf16.vlgmr.msrb.gmra.mxu3 %vm664_vm0, %v2510_v58  ;;  %v1464_v63 = vadd.f32 %v4296_v26, %v1179_v57 }
 0xa93   : > { %3501 = vrcp.f32 %v2433_v33  ;;  %v2730_v39 = vpack.c.bf16 %v2725_v12, %v2724_v18 }
 0xa94   : > { %3177 = vmatmul.msk.bf16.vlgmr.msra.gmra.mxu1 %vm718_vm1, %v2728_v31  ;;  %3503 = vrcp.f32 %v2696_v56  ;;  %v1739_v12 = vadd.f32 %v4828_v6, %v1464_v63 }
 0xa96   : > { %v2014_v18 = vadd.f32 %v4581_v46, %v1739_v12 }
 0xa98   : > { %v3500_v23 = vpop.eup %3499  ;;  %v2289_v26 = vadd.f32 %v4588_v29, %v2014_v18 }
 0xa99   : > { %v3502_v62 = vpop.eup %3501  ;;  %v2452_v43 = vmul.f32 %v3500_v23, %v4731_v11  ;;  %v2708_v24 = vpop.xlane.xlu0 %2707 }
 0xa9a   : > { %v2451_v37 = vmul.f32 %v3502_v62, %v4729_v25  ;;  %v3504_v44 = vpop.eup %3503 }
 0xa9b   : > { %v2722_v25 = vmul.f32 %v3504_v44, %v4715_v19 }
 0xa9c   : > { %v2456_v55 = vpack.c.bf16 %v2452_v43, %v2451_v37 }
 0xa9e   : > { %3164 = vmatmul.msk.bf16.gmra.mxu2 %vm718_vm1, %v2456_v55 }
 0xaa7   : > { %v2495_v14 = vpop.f32.mrf.mxu2 }
 0xaaf   : > { %v2497_v49 = vpop.f32.mrf.mxu2 }
 0xab0   : > { %v2511_v59 = vpack.c.bf16 %v2497_v49, %v2495_v14 }
 0xab2   : > { %3170 = vmatmul.msk.bf16.gmra.mxu3 %vm664_vm0, %v2511_v59 }
 0xab7   : > { %v2500_v47 = vpop.f32.mrf.mxu2 }
 0xabb   : > { %v2699_v50 = vpop.xlane.xlu1 %2698 }
 0xabc   : > { %3505 = vrcp.f32 %v2699_v50 }
 0xabf   : > { %v2502_v21 = vpop.f32.mrf.mxu2 }
 0xac0   : > { %v2512_v1 = vpack.c.bf16 %v2502_v21, %v2500_v47 }
 0xac2   : > { %v3506_v54 = vpop.eup %3505  ;;  %3171 = vmatmul.msk.bf16.gmra.mxu3 %vm664_vm0, %v2512_v1 }
 0xac3   : > { %v2723_v11 = vmul.f32 %v3506_v54, %v3488_v16  ;;  %v2711_v13 = vpop.xlane.xlu1 %2710 }
 0xac4   : > { %3507 = vrcp.f32 %v2711_v13 }
 0xac5   : > { %v2729_v5 = vpack.c.bf16 %v2723_v11, %v2722_v25  ;;  %3509 = vrcp.f32 %v2708_v24 }
 0xac7   : > { %3178 = vmatmul.msk.bf16.gmra.mxu1 %vm718_vm1, %v2729_v5 }
 0xaca   : > { %v3508_v0 = vpop.eup %3507 }
 0xacb   : > { %v3510_v10 = vpop.eup %3509  ;;  %v2727_v42 = vmul.f32 %v3508_v0, %v4754_v7 }
 0xacc   : > { %v2726_v19 = vmul.f32 %v3510_v10, %v4741_v60 }
 0xace   : > { %v2731_v9 = vpack.c.bf16 %v2727_v42, %v2726_v19 }
 0xad7   : > { %3179 = vmatmul.msk.bf16.gmra.mxu1 %vm718_vm1, %v2730_v39 }
 0xae7   : > { %3180 = vmatmul.msk.bf16.gmra.mxu1 %vm718_vm1, %v2731_v9 }
 0xb11   : > { %v2765_v34 = vpop.f32.mrf.mxu1 }
 0xb15   : > { %v2543_v53 = vpop.f32.mrf.mxu3 }
 0xb16   : > { %v2563_v58 = vadd.f32 %v2543_v53, %v4574_v30 }
 0xb19   : > { %v2767_v16 = vpop.f32.mrf.mxu1 }
 0xb1a   : > { %v2785_v51 = vpack.c.bf16 %v2767_v16, %v2765_v34 }
 0xb1c   : > { %3185 = vmatmul.msk.bf16.vlgmr.msra.gmra.mxu2 %vm664_vm0, %v2785_v51 }
 0xb1d   : > { %v2545_v8 = vpop.f32.mrf.mxu3 }
 0xb1e   : > { %v2564_v30 = vadd.f32 %v2545_v8, %v2289_v26 }
 0xb21   : > { %v2505_v22 = vpop.f32.mrf.mxu2 }
 0xb29   : > { %v2507_v36 = vpop.f32.mrf.mxu2 }
 0xb2a   : > { %v2513_v56 = vpack.c.bf16 %v2507_v36, %v2505_v22 }
 0xb2c   : > { %3172 = vmatmul.msk.bf16.gmra.mxu3 %vm664_vm0, %v2513_v56 }
 0xb35   : > { %v2548_v46 = vpop.f32.mrf.mxu3 }
 0xb36   : > { %v2565_v43 = vadd.f32 %v2548_v46, %v4592_v32 }
 0xb3d   : > { %v2550_v62 = vpop.f32.mrf.mxu3 }
 0xb3e   : > { %v2566_v49 = vadd.f32 %v2550_v62, %v4597_v41 }
 0xb44   : > { %v2770_v40 = vpop.f32.mrf.mxu1 }
 0xb45   : > { %v2553_v59 = vpop.f32.mrf.mxu3 }
 0xb46   : > { %v2567_v21 = vadd.f32 %v2553_v59, %v4602_v17 }
 0xb4c   : > { %v2772_v38 = vpop.f32.mrf.mxu1 }
 0xb4d   : > { %v2786_v27 = vpack.c.bf16 %v2772_v38, %v2770_v40  ;;  %v2555_v54 = vpop.f32.mrf.mxu3 }
 0xb4e   : > { %v2568_v25 = vadd.f32 %v2555_v54, %v4606_v4 }
 0xb4f   : > { %3186 = vmatmul.msk.bf16.gmra.mxu2 %vm664_vm0, %v2786_v27 }
 0xb54   : > { %v2775_v7 = vpop.f32.mrf.mxu1 }
 0xb5c   : > { %v2777_v60 = vpop.f32.mrf.mxu1 }
 0xb5d   : > { %v2787_v20 = vpack.c.bf16 %v2777_v60, %v2775_v7 }
 0xb5f   : > { %3187 = vmatmul.msk.bf16.gmra.mxu2 %vm664_vm0, %v2787_v20 }
 0xb64   : > { %v2780_v15 = vpop.f32.mrf.mxu1 }
 0xb6c   : > { %v2782_v45 = vpop.f32.mrf.mxu1 }
 0xb6d   : > { %v2788_v35 = vpack.c.bf16 %v2782_v45, %v2780_v15 }
 0xb6f   : > { %3188 = vmatmul.msk.bf16.gmra.mxu2 %vm664_vm0, %v2788_v35 }
 0xb9f   : > { %v2818_v61 = vpop.f32.mrf.mxu2 }
 0xba0   : > { %v2838_v33 = vadd.f32 %v2818_v61, %v2563_v58 }
 0xba2   : > { %v2850_v48 = vadd.f32 %v3254_v52, %v2838_v33 }
 0xba4   : > { %2858 = vst [vmem:[%s4799_s18] sm:$0xff] %v2850_v48 }
 0xba7   : > { %v2820_v31 = vpop.f32.mrf.mxu2 }
 0xba8   : > { %v2839_v39 = vadd.f32 %v2820_v31, %v2564_v30 }
 0xbaa   : > { %v2851_v23 = vadd.f32 %v3254_v52, %v2839_v39 }
 0xbac   : > { %2859 = vst [vmem:[%s4799_s18 + $0x8] sm:$0xff] %v2851_v23 }
 0xbaf   : > { %v2558_v41 = vpop.f32.mrf.mxu3 }
 0xbb0   : > { %v2569_v13 = vadd.f32 %v2558_v41, %v4611_v2 }
 0xbb7   : > { %v2560_v17 = vpop.f32.mrf.mxu3 }
 0xbb8   : > { %v2570_v42 = vadd.f32 %v2560_v17, %v4615_v28 }
 0xbd2   : > { %v2823_v37 = vpop.f32.mrf.mxu2 }
 0xbd3   : > { %v2840_v55 = vadd.f32 %v2823_v37, %v2565_v43 }
 0xbd5   : > { %v2852_v14 = vadd.f32 %v3254_v52, %v2840_v55 }
 0xbd7   : > { %2860 = vst [vmem:[%s4799_s18 + $0x10] sm:$0xff] %v2852_v14 }
 0xbda   : > { %v2825_v29 = vpop.f32.mrf.mxu2 }
 0xbdb   : > { %v2841_v47 = vadd.f32 %v2825_v29, %v2566_v49 }
 0xbdd   : > { %v2853_v50 = vadd.f32 %v3254_v52, %v2841_v47 }
 0xbdf   : > { %2861 = vst [vmem:[%s4799_s18 + $0x18] sm:$0xff] %v2853_v50 }
 0xbe2   : > { %v2828_v44 = vpop.f32.mrf.mxu2 }
 0xbe3   : > { %v2842_v1 = vadd.f32 %v2828_v44, %v2567_v21 }
 0xbe5   : > { %v2854_v32 = vadd.f32 %v3254_v52, %v2842_v1 }
 0xbe7   : > { %2862 = vst [vmem:[%s4799_s18 + $0x20] sm:$0xff] %v2854_v32 }
 0xbea   : > { %v2830_v11 = vpop.f32.mrf.mxu2 }
 0xbeb   : > { %v2843_v5 = vadd.f32 %v2830_v11, %v2568_v25 }
 0xbed   : > { %v2855_v3 = vadd.f32 %v3254_v52, %v2843_v5 }
 0xbef   : > { %2863 = vst [vmem:[%s4799_s18 + $0x28] sm:$0xff] %v2855_v3 }
 0xbf2   : > { %v2833_v24 = vpop.f32.mrf.mxu2 }
 0xbf3   : > { %v2844_v0 = vadd.f32 %v2833_v24, %v2569_v13 }
 0xbf5   : > { %v2856_v10 = vadd.f32 %v3254_v52, %v2844_v0 }
 0xbf7   : > { %2864 = vst [vmem:[%s4799_s18 + $0x30] sm:$0xff] %v2856_v10 }
 0xbfa   : > { %v2835_v19 = vpop.f32.mrf.mxu2 }
 0xbfb   : > { %v2845_v9 = vadd.f32 %v2835_v19, %v2570_v42 }
 0xbfd   : > { %v2857_v34 = vadd.f32 %v3254_v52, %v2845_v9 }
 0xbff   : > { %2865 = vst [vmem:[%s4799_s18 + $0x38] sm:$0xff] %v2857_v34 }
 0xc00 PF: > { %s18_s24 = sadd.s32 1, %s3517_s24  }
 0xc01   : > { %p15_p4 = scmp.ge.s32.totalorder %s18_s24, 4  }
 0xc03   :  { %17 = sbr.rel (!%p15_p4) target bundleno = 1 (0x1), region = 86 }

</bundles_post_ra>
